<compile_context>
chip_gen: v7x
topology: tpu7x:2x2x1
jax: 0.10.0
libtpu: 0.0.40
codegen_flags: <defaults>
</compile_context>

<pallas_src>
import math
import functools

import jax
import jax.numpy as jnp
from jax import lax
from jax.experimental import pallas as pl
from jax.experimental.pallas import tpu as pltpu


def _vit_attention_kernel(
    x_ref,      # (1, S_pad, H)  bf16  -- full sequence, block index invariant in qi
    wq_ref,     # (H, H) bf16 (in, out), pre-scaled by 1/sqrt(head_dim)
    bq_ref,     # (1, H) f32   pre-scaled by 1/sqrt(head_dim)
    wk_ref,     # (H, H) bf16
    bk_ref,     # (1, H) f32
    wv_ref,     # (H, H) bf16
    bv_ref,     # (1, H) f32
    wo_ref,     # (H, H) bf16
    bo_ref,     # (1, H) f32
    o_ref,      # (1, TQ, H) bf16
    q_s,        # (TQ, H)    bf16 VMEM scratch
    k_s,        # (S_pad, H) bf16 VMEM scratch (persists across the qi axis)
    v_s,        # (S_pad, H) bf16 VMEM scratch (persists across the qi axis)
    *,
    num_heads: int,
    head_dim: int,
    seq_len: int,
    q_tile: int,
):
    qi = pl.program_id(1)
    s_pad = x_ref.shape[1]

    # --- K/V projections: once per batch element, cached in VMEM scratch ----
    # (full-lane-width stores; reused for every query tile of this batch row).
    @pl.when(qi == 0)
    def _():
        x = x_ref[0]                                     # (S_pad, H) bf16
        k = jnp.dot(x, wk_ref[...], preferred_element_type=jnp.float32) + bk_ref[0]
        v = jnp.dot(x, wv_ref[...], preferred_element_type=jnp.float32) + bv_ref[0]
        k_s[...] = k.astype(jnp.bfloat16)
        v_s[...] = v.astype(jnp.bfloat16)

    # --- Q projection for this query tile (scale folded into wq/bq) ---------
    q_start = pl.multiple_of(qi * q_tile, q_tile)
    x_q = x_ref[0, pl.ds(q_start, q_tile), :]            # (TQ, H) bf16
    q = jnp.dot(x_q, wq_ref[...], preferred_element_type=jnp.float32) + bq_ref[0]
    q_s[...] = q.astype(jnp.bfloat16)                    # one full-lane store

    # Key-validity mask for padded sequence positions (static shape).
    if seq_len < s_pad:
        key_valid = lax.broadcasted_iota(jnp.int32, (1, s_pad), 1) < seq_len
    else:
        key_valid = None

    # --- per-head attention over the (TQ, S_pad) tile ------------------------
    parts = []
    for h in range(num_heads):
        lo = h * head_dim
        hi = lo + head_dim
        # Static ref slices: sub-tile addressing pushed into the load (no
        # value-slice relayout copies).
        q_h = q_s[:, lo:hi]                              # (TQ, hd) bf16
        k_h = k_s[:, lo:hi]                              # (S_pad, hd) bf16
        v_h = v_s[:, lo:hi]                              # (S_pad, hd) bf16

        # scores = q_h @ k_h^T  (scale already folded into wq/bq)
        scores = lax.dot_general(
            q_h, k_h, (((1,), (1,)), ((), ())),
            preferred_element_type=jnp.float32)          # (TQ, S_pad) f32
        if key_valid is not None:
            scores = jnp.where(key_valid, scores, jnp.float32(-1e30))

        # stable, *unnormalized* softmax
        m = jnp.max(scores, axis=-1, keepdims=True)
        p = jnp.exp(scores - m)                          # f32
        denom = jnp.sum(p, axis=-1, keepdims=True)       # f32
        # (attention-probs dropout: identity in eval mode)

        ctx_h = lax.dot_general(
            p.astype(jnp.bfloat16), v_h, (((1,), (0,)), ((), ())),
            preferred_element_type=jnp.float32)          # (TQ, hd) f32
        # deferred normalization (EUP reciprocal)
        ctx_h = ctx_h * pl.reciprocal(denom, approx=True)
        parts.append(ctx_h.astype(jnp.bfloat16))

    # Merge heads with a single lane-dense concatenation (no masked sub-lane
    # stores) and feed the output dense directly.
    ctx = jnp.concatenate(parts, axis=-1)                # (TQ, H) bf16

    # --- output dense (ViTSelfOutput), full-H contraction --------------------
    out = jnp.dot(ctx, wo_ref[...],
                  preferred_element_type=jnp.float32) + bo_ref[0]
    # (hidden dropout: identity in eval mode)

    o_ref[0] = out.astype(o_ref.dtype)


def _vmem_limit_bytes(s_pad, q_tile, hidden):
    """Derive a VMEM budget from the actual buffer shapes instead of a fixed 32 MiB."""
    bf16 = 2
    need = (
        2 * s_pad * hidden * bf16            # x block, double-buffered
        + 2 * 4 * hidden * hidden * bf16     # 4 weight matrices, double-buffered
        + 2 * 4 * hidden * 4                 # 4 f32 biases, double-buffered
        + 2 * q_tile * hidden * bf16         # output block, double-buffered
        + (q_tile + 2 * s_pad) * hidden * bf16   # q/k/v VMEM scratch
        + 8 * q_tile * s_pad                 # scores / probs working set (f32 + bf16)
    )
    limit = int(need) * 3 // 2 + (8 << 20)   # 1.5x + headroom for compiler scratch
    try:
        cap = int(pltpu.get_tpu_info().vmem_capacity_bytes) * 3 // 4
    except Exception:
        cap = 48 << 20                       # safe on every generation (v7x: 64 MiB)
    return max(16 << 20, min(limit, cap))


def vit_attention(x, params, *, num_heads, q_tile=128):
    """x: (B, S, H) float32. params: dict of f32 weights/biases in (in, out) layout."""
    B, S, H = x.shape
    head_dim = H // num_heads
    scale = 1.0 / math.sqrt(head_dim)

    # Pad S to a lane-dense multiple of 128; padded keys are masked in-kernel.
    s_pad = pl.cdiv(S, 128) * 128
    q_tile = min(q_tile, s_pad)
    num_q_blocks = s_pad // q_tile

    x_p = x if s_pad == S else jnp.pad(x, ((0, 0), (0, s_pad - S), (0, 0)))
    x_bf = x_p.astype(jnp.bfloat16)

    # bf16 weights; fold the attention scale into the query projection;
    # biases stay f32 (added after f32 accumulation).  Under jit these casts
    # are folded once per compile, not per call.
    wq = (params["wq"] * scale).astype(jnp.bfloat16)
    bq = params["bq"] * scale
    wk = params["wk"].astype(jnp.bfloat16)
    bk = params["bk"]
    wv = params["wv"].astype(jnp.bfloat16)
    bv = params["bv"]
    wo = params["wo"].astype(jnp.bfloat16)
    bo = params["bo"]

    kernel = functools.partial(
        _vit_attention_kernel,
        num_heads=num_heads, head_dim=head_dim, seq_len=S, q_tile=q_tile)

    # Grid-invariant index maps => weights stay resident across the grid.
    full_w = pl.BlockSpec((H, H), lambda b, qi: (0, 0))
    full_b = pl.BlockSpec((1, H), lambda b, qi: (0, 0))

    out = pl.pallas_call(
        kernel,
        # bf16 output: halves HBM writeback; cast back in the wrapper.
        out_shape=jax.ShapeDtypeStruct((B, s_pad, H), jnp.bfloat16),
        grid_spec=pltpu.PrefetchScalarGridSpec(
            num_scalar_prefetch=0,
            grid=(B, num_q_blocks),
            in_specs=[
                pl.BlockSpec((1, s_pad, H), lambda b, qi: (b, 0, 0)),  # x (full seq)
                full_w, full_b,                                        # query
                full_w, full_b,                                        # key
                full_w, full_b,                                        # value
                full_w, full_b,                                        # output dense
            ],
            out_specs=pl.BlockSpec((1, q_tile, H), lambda b, qi: (b, qi, 0)),
            scratch_shapes=[
                pltpu.VMEM((q_tile, H), jnp.bfloat16),   # q tile
                pltpu.VMEM((s_pad, H), jnp.bfloat16),    # K cache (per batch row)
                pltpu.VMEM((s_pad, H), jnp.bfloat16),    # V cache (per batch row)
            ],
        ),
        compiler_params=pltpu.CompilerParams(
            # qi is "arbitrary" because K/V scratch is reused across it; the
            # batch axis is sharded across TensorCores on megacore parts.
            dimension_semantics=("parallel", "arbitrary"),
            vmem_limit_bytes=_vmem_limit_bytes(s_pad, q_tile, H),
        ),
    )(x_bf, wq, bq, wk, bk, wv, bv, wo, bo)

    return out[:, :S, :].astype(x.dtype)


def _reference(x, params, *, num_heads):
    """Pure-JAX f32 reference mirroring the PyTorch forward (eval mode)."""
    B, S, H = x.shape
    hd = H // num_heads
    q = x @ params["wq"] + params["bq"][0]
    k = x @ params["wk"] + params["bk"][0]
    v = x @ params["wv"] + params["bv"][0]

    def split(t):  # (B,S,H) -> (B,nh,S,hd)
        return t.reshape(B, S, num_heads, hd).transpose(0, 2, 1, 3)

    q, k, v = split(q), split(k), split(v)
    scores = jnp.einsum("bhqd,bhkd->bhqk", q, k) / math.sqrt(hd)
    probs = jax.nn.softmax(scores, axis=-1)
    ctx = jnp.einsum("bhqk,bhkd->bhqd", probs, v)
    ctx = ctx.transpose(0, 2, 1, 3).reshape(B, S, H)
    return ctx @ params["wo"] + params["bo"][0]


def _init_params(key, hidden):
    keys = jax.random.split(key, 8)
    s = 0.02
    p = {}
    for i, name in enumerate(["q", "k", "v", "o"]):
        # nn.Linear weight is (out, in); store transposed (in, out) for x @ W.
        w = jax.random.normal(keys[2 * i], (hidden, hidden), jnp.float32) * s
        b = jax.random.normal(keys[2 * i + 1], (1, hidden), jnp.float32) * s
        p[f"w{name}"] = w
        p[f"b{name}"] = b
    return p


if __name__ == "__main__":
    B, S, H = 2, 8, 32
    NUM_HEADS = 4

    key = jax.random.PRNGKey(0)
    kx, kp = jax.random.split(key)
    x = jax.random.normal(kx, (B, S, H), jnp.float32)
    params = _init_params(kp, H)

    # jit the wrapper so the bf16 casts / scale folding are compiled once.
    vit_fn = jax.jit(functools.partial(vit_attention, num_heads=NUM_HEADS))
    out = jax.block_until_ready(vit_fn(x, params))

    ref = _reference(x, params, num_heads=NUM_HEADS)
    assert out.shape == (B, S, H)
    # bf16 matmul inputs / bf16 output + approx reciprocal => loosened tol.
    assert jnp.allclose(out, ref, atol=5e-3, rtol=1e-2), (
        f"max abs err {jnp.max(jnp.abs(out - ref))}"
    )
    print("KERNEL_OK")
</pallas_src>

<mosaic_0001>
module attributes {stable_mosaic.version = 11 : i64} {
  func.func @_vit_attention_kernel(%arg0: i32, %arg1: i32, %arg2: memref<1x128x32xbf16, #tpu.memory_space<vmem>>, %arg3: memref<32x32xbf16, #tpu.memory_space<vmem>>, %arg4: memref<1x32xf32, #tpu.memory_space<vmem>>, %arg5: memref<32x32xbf16, #tpu.memory_space<vmem>>, %arg6: memref<1x32xf32, #tpu.memory_space<vmem>>, %arg7: memref<32x32xbf16, #tpu.memory_space<vmem>>, %arg8: memref<1x32xf32, #tpu.memory_space<vmem>>, %arg9: memref<32x32xbf16, #tpu.memory_space<vmem>>, %arg10: memref<1x32xf32, #tpu.memory_space<vmem>>, %arg11: memref<1x128x32xbf16, #tpu.memory_space<vmem>>, %arg12: memref<128x32xbf16, #tpu.memory_space<vmem>>, %arg13: memref<128x32xbf16, #tpu.memory_space<vmem>>, %arg14: memref<128x32xbf16, #tpu.memory_space<vmem>>) attributes {dimension_semantics = [#tpu.dimension_semantics<parallel>, #tpu.dimension_semantics<arbitrary>], iteration_bounds = array<i64: 2, 1>, scalar_prefetch = 0 : i64, scratch_operands = 3 : i64, tpu.core_type = #tpu.core_type<tc>, window_params = [{transform_indices = @transform_0, window_bounds = array<i64: 1, 128, 32>}, {pipeline_mode = #tpu.pipeline_mode<synchronous>, transform_indices = @transform_1, window_bounds = array<i64: 32, 32>}, {pipeline_mode = #tpu.pipeline_mode<synchronous>, transform_indices = @transform_2, window_bounds = array<i64: 1, 32>}, {pipeline_mode = #tpu.pipeline_mode<synchronous>, transform_indices = @transform_3, window_bounds = array<i64: 32, 32>}, {pipeline_mode = #tpu.pipeline_mode<synchronous>, transform_indices = @transform_4, window_bounds = array<i64: 1, 32>}, {pipeline_mode = #tpu.pipeline_mode<synchronous>, transform_indices = @transform_5, window_bounds = array<i64: 32, 32>}, {pipeline_mode = #tpu.pipeline_mode<synchronous>, transform_indices = @transform_6, window_bounds = array<i64: 1, 32>}, {pipeline_mode = #tpu.pipeline_mode<synchronous>, transform_indices = @transform_7, window_bounds = array<i64: 32, 32>}, {pipeline_mode = #tpu.pipeline_mode<synchronous>, transform_indices = @transform_8, window_bounds = array<i64: 1, 32>}, {transform_indices = @transform_9, window_bounds = array<i64: 1, 128, 32>}]} {
    %c0_i32 = arith.constant 0 : i32
    %0 = arith.cmpi eq, %arg1, %c0_i32 : i32
    %1 = arith.extui %0 : i1 to i32
    %c0_i32_0 = arith.constant 0 : i32
    %2 = arith.cmpi ne, %1, %c0_i32_0 : i32
    scf.if %2 {
      %c0_57 = arith.constant 0 : index
      %c0_58 = arith.constant 0 : index
      %c0_59 = arith.constant 0 : index
      %116 = vector.load %arg2[%c0_57, %c0_58, %c0_59] : memref<1x128x32xbf16, #tpu.memory_space<vmem>>, vector<1x128x32xbf16>
      %117 = vector.shape_cast %116 : vector<1x128x32xbf16> to vector<128x32xbf16>
      %c0_60 = arith.constant 0 : index
      %c0_61 = arith.constant 0 : index
      %118 = vector.load %arg5[%c0_60, %c0_61] : memref<32x32xbf16, #tpu.memory_space<vmem>>, vector<32x32xbf16>
      %cst_62 = arith.constant dense<0.000000e+00> : vector<128x32xf32>
      %119 = tpu.matmul %117, %118, %cst_62 {dimension_numbers = #tpu.dot_dimension_numbers<[1], [0], [0], [1], [0, 0, 1, 1], [], []>} : vector<128x32xbf16>, vector<32x32xbf16>, vector<128x32xf32> -> vector<128x32xf32>
      %c0_63 = arith.constant 0 : index
      %c0_64 = arith.constant 0 : index
      %120 = vector.load %arg6[%c0_63, %c0_64] : memref<1x32xf32, #tpu.memory_space<vmem>>, vector<1x32xf32>
      %121 = vector.shape_cast %120 : vector<1x32xf32> to vector<32xf32>
      %122 = vector.shape_cast %121 : vector<32xf32> to vector<1x32xf32>
      %123 = vector.broadcast %122 : vector<1x32xf32> to vector<128x32xf32>
      %124 = arith.addf %119, %123 : vector<128x32xf32>
      %c0_65 = arith.constant 0 : index
      %c0_66 = arith.constant 0 : index
      %125 = vector.load %arg7[%c0_65, %c0_66] : memref<32x32xbf16, #tpu.memory_space<vmem>>, vector<32x32xbf16>
      %cst_67 = arith.constant dense<0.000000e+00> : vector<128x32xf32>
      %126 = tpu.matmul %117, %125, %cst_67 {dimension_numbers = #tpu.dot_dimension_numbers<[1], [0], [0], [1], [0, 0, 1, 1], [], []>} : vector<128x32xbf16>, vector<32x32xbf16>, vector<128x32xf32> -> vector<128x32xf32>
      %c0_68 = arith.constant 0 : index
      %c0_69 = arith.constant 0 : index
      %127 = vector.load %arg8[%c0_68, %c0_69] : memref<1x32xf32, #tpu.memory_space<vmem>>, vector<1x32xf32>
      %128 = vector.shape_cast %127 : vector<1x32xf32> to vector<32xf32>
      %129 = vector.shape_cast %128 : vector<32xf32> to vector<1x32xf32>
      %130 = vector.broadcast %129 : vector<1x32xf32> to vector<128x32xf32>
      %131 = arith.addf %126, %130 : vector<128x32xf32>
      %132 = arith.truncf %124 : vector<128x32xf32> to vector<128x32xbf16>
      %c0_70 = arith.constant 0 : index
      %c0_71 = arith.constant 0 : index
      %133 = vector.load %arg13[%c0_70, %c0_71] : memref<128x32xbf16, #tpu.memory_space<vmem>>, vector<128x32xbf16>
      tpu.vector_store %arg13[%c0_70, %c0_71], %132 {strides = array<i32>} : memref<128x32xbf16, #tpu.memory_space<vmem>>, vector<128x32xbf16>,
      %134 = arith.truncf %131 : vector<128x32xf32> to vector<128x32xbf16>
      %c0_72 = arith.constant 0 : index
      %c0_73 = arith.constant 0 : index
      %135 = vector.load %arg14[%c0_72, %c0_73] : memref<128x32xbf16, #tpu.memory_space<vmem>>, vector<128x32xbf16>
      tpu.vector_store %arg14[%c0_72, %c0_73], %134 {strides = array<i32>} : memref<128x32xbf16, #tpu.memory_space<vmem>>, vector<128x32xbf16>,
    } else {
    }
    %c128_i32 = arith.constant 128 : i32
    %3 = arith.muli %arg1, %c128_i32 : i32
    %4 = tpu.assume_multiple %3, 128 : i32
    %c0 = arith.constant 0 : index
    %5 = arith.index_cast %4 : i32 to index
    %c0_1 = arith.constant 0 : index
    %6 = vector.load %arg2[%c0, %5, %c0_1] : memref<1x128x32xbf16, #tpu.memory_space<vmem>>, vector<1x128x32xbf16>
    %7 = vector.shape_cast %6 : vector<1x128x32xbf16> to vector<128x32xbf16>
    %c0_2 = arith.constant 0 : index
    %c0_3 = arith.constant 0 : index
    %8 = vector.load %arg3[%c0_2, %c0_3] : memref<32x32xbf16, #tpu.memory_space<vmem>>, vector<32x32xbf16>
    %cst = arith.constant dense<0.000000e+00> : vector<128x32xf32>
    %9 = tpu.matmul %7, %8, %cst {dimension_numbers = #tpu.dot_dimension_numbers<[1], [0], [0], [1], [0, 0, 1, 1], [], []>} : vector<128x32xbf16>, vector<32x32xbf16>, vector<128x32xf32> -> vector<128x32xf32>
    %c0_4 = arith.constant 0 : index
    %c0_5 = arith.constant 0 : index
    %10 = vector.load %arg4[%c0_4, %c0_5] : memref<1x32xf32, #tpu.memory_space<vmem>>, vector<1x32xf32>
    %11 = vector.shape_cast %10 : vector<1x32xf32> to vector<32xf32>
    %12 = vector.shape_cast %11 : vector<32xf32> to vector<1x32xf32>
    %13 = vector.broadcast %12 : vector<1x32xf32> to vector<128x32xf32>
    %14 = arith.addf %9, %13 : vector<128x32xf32>
    %15 = arith.truncf %14 : vector<128x32xf32> to vector<128x32xbf16>
    %c0_6 = arith.constant 0 : index
    %c0_7 = arith.constant 0 : index
    %16 = vector.load %arg12[%c0_6, %c0_7] : memref<128x32xbf16, #tpu.memory_space<vmem>>, vector<128x32xbf16>
    tpu.vector_store %arg12[%c0_6, %c0_7], %15 {strides = array<i32>} : memref<128x32xbf16, #tpu.memory_space<vmem>>, vector<128x32xbf16>,
    %17 = tpu.iota {dimensions = array<i32: 1>} : vector<1x128xi32>
    %c8_i32 = arith.constant 8 : i32
    %18 = vector.broadcast %c8_i32 : i32 to vector<1x128xi32>
    %19 = arith.cmpi slt, %17, %18 : vector<1x128xi32>
    %c0_8 = arith.constant 0 : index
    %c0_9 = arith.constant 0 : index
    %20 = vector.load %arg12[%c0_8, %c0_9] : memref<128x32xbf16, #tpu.memory_space<vmem>>, vector<128x8xbf16>
    %c0_10 = arith.constant 0 : index
    %c0_11 = arith.constant 0 : index
    %21 = vector.load %arg13[%c0_10, %c0_11] : memref<128x32xbf16, #tpu.memory_space<vmem>>, vector<128x8xbf16>
    %c0_12 = arith.constant 0 : index
    %c0_13 = arith.constant 0 : index
    %22 = vector.load %arg14[%c0_12, %c0_13] : memref<128x32xbf16, #tpu.memory_space<vmem>>, vector<128x8xbf16>
    %cst_14 = arith.constant dense<0.000000e+00> : vector<128x128xf32>
    %23 = tpu.matmul %20, %21, %cst_14 {dimension_numbers = #tpu.dot_dimension_numbers<[1], [1], [0], [0], [0, 0, 1, 0], [], []>} : vector<128x8xbf16>, vector<128x8xbf16>, vector<128x128xf32> -> vector<128x128xf32>
    %cst_15 = arith.constant -1.000000e+30 : f32
    %24 = vector.shape_cast %19 : vector<1x128xi1> to vector<1x128xi1>
    %25 = vector.broadcast %24 : vector<1x128xi1> to vector<128x128xi1>
    %26 = vector.broadcast %cst_15 : f32 to vector<128x128xf32>
    %27 = arith.select %25, %23, %26 : vector<128x128xi1>, vector<128x128xf32>
    %cst_16 = arith.constant dense<0xFF800000> : vector<128xf32>
    %28 = vector.multi_reduction <maximumf>, %27, %cst_16 [1] : vector<128x128xf32> to vector<128xf32>
    %29 = vector.shape_cast %28 : vector<128xf32> to vector<128x1xf32>
    %30 = vector.broadcast %29 : vector<128x1xf32> to vector<128x128xf32>
    %31 = arith.subf %27, %30 : vector<128x128xf32>
    %32 = math.exp %31 : vector<128x128xf32>
    %cst_17 = arith.constant dense<0.000000e+00> : vector<128xf32>
    %33 = vector.multi_reduction <add>, %32, %cst_17 [1] : vector<128x128xf32> to vector<128xf32>
    %34 = vector.shape_cast %33 : vector<128xf32> to vector<128x1xf32>
    %35 = arith.truncf %32 : vector<128x128xf32> to vector<128x128xbf16>
    %cst_18 = arith.constant dense<0.000000e+00> : vector<128x8xf32>
    %36 = tpu.matmul %35, %22, %cst_18 {dimension_numbers = #tpu.dot_dimension_numbers<[1], [0], [0], [1], [0, 0, 1, 1], [], []>} : vector<128x128xbf16>, vector<128x8xbf16>, vector<128x8xf32> -> vector<128x8xf32>
    %37 = tpu.reciprocal %34 {approx = true} : vector<128x1xf32> -> vector<128x1xf32>
    %38 = vector.broadcast %37 : vector<128x1xf32> to vector<128x8xf32>
    %39 = arith.mulf %36, %38 : vector<128x8xf32>
    %40 = arith.truncf %39 : vector<128x8xf32> to vector<128x8xbf16>
    %c0_19 = arith.constant 0 : index
    %c8 = arith.constant 8 : index
    %41 = vector.load %arg12[%c0_19, %c8] : memref<128x32xbf16, #tpu.memory_space<vmem>>, vector<128x8xbf16>
    %c0_20 = arith.constant 0 : index
    %c8_21 = arith.constant 8 : index
    %42 = vector.load %arg13[%c0_20, %c8_21] : memref<128x32xbf16, #tpu.memory_space<vmem>>, vector<128x8xbf16>
    %c0_22 = arith.constant 0 : index
    %c8_23 = arith.constant 8 : index
    %43 = vector.load %arg14[%c0_22, %c8_23] : memref<128x32xbf16, #tpu.memory_space<vmem>>, vector<128x8xbf16>
    %cst_24 = arith.constant dense<0.000000e+00> : vector<128x128xf32>
    %44 = tpu.matmul %41, %42, %cst_24 {dimension_numbers = #tpu.dot_dimension_numbers<[1], [1], [0], [0], [0, 0, 1, 0], [], []>} : vector<128x8xbf16>, vector<128x8xbf16>, vector<128x128xf32> -> vector<128x128xf32>
    %cst_25 = arith.constant -1.000000e+30 : f32
    %45 = vector.shape_cast %19 : vector<1x128xi1> to vector<1x128xi1>
    %46 = vector.broadcast %45 : vector<1x128xi1> to vector<128x128xi1>
    %47 = vector.broadcast %cst_25 : f32 to vector<128x128xf32>
    %48 = arith.select %46, %44, %47 : vector<128x128xi1>, vector<128x128xf32>
    %cst_26 = arith.constant dense<0xFF800000> : vector<128xf32>
    %49 = vector.multi_reduction <maximumf>, %48, %cst_26 [1] : vector<128x128xf32> to vector<128xf32>
    %50 = vector.shape_cast %49 : vector<128xf32> to vector<128x1xf32>
    %51 = vector.broadcast %50 : vector<128x1xf32> to vector<128x128xf32>
    %52 = arith.subf %48, %51 : vector<128x128xf32>
    %53 = math.exp %52 : vector<128x128xf32>
    %cst_27 = arith.constant dense<0.000000e+00> : vector<128xf32>
    %54 = vector.multi_reduction <add>, %53, %cst_27 [1] : vector<128x128xf32> to vector<128xf32>
    %55 = vector.shape_cast %54 : vector<128xf32> to vector<128x1xf32>
    %56 = arith.truncf %53 : vector<128x128xf32> to vector<128x128xbf16>
    %cst_28 = arith.constant dense<0.000000e+00> : vector<128x8xf32>
    %57 = tpu.matmul %56, %43, %cst_28 {dimension_numbers = #tpu.dot_dimension_numbers<[1], [0], [0], [1], [0, 0, 1, 1], [], []>} : vector<128x128xbf16>, vector<128x8xbf16>, vector<128x8xf32> -> vector<128x8xf32>
    %58 = tpu.reciprocal %55 {approx = true} : vector<128x1xf32> -> vector<128x1xf32>
    %59 = vector.broadcast %58 : vector<128x1xf32> to vector<128x8xf32>
    %60 = arith.mulf %57, %59 : vector<128x8xf32>
    %61 = arith.truncf %60 : vector<128x8xf32> to vector<128x8xbf16>
    %c0_29 = arith.constant 0 : index
    %c16 = arith.constant 16 : index
    %62 = vector.load %arg12[%c0_29, %c16] : memref<128x32xbf16, #tpu.memory_space<vmem>>, vector<128x8xbf16>
    %c0_30 = arith.constant 0 : index
    %c16_31 = arith.constant 16 : index
    %63 = vector.load %arg13[%c0_30, %c16_31] : memref<128x32xbf16, #tpu.memory_space<vmem>>, vector<128x8xbf16>
    %c0_32 = arith.constant 0 : index
    %c16_33 = arith.constant 16 : index
    %64 = vector.load %arg14[%c0_32, %c16_33] : memref<128x32xbf16, #tpu.memory_space<vmem>>, vector<128x8xbf16>
    %cst_34 = arith.constant dense<0.000000e+00> : vector<128x128xf32>
    %65 = tpu.matmul %62, %63, %cst_34 {dimension_numbers = #tpu.dot_dimension_numbers<[1], [1], [0], [0], [0, 0, 1, 0], [], []>} : vector<128x8xbf16>, vector<128x8xbf16>, vector<128x128xf32> -> vector<128x128xf32>
    %cst_35 = arith.constant -1.000000e+30 : f32
    %66 = vector.shape_cast %19 : vector<1x128xi1> to vector<1x128xi1>
    %67 = vector.broadcast %66 : vector<1x128xi1> to vector<128x128xi1>
    %68 = vector.broadcast %cst_35 : f32 to vector<128x128xf32>
    %69 = arith.select %67, %65, %68 : vector<128x128xi1>, vector<128x128xf32>
    %cst_36 = arith.constant dense<0xFF800000> : vector<128xf32>
    %70 = vector.multi_reduction <maximumf>, %69, %cst_36 [1] : vector<128x128xf32> to vector<128xf32>
    %71 = vector.shape_cast %70 : vector<128xf32> to vector<128x1xf32>
    %72 = vector.broadcast %71 : vector<128x1xf32> to vector<128x128xf32>
    %73 = arith.subf %69, %72 : vector<128x128xf32>
    %74 = math.exp %73 : vector<128x128xf32>
    %cst_37 = arith.constant dense<0.000000e+00> : vector<128xf32>
    %75 = vector.multi_reduction <add>, %74, %cst_37 [1] : vector<128x128xf32> to vector<128xf32>
    %76 = vector.shape_cast %75 : vector<128xf32> to vector<128x1xf32>
    %77 = arith.truncf %74 : vector<128x128xf32> to vector<128x128xbf16>
    %cst_38 = arith.constant dense<0.000000e+00> : vector<128x8xf32>
    %78 = tpu.matmul %77, %64, %cst_38 {dimension_numbers = #tpu.dot_dimension_numbers<[1], [0], [0], [1], [0, 0, 1, 1], [], []>} : vector<128x128xbf16>, vector<128x8xbf16>, vector<128x8xf32> -> vector<128x8xf32>
    %79 = tpu.reciprocal %76 {approx = true} : vector<128x1xf32> -> vector<128x1xf32>
    %80 = vector.broadcast %79 : vector<128x1xf32> to vector<128x8xf32>
    %81 = arith.mulf %78, %80 : vector<128x8xf32>
    %82 = arith.truncf %81 : vector<128x8xf32> to vector<128x8xbf16>
    %c0_39 = arith.constant 0 : index
    %c24 = arith.constant 24 : index
    %83 = vector.load %arg12[%c0_39, %c24] : memref<128x32xbf16, #tpu.memory_space<vmem>>, vector<128x8xbf16>
    %c0_40 = arith.constant 0 : index
    %c24_41 = arith.constant 24 : index
    %84 = vector.load %arg13[%c0_40, %c24_41] : memref<128x32xbf16, #tpu.memory_space<vmem>>, vector<128x8xbf16>
    %c0_42 = arith.constant 0 : index
    %c24_43 = arith.constant 24 : index
    %85 = vector.load %arg14[%c0_42, %c24_43] : memref<128x32xbf16, #tpu.memory_space<vmem>>, vector<128x8xbf16>
    %cst_44 = arith.constant dense<0.000000e+00> : vector<128x128xf32>
    %86 = tpu.matmul %83, %84, %cst_44 {dimension_numbers = #tpu.dot_dimension_numbers<[1], [1], [0], [0], [0, 0, 1, 0], [], []>} : vector<128x8xbf16>, vector<128x8xbf16>, vector<128x128xf32> -> vector<128x128xf32>
    %cst_45 = arith.constant -1.000000e+30 : f32
    %87 = vector.shape_cast %19 : vector<1x128xi1> to vector<1x128xi1>
    %88 = vector.broadcast %87 : vector<1x128xi1> to vector<128x128xi1>
    %89 = vector.broadcast %cst_45 : f32 to vector<128x128xf32>
    %90 = arith.select %88, %86, %89 : vector<128x128xi1>, vector<128x128xf32>
    %cst_46 = arith.constant dense<0xFF800000> : vector<128xf32>
    %91 = vector.multi_reduction <maximumf>, %90, %cst_46 [1] : vector<128x128xf32> to vector<128xf32>
    %92 = vector.shape_cast %91 : vector<128xf32> to vector<128x1xf32>
    %93 = vector.broadcast %92 : vector<128x1xf32> to vector<128x128xf32>
    %94 = arith.subf %90, %93 : vector<128x128xf32>
    %95 = math.exp %94 : vector<128x128xf32>
    %cst_47 = arith.constant dense<0.000000e+00> : vector<128xf32>
    %96 = vector.multi_reduction <add>, %95, %cst_47 [1] : vector<128x128xf32> to vector<128xf32>
    %97 = vector.shape_cast %96 : vector<128xf32> to vector<128x1xf32>
    %98 = arith.truncf %95 : vector<128x128xf32> to vector<128x128xbf16>
    %cst_48 = arith.constant dense<0.000000e+00> : vector<128x8xf32>
    %99 = tpu.matmul %98, %85, %cst_48 {dimension_numbers = #tpu.dot_dimension_numbers<[1], [0], [0], [1], [0, 0, 1, 1], [], []>} : vector<128x128xbf16>, vector<128x8xbf16>, vector<128x8xf32> -> vector<128x8xf32>
    %100 = tpu.reciprocal %97 {approx = true} : vector<128x1xf32> -> vector<128x1xf32>
    %101 = vector.broadcast %100 : vector<128x1xf32> to vector<128x8xf32>
    %102 = arith.mulf %99, %101 : vector<128x8xf32>
    %103 = arith.truncf %102 : vector<128x8xf32> to vector<128x8xbf16>
    %104 = tpu.concatenate %40, %61, %82, %103 in 1 : vector<128x8xbf16>, vector<128x8xbf16>, vector<128x8xbf16>, vector<128x8xbf16> -> vector<128x32xbf16>
    %c0_49 = arith.constant 0 : index
    %c0_50 = arith.constant 0 : index
    %105 = vector.load %arg9[%c0_49, %c0_50] : memref<32x32xbf16, #tpu.memory_space<vmem>>, vector<32x32xbf16>
    %cst_51 = arith.constant dense<0.000000e+00> : vector<128x32xf32>
    %106 = tpu.matmul %104, %105, %cst_51 {dimension_numbers = #tpu.dot_dimension_numbers<[1], [0], [0], [1], [0, 0, 1, 1], [], []>} : vector<128x32xbf16>, vector<32x32xbf16>, vector<128x32xf32> -> vector<128x32xf32>
    %c0_52 = arith.constant 0 : index
    %c0_53 = arith.constant 0 : index
    %107 = vector.load %arg10[%c0_52, %c0_53] : memref<1x32xf32, #tpu.memory_space<vmem>>, vector<1x32xf32>
    %108 = vector.shape_cast %107 : vector<1x32xf32> to vector<32xf32>
    %109 = vector.shape_cast %108 : vector<32xf32> to vector<1x32xf32>
    %110 = vector.broadcast %109 : vector<1x32xf32> to vector<128x32xf32>
    %111 = arith.addf %106, %110 : vector<128x32xf32>
    %112 = arith.truncf %111 : vector<128x32xf32> to vector<128x32xbf16>
    %c0_54 = arith.constant 0 : index
    %c0_55 = arith.constant 0 : index
    %c0_56 = arith.constant 0 : index
    %113 = vector.load %arg11[%c0_54, %c0_55, %c0_56] : memref<1x128x32xbf16, #tpu.memory_space<vmem>>, vector<1x128x32xbf16>
    %114 = vector.shape_cast %113 : vector<1x128x32xbf16> to vector<128x32xbf16>
    %115 = vector.shape_cast %112 : vector<128x32xbf16> to vector<1x128x32xbf16>
    tpu.vector_store %arg11[%c0_54, %c0_55, %c0_56], %115 {strides = array<i32>} : memref<1x128x32xbf16, #tpu.memory_space<vmem>>, vector<1x128x32xbf16>,
    return
  }
  func.func @transform_0(%arg0: i32, %arg1: i32) -> (i32, i32, i32) {
    %c0_i32 = arith.constant 0 : i32
    %c0_i32_0 = arith.constant 0 : i32
    %c0_i32_1 = arith.constant 0 : i32
    return %arg0, %c0_i32, %c0_i32_0 : i32, i32, i32
  }
  func.func @transform_1(%arg0: i32, %arg1: i32) -> (i32, i32) {
    %c0_i32 = arith.constant 0 : i32
    %c0_i32_0 = arith.constant 0 : i32
    %c0_i32_1 = arith.constant 0 : i32
    return %c0_i32, %c0_i32_0 : i32, i32
  }
  func.func @transform_2(%arg0: i32, %arg1: i32) -> (i32, i32) {
    %c0_i32 = arith.constant 0 : i32
    %c0_i32_0 = arith.constant 0 : i32
    %c0_i32_1 = arith.constant 0 : i32
    return %c0_i32, %c0_i32_0 : i32, i32
  }
  func.func @transform_3(%arg0: i32, %arg1: i32) -> (i32, i32) {
    %c0_i32 = arith.constant 0 : i32
    %c0_i32_0 = arith.constant 0 : i32
    %c0_i32_1 = arith.constant 0 : i32
    return %c0_i32, %c0_i32_0 : i32, i32
  }
  func.func @transform_4(%arg0: i32, %arg1: i32) -> (i32, i32) {
    %c0_i32 = arith.constant 0 : i32
    %c0_i32_0 = arith.constant 0 : i32
    %c0_i32_1 = arith.constant 0 : i32
    return %c0_i32, %c0_i32_0 : i32, i32
  }
  func.func @transform_5(%arg0: i32, %arg1: i32) -> (i32, i32) {
    %c0_i32 = arith.constant 0 : i32
    %c0_i32_0 = arith.constant 0 : i32
    %c0_i32_1 = arith.constant 0 : i32
    return %c0_i32, %c0_i32_0 : i32, i32
  }
  func.func @transform_6(%arg0: i32, %arg1: i32) -> (i32, i32) {
    %c0_i32 = arith.constant 0 : i32
    %c0_i32_0 = arith.constant 0 : i32
    %c0_i32_1 = arith.constant 0 : i32
    return %c0_i32, %c0_i32_0 : i32, i32
  }
  func.func @transform_7(%arg0: i32, %arg1: i32) -> (i32, i32) {
    %c0_i32 = arith.constant 0 : i32
    %c0_i32_0 = arith.constant 0 : i32
    %c0_i32_1 = arith.constant 0 : i32
    return %c0_i32, %c0_i32_0 : i32, i32
  }
  func.func @transform_8(%arg0: i32, %arg1: i32) -> (i32, i32) {
    %c0_i32 = arith.constant 0 : i32
    %c0_i32_0 = arith.constant 0 : i32
    %c0_i32_1 = arith.constant 0 : i32
    return %c0_i32, %c0_i32_0 : i32, i32
  }
  func.func @transform_9(%arg0: i32, %arg1: i32) -> (i32, i32, i32) {
    %c0_i32 = arith.constant 0 : i32
    %c0_i32_0 = arith.constant 0 : i32
    return %arg0, %arg1, %c0_i32 : i32, i32, i32
  }
}

</mosaic_0001>

<bundles_post_ra>
// kernel: vit_attention.1
= control target key start
LH: loop header
LB: loop body
LE: loop exit
PB: predicated region body
PF: predicated region fallthrough
CT: control target
= control target key end

     0   :  { %s4345_s30 = smov 0   ;;  %s4347_s10 = smov 0   ;;  %s5861_s0 = inlined_call_operand.vmem [shape: bf16[2,128,32], index: 0, kind: input, shape index: {}]   ;;  %s5862_s1 = inlined_call_operand.vmem [shape: bf16[32,32], index: 1, kind: input, shape index: {}]   ;;  %s5863_s2 = inlined_call_operand.vmem [shape: f32[1,32], index: 2, kind: input, shape index: {}]   ;;  %s5864_s3 = inlined_call_operand.vmem [shape: bf16[32,32], index: 3, kind: input, shape index: {}]   ;;  %s5865_s4 = inlined_call_operand.vmem [shape: f32[1,32], index: 4, kind: input, shape index: {}]   ;;  %s5866_s5 = inlined_call_operand.vmem [shape: bf16[32,32], index: 5, kind: input, shape index: {}]   ;;  %s5867_s6 = inlined_call_operand.vmem [shape: f32[1,32], index: 6, kind: input, shape index: {}]   ;;  %s5868_s7 = inlined_call_operand.vmem [shape: bf16[32,32], index: 7, kind: input, shape index: {}]   ;;  %s5869_s8 = inlined_call_operand.vmem [shape: f32[1,32], index: 8, kind: input, shape index: {}]   ;;  %s5870_s9 = inlined_call_operand.vmem [shape: bf16[2,128,32], index: 9, kind: output, shape index: {}]  }
   0x1   :  { %s4349_s11 = smov 0  }
   0x2 LB: > { %s31_s12 = sadd.s32 1, %s4283_s10  ;;  %p3264_p0 = scmp.ge.s32.totalorder %s4287_s11, 1  ;;  %s4287_s11 = sphi %s4349_s11, %s19_s11   ;;  %s4283_s10 = sphi %s4347_s10, %s5986_s10   ;;  %s4279_s30 = sphi %s4345_s30, %s5985_s30  }
   0x3   : > { %p33_p1 = scmp.ge.s32.totalorder %s31_s12, 2  ;;  %p301_p2 = scmp.lt.s32.totalorder %s4287_s11, 3 }
   0x5   : > { %s5988_s12 = smov (%p33_p1, %s31_s12), 0  ;;  %p302_p3 = pnand %p3264_p0, %p301_p2 }
   0x7   : > { %305 = sbr.rel (%p302_p3) target bundleno = 2713 (0xa99), region = 56 }
   0xe   : > { %v3963_v0 = vld [vmem:[%s5864_s3] sm:$0xff]   ;;  %p341_p4 = scmp.lt.s32.totalorder %s4279_s30, 1  ;;  %v3964_v1 = vld [vmem:[%s5864_s3 + $0x8] sm:$0xff]   ;;  %vm440_vm0 = vcmask 261120   ;;  %vm963_vm1 = vcmask 64512   ;;  %s4289_s16 = smov 120  }
   0xf   : > { %3565 = vmatprep.subr.bf16.mxu0 %v3963_v0  ;;  %v3971_v2 = vld [vmem:[%s5862_s1] sm:$0xff]   ;;  %v3978_v4 = vld [vmem:[%s5866_s5 + $0x8] sm:$0xff]   ;;  %s4290_s20 = smov 112   ;;  %s4291_s21 = smov 104   ;;  %vm2943_vm3 = vcmask 195584   ;;  %vm2926_vm4 = vcmask 130048  }
  0x10   : > { %s5990_s30 = smov (!%p341_p4, %s4279_s30), 1  ;;  %3566 = vmatpush3.bf16.msra.mxu0 %v3963_v0  ;;  %v3977_v3 = vld [vmem:[%s5866_s5] sm:$0xff]   ;;  %v3974_v6 = vld [vmem:[%s5862_s1 + $0x8] sm:$0xff]   ;;  %s4292_s22 = smov 8   ;;  %vm3160_vm5 = vcmask 257024  }
  0x11   : > { %3567 = vmatprep.subr.bf16.mxu0 %v3964_v1  ;;  %s3379_s19 = sshll.u32 %s5990_s30, 6  ;;  %3585 = vmatprep.subr.bf16.mxu1 %v3977_v3  ;;  %v4434_v23 = vld [vmem:[%s5865_s4] ss:$0 sm:$0xff]  ;;  %s4293_s23 = smov 16  }
  0x12   : > { %s4383_s24 = scalar_lea.vmem %s5861_s0, %s3379_s19  ;;  %3586 = vmatpush3.bf16.msra.mxu1 %v3977_v3  ;;  %v4443_v31 = vld [vmem:[%s5867_s6] ss:$0 sm:$0xff]  ;;  %s4294_s28 = smov 24  }
  0x13   : > { %v3965_v5 = vld [vmem:[%s4383_s24] sm:$0xff]   ;;  %v3966_v7 = vld [vmem:[%s4383_s24 + $0x8] sm:$0xff]   ;;  %v3967_v8 = vld [vmem:[%s4383_s24 + $0x10] sm:$0xff]   ;;  %3587 = vmatprep.subr.bf16.mxu1 %v3978_v4 }
  0x14   : > { %3568 = vmatpush3.bf16.msra.mxu0 %v3964_v1  ;;  %3569 = vmatprep.mubr.msk.bf16.mxu0 %vm440_vm0, %v3965_v5  ;;  %v3968_v9 = vld [vmem:[%s4383_s24 + $0x18] sm:$0xff]   ;;  %v3969_v10 = vld [vmem:[%s4383_s24 + $0x20] sm:$0xff]   ;;  %v3970_v11 = vld [vmem:[%s4383_s24 + $0x28] sm:$0xff]  }
  0x15   : > { %3605 = vmatprep.subr.bf16.mxu0 %v3971_v2  ;;  %3589 = vmatprep.mubr.msk.bf16.mxu1 %vm440_vm0, %v3965_v5  ;;  %v3972_v12 = vld [vmem:[%s4383_s24 + $0x30] sm:$0xff]   ;;  %v3973_v13 = vld [vmem:[%s4383_s24 + $0x38] sm:$0xff]   ;;  %v3975_v14 = vld [vmem:[%s4383_s24] sm:$0xff]  }
  0x16   : > { %3588 = vmatpush3.bf16.msra.mxu1 %v3978_v4  ;;  %v3976_v15 = vld [vmem:[%s4383_s24 + $0x8] sm:$0xff]   ;;  %v3979_v16 = vld [vmem:[%s4383_s24 + $0x10] sm:$0xff]   ;;  %v3980_v17 = vld [vmem:[%s4383_s24 + $0x18] sm:$0xff]  }
  0x17   : > { %3570 = vmatmul.mubr.msk.bf16.vlgmr.msra.gmra.mrb[0].mxu0 %vm440_vm0, %v3966_v7  ;;  %v3981_v18 = vld [vmem:[%s4383_s24 + $0x20] sm:$0xff]   ;;  %v3982_v19 = vld [vmem:[%s4383_s24 + $0x28] sm:$0xff]   ;;  %v3983_v20 = vld [vmem:[%s4383_s24 + $0x30] sm:$0xff]  }
  0x18   : > { %3573 = vmatprep.mubr.msk.bf16.mxu0 %vm440_vm0, %v3967_v8  ;;  %3606 = vmatpush3.bf16.msra.mxu0 %v3971_v2  ;;  %v3984_v21 = vld [vmem:[%s4383_s24 + $0x38] sm:$0xff]  }
  0x19   : > { %3607 = vmatprep.subr.bf16.mxu0 %v3974_v6  ;;  %3590 = vmatmul.mubr.msk.bf16.vlgmr.msra.gmra.mrb[0].mxu1 %vm440_vm0, %v3966_v7 }
  0x1a   : > { %3593 = vmatprep.mubr.msk.bf16.mxu1 %vm440_vm0, %v3967_v8 }
  0x1c   : > { %3608 = vmatpush3.bf16.msra.mxu0 %v3974_v6 }
  0x1f   : > { %3574 = vmatmul.mubr.msk.bf16.gmra.mrb[4].mxu0 %vm440_vm0, %v3968_v9 }
  0x20   : > { %3577 = vmatprep.mubr.msk.bf16.mxu0 %vm440_vm0, %v3969_v10 }
  0x21   : > { %3594 = vmatmul.mubr.msk.bf16.gmra.mrb[4].mxu1 %vm440_vm0, %v3968_v9 }
  0x22   : > { %3597 = vmatprep.mubr.msk.bf16.mxu1 %vm440_vm0, %v3969_v10 }
  0x27   : > { %3578 = vmatmul.mubr.msk.bf16.gmra.mrb[8].mxu0 %vm440_vm0, %v3970_v11 }
  0x28   : > { %3581 = vmatprep.mubr.msk.bf16.mxu0 %vm440_vm0, %v3972_v12 }
  0x29   : > { %3598 = vmatmul.mubr.msk.bf16.gmra.mrb[8].mxu1 %vm440_vm0, %v3970_v11 }
  0x2a   : > { %3601 = vmatprep.mubr.msk.bf16.mxu1 %vm440_vm0, %v3972_v12 }
  0x2f   : > { %3582 = vmatmul.mubr.msk.bf16.gmra.mrb[12].mxu0 %vm440_vm0, %v3973_v13 }
  0x30   : > { %3609 = vmatprep.mubr.msk.bf16.mxu0 %vm440_vm0, %v3975_v14 }
  0x31   : > { %3602 = vmatmul.mubr.msk.bf16.gmra.mrb[12].mxu1 %vm440_vm0, %v3973_v13 }
  0x37   : > { %3610 = vmatmul.mubr.msk.bf16.vlgmr.msra.gmra.mrb[16].mxu0 %vm440_vm0, %v3976_v15 }
  0x38   : > { %3613 = vmatprep.mubr.msk.bf16.mxu0 %vm440_vm0, %v3979_v16 }
  0x3f   : > { %3614 = vmatmul.mubr.msk.bf16.gmra.mrb[20].mxu0 %vm440_vm0, %v3980_v17 }
  0x40   : > { %3617 = vmatprep.mubr.msk.bf16.mxu0 %vm440_vm0, %v3981_v18 }
  0x47   : > { %3618 = vmatmul.mubr.msk.bf16.gmra.mrb[24].mxu0 %vm440_vm0, %v3982_v19 }
  0x48   : > { %3621 = vmatprep.mubr.msk.bf16.mxu0 %vm440_vm0, %v3983_v20 }
  0x4f   : > { %3622 = vmatmul.mubr.msk.bf16.gmra.mrb[28].mxu0 %vm440_vm0, %v3984_v21 }
  0xea   : > { %v3571_v22 = vpop.f32.mrb[0].mxu0 }
  0xeb   : > { %v499_v24 = vpop.f32.mrb[1].mxu0  ;;  %v508_v26 = vadd.f32 %v3571_v22, %v4434_v23 }
  0xec   : > { %v3572_v25 = vpop.f32.mrb[2].mxu0  ;;  %v500_v29 = vadd.f32 %v4434_v23, %v499_v24  ;;  %v3591_v33 = vpop.f32.mrb[0].mxu1 }
  0xed   : > { %v511_v27 = vadd.f32 %v3572_v25, %v4434_v23  ;;  %v502_v28 = vpop.f32.mrb[3].mxu0  ;;  %v628_v35 = vadd.f32 %v3591_v33, %v4443_v31  ;;  %v619_v36 = vpop.f32.mrb[1].mxu1 }
  0xee   : > { %v503_v30 = vadd.f32 %v4434_v23, %v502_v28  ;;  %v620_v37 = vadd.f32 %v4443_v31, %v619_v36  ;;  %v3592_v38 = vpop.f32.mrb[2].mxu1 }
  0xef   : > { %v683_v32 = vpack.c.bf16 %v511_v27, %v508_v26  ;;  %v631_v40 = vadd.f32 %v3592_v38, %v4443_v31  ;;  %v622_v41 = vpop.f32.mrb[3].mxu1 }
  0xf0   : > { %v682_v34 = vpack.c.bf16 %v503_v30, %v500_v29  ;;  %v623_v44 = vadd.f32 %v4443_v31, %v622_v41 }
  0xf1   : > { %691 = vst.msk [vmem:[#allocation3 + $0x8] sm:$0xff] %vm440_vm0, %v683_v32  ;;  %v699_v47 = vpack.c.bf16 %v631_v40, %v628_v35 }
  0xf2   : > { %690 = vst.msk [vmem:[#allocation3] sm:$0xff] %vm440_vm0, %v682_v34  ;;  %v3575_v39 = vpop.f32.mrb[4].mxu0  ;;  %v698_v50 = vpack.c.bf16 %v623_v44, %v620_v37 }
  0xf3   : > { %v524_v42 = vadd.f32 %v3575_v39, %v4434_v23  ;;  %v515_v43 = vpop.f32.mrb[5].mxu0  ;;  %707 = vst.msk [vmem:[#allocation4 + $0x8] sm:$0xff] %vm440_vm0, %v699_v47 }
  0xf4   : > { %v516_v45 = vadd.f32 %v4434_v23, %v515_v43  ;;  %v3576_v46 = vpop.f32.mrb[6].mxu0  ;;  %706 = vst.msk [vmem:[#allocation4] sm:$0xff] %vm440_vm0, %v698_v50  ;;  %v3595_v53 = vpop.f32.mrb[4].mxu1 }
  0xf5   : > { %v527_v48 = vadd.f32 %v3576_v46, %v4434_v23  ;;  %v518_v49 = vpop.f32.mrb[7].mxu0  ;;  %v644_v56 = vadd.f32 %v3595_v53, %v4443_v31  ;;  %v635_v57 = vpop.f32.mrb[5].mxu1 }
  0xf6   : > { %v519_v51 = vadd.f32 %v4434_v23, %v518_v49  ;;  %v636_v59 = vadd.f32 %v4443_v31, %v635_v57  ;;  %v3596_v60 = vpop.f32.mrb[6].mxu1 }
  0xf7   : > { %v685_v52 = vpack.c.bf16 %v527_v48, %v524_v42  ;;  %v647_v63 = vadd.f32 %v3596_v60, %v4443_v31  ;;  %v638_v0 = vpop.f32.mrb[7].mxu1  ;;  %v4519_v42 = vld [vmem:[%s5863_s2] ss:$0 sm:$0xff] }
  0xf8   : > { %v4457_v54 = vld [vmem:[#allocation3 + $0x8] sm:$0xff]  ;;  %v684_v55 = vpack.c.bf16 %v519_v51, %v516_v45  ;;  %v639_v3 = vadd.f32 %v4443_v31, %v638_v0 }
  0xf9   : > { %1418 = vrot.lane.b32.xlu1 %v4457_v54, %s4289_s16  ;;  %693 = vst.msk [vmem:[#allocation3 + $0x18] sm:$0xff] %vm440_vm0, %v685_v52  ;;  %v4463_v58 = vld [vmem:[#allocation3] sm:$0xff]  ;;  %v701_v6 = vpack.c.bf16 %v647_v63, %v644_v56  ;;  %v992_v21 = vsel %vm963_vm1, %v4457_v54, 0 }
  0xfa   : > { %692 = vst.msk [vmem:[#allocation3 + $0x10] sm:$0xff] %vm440_vm0, %v684_v55  ;;  %1416 = vrot.lane.b32.xlu0 %v4463_v58, %s4289_s16  ;;  %3901 = vmatprep.subr.msk.bf16.mxu1 %vm963_vm1, %v4463_v58  ;;  %v989_v61 = vsel %vm963_vm1, %v4463_v58, 0  ;;  %v3579_v62 = vpop.f32.mrb[8].mxu0  ;;  %v700_v9 = vpack.c.bf16 %v639_v3, %v636_v59  ;;  %v4484_v12 = vld [vmem:[#allocation4 + $0x8] sm:$0xff] }
  0xfb   : > { %3626 = vmatpush3.bf16.xpose.msra.mxu1 %v989_v61  ;;  %v540_v1 = vadd.f32 %v3579_v62, %v4434_v23  ;;  %v531_v2 = vpop.f32.mrb[9].mxu0  ;;  %709 = vst.msk [vmem:[#allocation4 + $0x18] sm:$0xff] %vm440_vm0, %v701_v6  ;;  %v4482_v11 = vld [vmem:[#allocation4] sm:$0xff] }
  0xfc   : > { %3902 = vmatprep.subr.msk.bf16.mxu1 %vm963_vm1, %v4457_v54  ;;  %v532_v4 = vadd.f32 %v4434_v23, %v531_v2  ;;  %v3580_v5 = vpop.f32.mrb[10].mxu0  ;;  %708 = vst.msk [vmem:[#allocation4 + $0x10] sm:$0xff] %vm440_vm0, %v700_v9  ;;  %v3599_v14 = vpop.f32.mrb[8].mxu1  ;;  %3657 = vmatprep.subr.bf16.mxu0 %v4482_v11 }
  0xfd   : > { %v543_v7 = vadd.f32 %v3580_v5, %v4434_v23  ;;  %v534_v8 = vpop.f32.mrb[11].mxu0  ;;  %v660_v16 = vadd.f32 %v3599_v14, %v4443_v31  ;;  %v651_v17 = vpop.f32.mrb[9].mxu1  ;;  %3658 = vmatpush3.bf16.msra.mxu0 %v4482_v11 }
  0xfe   : > { %v535_v10 = vadd.f32 %v4434_v23, %v534_v8  ;;  %v652_v19 = vadd.f32 %v4443_v31, %v651_v17  ;;  %v3600_v20 = vpop.f32.mrb[10].mxu1  ;;  %3659 = vmatprep.subr.bf16.mxu0 %v4484_v12 }
  0xff   : > { %v687_v13 = vpack.c.bf16 %v543_v7, %v540_v1  ;;  %v663_v24 = vadd.f32 %v3600_v20, %v4443_v31  ;;  %v654_v25 = vpop.f32.mrb[11].mxu1 }
 0x100   : > { %v686_v15 = vpack.c.bf16 %v535_v10, %v532_v4  ;;  %v655_v28 = vadd.f32 %v4443_v31, %v654_v25  ;;  %v4530_v50 = vld [vmem:[#allocation3 + $0x18] sm:$0xff] }
 0x101   : > { %v4490_v18 = vld [vmem:[#allocation3 + $0x10] sm:$0xff]  ;;  %695 = vst.msk [vmem:[#allocation3 + $0x28] sm:$0xff] %vm440_vm0, %v687_v13  ;;  %v703_v32 = vpack.c.bf16 %v663_v24, %v660_v16  ;;  %3660 = vmatpush3.bf16.msra.mxu0 %v4484_v12  ;;  %v998_v3 = vsel %vm963_vm1, %v4530_v50, 0 }
 0x102   : > { %1420 = vrot.lane.b32.xlu0 %v4490_v18, %s4289_s16  ;;  %694 = vst.msk [vmem:[#allocation3 + $0x20] sm:$0xff] %vm440_vm0, %v686_v15  ;;  %v3583_v22 = vpop.f32.mrb[12].mxu0  ;;  %v702_v35 = vpack.c.bf16 %v655_v28, %v652_v19  ;;  %v4512_v38 = vld [vmem:[#allocation4 + $0x18] sm:$0xff]  ;;  %v995_v46 = vsel %vm963_vm1, %v4490_v18, 0 }
 0x103   : > { %3628 = vmatpush3.bf16.xpose.msra.mxu1 %v992_v21  ;;  %v556_v26 = vadd.f32 %v3583_v22, %v4434_v23  ;;  %v547_v27 = vpop.f32.mrb[13].mxu0  ;;  %711 = vst.msk [vmem:[#allocation4 + $0x28] sm:$0xff] %vm440_vm0, %v703_v32  ;;  %v4510_v37 = vld [vmem:[#allocation4 + $0x10] sm:$0xff] }
 0x104   : > { %3903 = vmatprep.subr.msk.bf16.mxu1 %vm963_vm1, %v4490_v18  ;;  %v548_v29 = vadd.f32 %v4434_v23, %v547_v27  ;;  %v3584_v30 = vpop.f32.mrb[14].mxu0  ;;  %710 = vst.msk [vmem:[#allocation4 + $0x20] sm:$0xff] %vm440_vm0, %v702_v35  ;;  %v3603_v40 = vpop.f32.mrb[12].mxu1  ;;  %3661 = vmatprep.subr.bf16.mxu0 %v4510_v37 }
 0x105   : > { %v559_v33 = vadd.f32 %v3584_v30, %v4434_v23  ;;  %v550_v34 = vpop.f32.mrb[15].mxu0  ;;  %v667_v43 = vpop.f32.mrb[13].mxu1  ;;  %3662 = vmatpush3.bf16.msra.mxu0 %v4510_v37 }
 0x106   : > { %v551_v36 = vadd.f32 %v4434_v23, %v550_v34  ;;  %v676_v23 = vadd.f32 %v3603_v40, %v4443_v31  ;;  %v668_v44 = vadd.f32 %v4443_v31, %v667_v43  ;;  %v3604_v45 = vpop.f32.mrb[14].mxu1  ;;  %3663 = vmatprep.subr.bf16.mxu0 %v4512_v38 }
 0x107   : > { %v689_v39 = vpack.c.bf16 %v559_v33, %v556_v26  ;;  %v679_v48 = vadd.f32 %v3604_v45, %v4443_v31  ;;  %v670_v49 = vpop.f32.mrb[15].mxu1 }
 0x108   : > { %v688_v41 = vpack.c.bf16 %v551_v36, %v548_v29  ;;  %v671_v53 = vadd.f32 %v4443_v31, %v670_v49  ;;  %v4577_v22 = vld [vmem:[#allocation3 + $0x28] sm:$0xff] }
 0x109   : > { %697 = vst.msk [vmem:[#allocation3 + $0x38] sm:$0xff] %vm440_vm0, %v689_v39  ;;  %v705_v57 = vpack.c.bf16 %v679_v48, %v676_v23  ;;  %3664 = vmatpush3.bf16.msra.mxu0 %v4512_v38  ;;  %v4548_v2 = vld [vmem:[#allocation3 + $0x20] sm:$0xff]  ;;  %v1004_v35 = vsel %vm963_vm1, %v4577_v22, 0 }
 0x10a   : > { %696 = vst.msk [vmem:[#allocation3 + $0x30] sm:$0xff] %vm440_vm0, %v688_v41  ;;  %v3611_v47 = vpop.f32.mrb[16].mxu0  ;;  %v704_v61 = vpack.c.bf16 %v671_v53, %v668_v44  ;;  %v4543_v31 = vld [vmem:[#allocation4 + $0x28] sm:$0xff]  ;;  %v1001_v20 = vsel %vm963_vm1, %v4548_v2, 0 }
 0x10b   : > { %3630 = vmatpush3.bf16.xpose.msra.mxu1 %v995_v46  ;;  %v866_v51 = vadd.f32 %v3611_v47, %v4519_v42  ;;  %v857_v52 = vpop.f32.mrb[17].mxu0  ;;  %713 = vst.msk [vmem:[#allocation4 + $0x38] sm:$0xff] %vm440_vm0, %v705_v57  ;;  %v4541_v63 = vld [vmem:[#allocation4 + $0x20] sm:$0xff] }
 0x10c   : > { %3904 = vmatprep.subr.msk.bf16.mxu1 %vm963_vm1, %v4530_v50  ;;  %v858_v55 = vadd.f32 %v4519_v42, %v857_v52  ;;  %v3612_v56 = vpop.f32.mrb[18].mxu0  ;;  %712 = vst.msk [vmem:[#allocation4 + $0x30] sm:$0xff] %vm440_vm0, %v704_v61  ;;  %3665 = vmatprep.subr.bf16.mxu0 %v4541_v63  ;;  %v936_v61 = vlaneseq }
 0x10d   : > { %v869_v59 = vadd.f32 %v3612_v56, %v4519_v42  ;;  %v860_v60 = vpop.f32.mrb[19].mxu0  ;;  %3666 = vmatpush3.bf16.msra.mxu0 %v4541_v63 }
 0x10e   : > { %v861_v62 = vadd.f32 %v4519_v42, %v860_v60  ;;  %3667 = vmatprep.subr.bf16.mxu0 %v4543_v31 }
 0x10f   : > { %v921_v0 = vpack.c.bf16 %v869_v59, %v866_v51 }
 0x110   : > { %v920_v1 = vpack.c.bf16 %v861_v62, %v858_v55  ;;  %v4602_v49 = vld [vmem:[#allocation3 + $0x38] sm:$0xff]  ;;  %v4640_v62 = vand.u32 127, %v936_v61 }
 0x111   : > { %929 = vst.msk [vmem:[#allocation2 + $0x8] sm:$0xff] %vm440_vm0, %v921_v0  ;;  %3668 = vmatpush3.bf16.msra.mxu0 %v4543_v31  ;;  %v4586_v34 = vld [vmem:[#allocation3 + $0x30] sm:$0xff]  ;;  %v1010_v51 = vsel %vm963_vm1, %v4602_v49, 0 }
 0x112   : > { %928 = vst.msk [vmem:[#allocation2] sm:$0xff] %vm440_vm0, %v920_v1  ;;  %v3615_v4 = vpop.f32.mrb[20].mxu0  ;;  %v4564_v15 = vld [vmem:[#allocation4 + $0x38] sm:$0xff]  ;;  %v1007_v48 = vsel %vm963_vm1, %v4586_v34, 0  ;;  %vm938_vm2 = vcmp.lt.s32.totalorder %v4640_v62, 8 }
 0x113   : > { %3632 = vmatpush3.bf16.xpose.msra.mxu1 %v998_v3  ;;  %v882_v5 = vadd.f32 %v3615_v4, %v4519_v42  ;;  %v873_v6 = vpop.f32.mrb[21].mxu0  ;;  %v4562_v14 = vld [vmem:[#allocation4 + $0x30] sm:$0xff] }
 0x114   : > { %3905 = vmatprep.subr.msk.bf16.mxu1 %vm963_vm1, %v4548_v2  ;;  %v874_v7 = vadd.f32 %v4519_v42, %v873_v6  ;;  %v3616_v8 = vpop.f32.mrb[22].mxu0  ;;  %3669 = vmatprep.subr.bf16.mxu0 %v4562_v14 }
 0x115   : > { %v885_v9 = vadd.f32 %v3616_v8, %v4519_v42  ;;  %v876_v10 = vpop.f32.mrb[23].mxu0  ;;  %3670 = vmatpush3.bf16.msra.mxu0 %v4562_v14 }
 0x116   : > { %v877_v13 = vadd.f32 %v4519_v42, %v876_v10  ;;  %3671 = vmatprep.subr.bf16.mxu0 %v4564_v15 }
 0x117   : > { %v923_v16 = vpack.c.bf16 %v885_v9, %v882_v5 }
 0x118   : > { %v922_v17 = vpack.c.bf16 %v877_v13, %v874_v7  ;;  %v4610_v52 = vld [vmem:[#allocation2 + $0x8] sm:$0xff] }
 0x119   : > { %v4568_v19 = vld [vmem:[#allocation2] sm:$0xff]  ;;  %931 = vst.msk [vmem:[#allocation2 + $0x18] sm:$0xff] %vm440_vm0, %v923_v16  ;;  %3672 = vmatpush3.bf16.msra.mxu0 %v4564_v15 }
 0x11a   : > { %3641 = vmatprep.mubr.msk.bf16.mxu1 %vm963_vm1, %v4568_v19  ;;  %930 = vst.msk [vmem:[#allocation2 + $0x10] sm:$0xff] %vm440_vm0, %v922_v17  ;;  %v3619_v21 = vpop.f32.mrb[24].mxu0 }
 0x11b   : > { %3634 = vmatpush3.bf16.xpose.msra.mxu1 %v1001_v20  ;;  %v898_v24 = vadd.f32 %v3619_v21, %v4519_v42  ;;  %v889_v25 = vpop.f32.mrb[25].mxu0 }
 0x11c   : > { %3906 = vmatprep.subr.msk.bf16.mxu1 %vm963_vm1, %v4577_v22  ;;  %v890_v26 = vadd.f32 %v4519_v42, %v889_v25  ;;  %v3620_v27 = vpop.f32.mrb[26].mxu0 }
 0x11d   : > { %v901_v28 = vadd.f32 %v3620_v27, %v4519_v42  ;;  %v892_v29 = vpop.f32.mrb[27].mxu0 }
 0x11e   : > { %v893_v30 = vadd.f32 %v4519_v42, %v892_v29 }
 0x11f   : > { %v925_v32 = vpack.c.bf16 %v901_v28, %v898_v24 }
 0x120   : > { %v924_v33 = vpack.c.bf16 %v893_v30, %v890_v26  ;;  %v4616_v53 = vld [vmem:[#allocation2 + $0x18] sm:$0xff] }
 0x121   : > { %933 = vst.msk [vmem:[#allocation2 + $0x28] sm:$0xff] %vm440_vm0, %v925_v32 }
 0x122   : > { %932 = vst.msk [vmem:[#allocation2 + $0x20] sm:$0xff] %vm440_vm0, %v924_v33  ;;  %v3623_v36 = vpop.f32.mrb[28].mxu0 }
 0x123   : > { %3636 = vmatpush3.bf16.xpose.msra.mxu1 %v1004_v35  ;;  %v914_v39 = vadd.f32 %v3623_v36, %v4519_v42  ;;  %v905_v40 = vpop.f32.mrb[29].mxu0 }
 0x124   : > { %3907 = vmatprep.subr.msk.bf16.mxu1 %vm963_vm1, %v4586_v34  ;;  %v906_v41 = vadd.f32 %v4519_v42, %v905_v40  ;;  %v3624_v23 = vpop.f32.mrb[30].mxu0 }
 0x125   : > { %v917_v43 = vadd.f32 %v3624_v23, %v4519_v42  ;;  %v908_v44 = vpop.f32.mrb[31].mxu0 }
 0x126   : > { %v909_v45 = vadd.f32 %v4519_v42, %v908_v44  ;;  %v4608_v42 = vld [vmem:[#allocation2 + $0x10] sm:$0xff] }
 0x127   : > { %v927_v46 = vpack.c.bf16 %v917_v43, %v914_v39 }
 0x128   : > { %v926_v47 = vpack.c.bf16 %v909_v45, %v906_v41  ;;  %v4624_v56 = vld [vmem:[#allocation2 + $0x28] sm:$0xff] }
 0x129   : > { %935 = vst.msk [vmem:[#allocation2 + $0x38] sm:$0xff] %vm440_vm0, %v927_v46  ;;  %v4618_v55 = vld [vmem:[#allocation2 + $0x20] sm:$0xff] }
 0x12a   : > { %934 = vst.msk [vmem:[#allocation2 + $0x30] sm:$0xff] %vm440_vm0, %v926_v47 }
 0x12b   : > { %3638 = vmatpush3.bf16.xpose.msra.mxu1 %v1007_v48 }
 0x12c   : > { %3908 = vmatprep.subr.msk.bf16.mxu1 %vm963_vm1, %v4602_v49 }
 0x130   : > { %v4632_v59 = vld [vmem:[#allocation2 + $0x38] sm:$0xff] }
 0x131   : > { %v4626_v57 = vld [vmem:[#allocation2 + $0x30] sm:$0xff] }
 0x133   : > { %3640 = vmatpush3.bf16.xpose.msra.mxu1 %v1010_v51 }
 0x13a   : > { %3642 = vmatmul.mubr.msk.bf16.vlgmr.msra.gmra.mrb[16].mxu1 %vm963_vm1, %v4610_v52 }
 0x13b   : > { %3645 = vmatprep.mubr.msk.bf16.mxu1 %vm963_vm1, %v4608_v42 }
 0x142   : > { %3646 = vmatmul.mubr.msk.bf16.gmra.mrb[20].mxu1 %vm963_vm1, %v4616_v53 }
 0x143   : > { %3649 = vmatprep.mubr.msk.bf16.mxu1 %vm963_vm1, %v4618_v55 }
 0x14a   : > { %3650 = vmatmul.mubr.msk.bf16.gmra.mrb[24].mxu1 %vm963_vm1, %v4624_v56 }
 0x14b   : > { %3653 = vmatprep.mubr.msk.bf16.mxu1 %vm963_vm1, %v4626_v57 }
 0x152   : > { %3654 = vmatmul.mubr.msk.bf16.gmra.mrb[28].mxu1 %vm963_vm1, %v4632_v59 }
 0x16b   : > { %v1419_v45 = vpop.permute.xlu1 %1418 }
 0x16c   : > { %v4636_v60 = vpop.permute.xlu0 %1416 }
 0x16d   : > { %3909 = vmatprep.subr.msk.bf16.mxu0 %vm963_vm1, %v4636_v60 }
 0x174   : > { %v1421_v46 = vpop.permute.xlu0 %1420 }
 0x20d   : > { %v3643_v0 = vpop.f32.mrb[16].mxu1 }
 0x20e   : > { %v1046_v1 = vpop.f32.mrb[17].mxu1  ;;  %v4645_v3 = vsel %vm938_vm2, %v3643_v0, -1e+30 }
 0x20f   : > { %1131 = vmax.xlane.f32.xlu1 %v4645_v3  ;;  %v3644_v4 = vpop.f32.mrb[18].mxu1  ;;  %v4650_v5 = vsel %vm938_vm2, %v1046_v1, -1e+30 }
 0x210   : > { %1127 = vmax.xlane.f32.xlu0 %v4650_v5  ;;  %v1049_v6 = vpop.f32.mrb[19].mxu1  ;;  %v4655_v7 = vsel %vm938_vm2, %v3644_v4, -1e+30 }
 0x211   : > { %v4660_v8 = vsel %vm938_vm2, %v1049_v6, -1e+30 }
 0x213   : > { %1133 = vmax.xlane.f32.xlu1 %v4655_v7 }
 0x214   : > { %1129 = vmax.xlane.f32.xlu0 %v4660_v8 }
 0x215   : > { %v3647_v9 = vpop.f32.mrb[20].mxu1 }
 0x216   : > { %v1062_v10 = vpop.f32.mrb[21].mxu1  ;;  %v4674_v30 = vsel %vm938_vm2, %v3647_v9, -1e+30 }
 0x217   : > { %v3648_v13 = vpop.f32.mrb[22].mxu1  ;;  %v4669_v29 = vsel %vm938_vm2, %v1062_v10, -1e+30 }
 0x218   : > { %v1065_v16 = vpop.f32.mrb[23].mxu1  ;;  %v4683_v33 = vsel %vm938_vm2, %v3648_v13, -1e+30 }
 0x219   : > { %v4689_v35 = vsel %vm938_vm2, %v1065_v16, -1e+30 }
 0x21d   : > { %v3651_v17 = vpop.f32.mrb[24].mxu1 }
 0x21e   : > { %v1078_v20 = vpop.f32.mrb[25].mxu1  ;;  %v4703_v40 = vsel %vm938_vm2, %v3651_v17, -1e+30  ;;  %v1457_v17 = vsel %vm963_vm1, %v4636_v60, 0 }
 0x21f   : > { %v3652_v21 = vpop.f32.mrb[26].mxu1  ;;  %v4679_v32 = vsel %vm938_vm2, %v1078_v20, -1e+30  ;;  %v1460_v20 = vsel %vm963_vm1, %v1419_v45, 0 }
 0x220   : > { %v1081_v24 = vpop.f32.mrb[27].mxu1  ;;  %v4709_v41 = vsel %vm938_vm2, %v3652_v21, -1e+30  ;;  %v1463_v21 = vsel %vm963_vm1, %v1421_v46, 0 }
 0x221   : > { %v4694_v36 = vsel %vm938_vm2, %v1081_v24, -1e+30 }
 0x224   : > { %1422 = vrot.lane.b32.xlu1 %v4530_v50, %s4289_s16 }
 0x225   : > { %v3655_v25 = vpop.f32.mrb[28].mxu1 }
 0x226   : > { %v1094_v26 = vpop.f32.mrb[29].mxu1  ;;  %v4699_v39 = vsel %vm938_vm2, %v3655_v25, -1e+30 }
 0x227   : > { %v3656_v27 = vpop.f32.mrb[30].mxu1  ;;  %v4714_v23 = vsel %vm938_vm2, %v1094_v26, -1e+30 }
 0x228   : > { %v1097_v28 = vpop.f32.mrb[31].mxu1  ;;  %v4719_v43 = vsel %vm938_vm2, %v3656_v27, -1e+30 }
 0x229   : > { %v4724_v44 = vsel %vm938_vm2, %v1097_v28, -1e+30 }
 0x22a   : > { %1424 = vrot.lane.b32.xlu0 %v4548_v2, %s4289_s16 }
 0x248   : > { %1135 = vmax.xlane.f32.xlu1 %v4669_v29 }
 0x249   : > { %1139 = vmax.xlane.f32.xlu0 %v4674_v30 }
 0x24c   : > { %1141 = vmax.xlane.f32.xlu1 %v4683_v33 }
 0x24d   : > { %1143 = vmax.xlane.f32.xlu0 %v4679_v32 }
 0x250   : > { %1137 = vmax.xlane.f32.xlu1 %v4689_v35 }
 0x251   : > { %1145 = vmax.xlane.f32.xlu0 %v4694_v36 }
 0x254   : > { %1147 = vmax.xlane.f32.xlu1 %v4703_v40 }
 0x255   : > { %1155 = vmax.xlane.f32.xlu0 %v4699_v39 }
 0x258   : > { %1149 = vmax.xlane.f32.xlu1 %v4709_v41 }
 0x25c   : > { %1151 = vmax.xlane.f32.xlu1 %v4714_v23 }
 0x260   : > { %1157 = vmax.xlane.f32.xlu1 %v4719_v43 }
 0x264   : > { %1153 = vmax.xlane.f32.xlu1 %v4724_v44 }
 0x26b   : > { %1428 = vrot.lane.b32.xlu0 %v4586_v34, %s4289_s16 }
 0x26f   : > { %1430 = vrot.lane.b32.xlu0 %v4602_v49, %s4289_s16 }
 0x273   : > { %1392 = vrot.lane.b32.xlu0 %v4568_v19, %s4289_s16 }
 0x275   : > { %1426 = vrot.lane.b32.xlu1 %v4577_v22, %s4289_s16 }
 0x277   : > { %1396 = vrot.lane.b32.xlu0 %v4608_v42, %s4289_s16 }
 0x279   : > { %1394 = vrot.lane.b32.xlu1 %v4610_v52, %s4289_s16 }
 0x27b   : > { %1400 = vrot.lane.b32.xlu0 %v4618_v55, %s4289_s16 }
 0x27d   : > { %1398 = vrot.lane.b32.xlu1 %v4616_v53, %s4289_s16 }
 0x27f   : > { %1404 = vrot.lane.b32.xlu0 %v4626_v57, %s4289_s16 }
 0x281   : > { %1402 = vrot.lane.b32.xlu1 %v4624_v56, %s4289_s16 }
 0x283   : > { %1721 = vrot.lane.b32.xlu0 %v4482_v11, %s4289_s16 }
 0x285   : > { %1406 = vrot.lane.b32.xlu1 %v4632_v59, %s4289_s16 }
 0x287   : > { %1725 = vrot.lane.b32.xlu0 %v4510_v37, %s4289_s16 }
 0x289   : > { %1723 = vrot.lane.b32.xlu1 %v4484_v12, %s4289_s16 }
 0x28b   : > { %1733 = vrot.lane.b32.xlu0 %v4562_v14, %s4289_s16 }
 0x28d   : > { %1727 = vrot.lane.b32.xlu1 %v4512_v38, %s4289_s16 }
 0x28f   : > { %1898 = vrot.lane.b32.xlu0 %v4463_v58, %s4290_s20 }
 0x291   : > { %1729 = vrot.lane.b32.xlu1 %v4541_v63, %s4289_s16 }
 0x293   : > { %1900 = vrot.lane.b32.xlu0 %v4457_v54, %s4290_s20 }
 0x295   : > { %1731 = vrot.lane.b32.xlu1 %v4543_v31, %s4289_s16 }
 0x297   : > { %1904 = vrot.lane.b32.xlu0 %v4530_v50, %s4290_s20 }
 0x299   : > { %1735 = vrot.lane.b32.xlu1 %v4564_v15, %s4289_s16  ;;  %s5818_s16 = scalar_lea.vmem %s5870_s9, %s3379_s19 }
 0x29c   : > { %v1132_v47 = vpop.xlane.xlu1 %1131 }
 0x29d   : > { %v1128_v48 = vpop.xlane.xlu0 %1127  ;;  %1902 = vrot.lane.b32.xlu1 %v4490_v18, %s4290_s20  ;;  %v1161_v54 = vsub.f32 %v4645_v3, %v1132_v47 }
 0x29e   : > { %v1159_v58 = vsub.f32 %v4650_v5, %v1128_v48 }
 0x29f   : > { %v1179_v6 = vmul.f32 1.442695, %v1161_v54 }
 0x2a0   : > { %v1175_v51 = vmul.f32 1.442695, %v1159_v58  ;;  %v1134_v61 = vpop.xlane.xlu1 %1133 }
 0x2a1   : > { %v1162_v0 = vsub.f32 %v4655_v7, %v1134_v61  ;;  %v1130_v1 = vpop.xlane.xlu0 %1129 }
 0x2a2   : > { %v1160_v4 = vsub.f32 %v4660_v8, %v1130_v1  ;;  %3987 = vpow2.f32 %v1175_v51 }
 0x2a3   : > { %v1181_v9 = vmul.f32 1.442695, %v1162_v0 }
 0x2a4   : > { %v1177_v10 = vmul.f32 1.442695, %v1160_v4  ;;  %v1423_v24 = vpop.permute.xlu1 %1422 }
 0x2a5   : > { %3989 = vpow2.f32 %v1181_v9  ;;  %v1466_v25 = vsel %vm963_vm1, %v1423_v24, 0  ;;  %v1425_v26 = vpop.permute.xlu0 %1424 }
 0x2a6   : > { %3991 = vpow2.f32 %v1177_v10  ;;  %v1469_v60 = vsel %vm963_vm1, %v1425_v26, 0 }
 0x2a7   : > { %3993 = vpow2.f32 %v1179_v6 }
 0x2ac   : > { %v4777_v13 = vpop.eup %3987 }
 0x2af   : > { %v4779_v16 = vpop.eup %3989 }
 0x2b0   : > { %v4781_v5 = vpop.eup %3991 }
 0x2b1   : > { %v4783_v3 = vpop.eup %3993  ;;  %v1239_v7 = vpack.c.bf16 %v4781_v5, %v4777_v13 }
 0x2b2   : > { %v1240_v8 = vpack.c.bf16 %v4779_v16, %v4783_v3 }
 0x2b3   : > { %3673 = vmatprep.mubr.bf16.mxu0 %v1239_v7 }
 0x2b4   : > { %3674 = vmatmul.mubr.bf16.vlgmr.msra.gmra.mrb[32].mxu0 %v1240_v8 }
 0x2b5   : > { %3690 = vmatpush3.bf16.xpose.msra.mxu0 %v1457_v17 }
 0x2b6   : > { %3910 = vmatprep.subr.msk.bf16.mxu0 %vm963_vm1, %v1419_v45 }
 0x2bd   : > { %3692 = vmatpush3.bf16.xpose.msra.mxu0 %v1460_v20 }
 0x2be   : > { %3911 = vmatprep.subr.msk.bf16.mxu0 %vm963_vm1, %v1421_v46 }
 0x2c5   : > { %3694 = vmatpush3.bf16.xpose.msra.mxu0 %v1463_v21 }
 0x2c6   : > { %3912 = vmatprep.subr.msk.bf16.mxu0 %vm963_vm1, %v1423_v24 }
 0x2cd   : > { %3696 = vmatpush3.bf16.xpose.msra.mxu0 %v1466_v25 }
 0x2ce   : > { %3913 = vmatprep.subr.msk.bf16.mxu0 %vm963_vm1, %v1425_v26 }
 0x2d5   : > { %3698 = vmatpush3.bf16.xpose.msra.mxu0 %v1469_v60  ;;  %v1136_v27 = vpop.xlane.xlu1 %1135 }
 0x2d6   : > { %v1163_v28 = vsub.f32 %v4669_v29, %v1136_v27  ;;  %v1140_v45 = vpop.xlane.xlu0 %1139 }
 0x2d7   : > { %v1165_v47 = vsub.f32 %v4674_v30, %v1140_v45 }
 0x2d8   : > { %v1183_v48 = vmul.f32 1.442695, %v1163_v28 }
 0x2d9   : > { %v1142_v46 = vpop.xlane.xlu1 %1141  ;;  %v1187_v51 = vmul.f32 1.442695, %v1165_v47 }
 0x2da   : > { %v1166_v58 = vsub.f32 %v4683_v33, %v1142_v46  ;;  %v1144_v54 = vpop.xlane.xlu0 %1143  ;;  %3995 = vpow2.f32 %v1183_v48 }
 0x2db   : > { %v1167_v61 = vsub.f32 %v4679_v32, %v1144_v54  ;;  %3997 = vpow2.f32 %v1187_v51 }
 0x2dc   : > { %v1189_v0 = vmul.f32 1.442695, %v1166_v58 }
 0x2dd   : > { %v1191_v1 = vmul.f32 1.442695, %v1167_v61  ;;  %v1138_v4 = vpop.xlane.xlu1 %1137 }
 0x2de   : > { %v1164_v6 = vsub.f32 %v4689_v35, %v1138_v4  ;;  %v1146_v9 = vpop.xlane.xlu0 %1145  ;;  %3999 = vpow2.f32 %v1189_v0 }
 0x2df   : > { %v1168_v29 = vsub.f32 %v4694_v36, %v1146_v9  ;;  %4001 = vpow2.f32 %v1191_v1 }
 0x2e0   : > { %v1185_v30 = vmul.f32 1.442695, %v1164_v6 }
 0x2e1   : > { %v1193_v10 = vmul.f32 1.442695, %v1168_v29  ;;  %v1148_v7 = vpop.xlane.xlu1 %1147 }
 0x2e2   : > { %4003 = vpow2.f32 %v1185_v30  ;;  %v1169_v33 = vsub.f32 %v4703_v40, %v1148_v7  ;;  %v1156_v8 = vpop.xlane.xlu0 %1155 }
 0x2e3   : > { %4005 = vpow2.f32 %v1193_v10  ;;  %v1173_v51 = vsub.f32 %v4699_v39, %v1156_v8 }
 0x2e4   : > { %v1195_v32 = vmul.f32 1.442695, %v1169_v33  ;;  %v4807_v35 = vpop.eup %3995 }
 0x2e5   : > { %v1150_v17 = vpop.xlane.xlu1 %1149  ;;  %v4809_v25 = vpop.eup %3997 }
 0x2e6   : > { %v1170_v20 = vsub.f32 %v4709_v41, %v1150_v17  ;;  %v1429_v21 = vpop.permute.xlu0 %1428  ;;  %4007 = vpow2.f32 %v1195_v32 }
 0x2e8   : > { %v1197_v24 = vmul.f32 1.442695, %v1170_v20  ;;  %v4811_v26 = vpop.eup %3999  ;;  %v1475_v20 = vsel %vm963_vm1, %v1429_v21, 0 }
 0x2e9   : > { %v1152_v36 = vpop.xlane.xlu1 %1151  ;;  %v4813_v27 = vpop.eup %4001  ;;  %v1242_v58 = vpack.c.bf16 %v4811_v26, %v4809_v25 }
 0x2ea   : > { %4009 = vpow2.f32 %v1197_v24  ;;  %v1431_v60 = vpop.permute.xlu0 %1430  ;;  %5877 = vst [vmem:[#allocation5_spill] sm:$0xff] %v4813_v27  ;;  %v1171_v28 = vsub.f32 %v4714_v23, %v1152_v36 }
 0x2ec   : > { %v4815_v40 = vpop.eup %4003  ;;  %v1199_v61 = vmul.f32 1.442695, %v1171_v28 }
 0x2ed   : > { %v4818_v45 = vpop.eup %4005  ;;  %v1158_v41 = vpop.xlane.xlu1 %1157  ;;  %v1241_v47 = vpack.c.bf16 %v4815_v40, %v4807_v35 }
 0x2ee   : > { %v1174_v46 = vsub.f32 %v4719_v43, %v1158_v41  ;;  %v1393_v48 = vpop.permute.xlu0 %1392  ;;  %v1243_v54 = vpack.c.bf16 %v4818_v45, %v4813_v27  ;;  %v1203_v43 = vmul.f32 1.442695, %v1173_v51  ;;  %4011 = vpow2.f32 %v1199_v61 }
 0x2ef   : > { %3677 = vmatprep.mubr.bf16.mxu0 %v1241_v47 }
 0x2f0   : > { %3678 = vmatmul.mubr.bf16.gmra.mrb[36].mxu0 %v1242_v58  ;;  %v1205_v23 = vmul.f32 1.442695, %v1174_v46  ;;  %v4829_v6 = vpop.eup %4007  ;;  %v1478_v58 = vsel %vm963_vm1, %v1431_v60, 0 }
 0x2f1   : > { %3681 = vmatprep.mubr.bf16.mxu0 %v1243_v54  ;;  %v1154_v0 = vpop.xlane.xlu1 %1153  ;;  %5878 = vst [vmem:[#allocation6_spill] sm:$0xff] %v4829_v6 }
 0x2f2   : > { %v1172_v1 = vsub.f32 %v4724_v44, %v1154_v0  ;;  %v1397_v4 = vpop.permute.xlu0 %1396  ;;  %4013 = vpow2.f32 %v1205_v23 }
 0x2f4   : > { %v4831_v9 = vpop.eup %4009  ;;  %v1201_v29 = vmul.f32 1.442695, %v1172_v1 }
 0x2f5   : > { %v1427_v30 = vpop.permute.xlu1 %1426  ;;  %v1244_v39 = vpack.c.bf16 %v4831_v9, %v4829_v6 }
 0x2f6   : > { %4015 = vpow2.f32 %v1201_v29  ;;  %v1401_v10 = vpop.permute.xlu0 %1400  ;;  %3914 = vmatprep.subr.msk.bf16.mxu0 %vm963_vm1, %v1427_v30  ;;  %v1472_v7 = vsel %vm963_vm1, %v1427_v30, 0 }
 0x2f7   : > { %4017 = vpow2.f32 %v1203_v43  ;;  %3700 = vmatpush3.bf16.xpose.msra.mxu0 %v1472_v7 }
 0x2f8   : > { %3682 = vmatmul.mubr.bf16.gmra.mrb[40].mxu0 %v1244_v39  ;;  %3915 = vmatprep.subr.msk.bf16.mxu0 %vm963_vm1, %v1429_v21  ;;  %v4838_v32 = vpop.eup %4011 }
 0x2f9   : > { %v1395_v44 = vpop.permute.xlu1 %1394  ;;  %5879 = vst [vmem:[#allocation7_spill] sm:$0xff] %v4838_v32 }
 0x2fa   : > { %v1405_v33 = vpop.permute.xlu0 %1404 }
 0x2fc   : > { %v4841_v24 = vpop.eup %4013 }
 0x2fd   : > { %v1399_v8 = vpop.permute.xlu1 %1398  ;;  %5880 = vst [vmem:[#allocation8_spill] sm:$0xff] %v4841_v24 }
 0x2fe   : > { %v1722_v17 = vpop.permute.xlu0 %1721 }
 0x2ff   : > { %3702 = vmatpush3.bf16.xpose.msra.mxu0 %v1475_v20  ;;  %3721 = vmatprep.subr.bf16.mxu1 %v1722_v17 }
 0x300   : > { %v4843_v36 = vpop.eup %4015  ;;  %3916 = vmatprep.subr.msk.bf16.mxu0 %vm963_vm1, %v1431_v60  ;;  %3722 = vmatpush3.bf16.msra.mxu1 %v1722_v17 }
 0x301   : > { %5881 = vst [vmem:[#allocation9_spill] sm:$0xff] %v4843_v36  ;;  %v4846_v28 = vpop.eup %4017  ;;  %v1403_v41 = vpop.permute.xlu1 %1402  ;;  %v1245_v47 = vpack.c.bf16 %v4843_v36, %v4838_v32 }
 0x302   : > { %5882 = vst [vmem:[#allocation10_spill] sm:$0xff] %v4846_v28  ;;  %v1246_v46 = vpack.c.bf16 %v4841_v24, %v4846_v28  ;;  %v1726_v51 = vpop.permute.xlu0 %1725  ;;  %v4263_v24 = vld [vmem:[#allocation4 + $0x30] sm:$0xff] }
 0x303   : > { %3685 = vmatprep.mubr.bf16.mxu0 %v1245_v47 }
 0x304   : > { %3686 = vmatmul.mubr.bf16.gmra.mrb[44].mxu0 %v1246_v46 }
 0x305   : > { %3705 = vmatprep.mubr.msk.bf16.mxu0 %vm963_vm1, %v1393_v48  ;;  %v1407_v21 = vpop.permute.xlu1 %1406 }
 0x306   : > { %v1734_v60 = vpop.permute.xlu0 %1733 }
 0x307   : > { %3704 = vmatpush3.bf16.xpose.msra.mxu0 %v1478_v58 }
 0x309   : > { %v1724_v54 = vpop.permute.xlu1 %1723 }
 0x30a   : > { %3723 = vmatprep.subr.bf16.mxu1 %v1724_v54  ;;  %v4860_v1 = vpop.permute.xlu0 %1898 }
 0x30b   : > { %3724 = vmatpush3.bf16.msra.mxu1 %v1724_v54 }
 0x30c   : > { %3725 = vmatprep.subr.bf16.mxu1 %v1726_v51 }
 0x30d   : > { %v1728_v61 = vpop.permute.xlu1 %1727 }
 0x30e   : > { %3706 = vmatmul.mubr.msk.bf16.vlgmr.msra.gmra.mrb[48].mxu0 %vm963_vm1, %v1395_v44 }
 0x30f   : > { %3709 = vmatprep.mubr.msk.bf16.mxu0 %vm963_vm1, %v1397_v4  ;;  %3726 = vmatpush3.bf16.msra.mxu1 %v1726_v51 }
 0x310   : > { %3727 = vmatprep.subr.bf16.mxu1 %v1728_v61 }
 0x311   : > { %v1730_v23 = vpop.permute.xlu1 %1729 }
 0x313   : > { %3728 = vmatpush3.bf16.msra.mxu1 %v1728_v61 }
 0x314   : > { %3729 = vmatprep.subr.bf16.mxu1 %v1730_v23 }
 0x315   : > { %v1732_v48 = vpop.permute.xlu1 %1731 }
 0x316   : > { %3710 = vmatmul.mubr.msk.bf16.gmra.mrb[52].mxu0 %vm963_vm1, %v1399_v8 }
 0x317   : > { %3713 = vmatprep.mubr.msk.bf16.mxu0 %vm963_vm1, %v1401_v10  ;;  %3730 = vmatpush3.bf16.msra.mxu1 %v1730_v23 }
 0x318   : > { %3731 = vmatprep.subr.bf16.mxu1 %v1732_v48 }
 0x319   : > { %v1736_v0 = vpop.permute.xlu1 %1735 }
 0x31b   : > { %3732 = vmatpush3.bf16.msra.mxu1 %v1732_v48 }
 0x31c   : > { %3733 = vmatprep.subr.bf16.mxu1 %v1734_v60 }
 0x31e   : > { %3714 = vmatmul.mubr.msk.bf16.gmra.mrb[56].mxu0 %vm963_vm1, %v1403_v41 }
 0x31f   : > { %3717 = vmatprep.mubr.msk.bf16.mxu0 %vm963_vm1, %v1405_v33  ;;  %3734 = vmatpush3.bf16.msra.mxu1 %v1734_v60 }
 0x320   : > { %3735 = vmatprep.subr.bf16.mxu1 %v1736_v0 }
 0x323   : > { %3736 = vmatpush3.bf16.msra.mxu1 %v1736_v0 }
 0x324   : > { %3917 = vmatprep.subr.msk.bf16.mxu1 %vm963_vm1, %v4860_v1 }
 0x326   : > { %3718 = vmatmul.mubr.msk.bf16.gmra.mrb[60].mxu0 %vm963_vm1, %v1407_v21 }
 0x387   : > { %v4865_v4 = vpop.f32.mrb[32].mxu0 }
 0x388   : > { %5883 = vst [vmem:[#allocation11_spill] sm:$0xff] %v4865_v4  ;;  %v4867_v43 = vpop.f32.mrb[33].mxu0 }
 0x389   : > { %5884 = vst [vmem:[#allocation12_spill] sm:$0xff] %v4867_v43  ;;  %v4869_v29 = vpop.f32.mrb[34].mxu0 }
 0x38a   : > { %5885 = vst [vmem:[#allocation13_spill] sm:$0xff] %v4869_v29  ;;  %v4871_v30 = vpop.f32.mrb[35].mxu0 }
 0x38b   : > { %5886 = vst [vmem:[#allocation14_spill] sm:$0xff] %v4871_v30 }
 0x3c3   : > { %v4873_v39 = vpop.f32.mrb[36].mxu0 }
 0x3c4   : > { %5887 = vst [vmem:[#allocation15_spill] sm:$0xff] %v4873_v39  ;;  %v4875_v10 = vpop.f32.mrb[37].mxu0 }
 0x3c5   : > { %5888 = vst [vmem:[#allocation16_spill] sm:$0xff] %v4875_v10  ;;  %v4877_v7 = vpop.f32.mrb[38].mxu0 }
 0x3c6   : > { %5889 = vst [vmem:[#allocation17_spill] sm:$0xff] %v4877_v7  ;;  %v4879_v44 = vpop.f32.mrb[39].mxu0 }
 0x3c7   : > { %5890 = vst [vmem:[#allocation18_spill] sm:$0xff] %v4879_v44 }
 0x3cb   : > { %v4881_v33 = vpop.f32.mrb[40].mxu0 }
 0x3cc   : > { %5891 = vst [vmem:[#allocation19_spill] sm:$0xff] %v4881_v33  ;;  %v4883_v8 = vpop.f32.mrb[41].mxu0 }
 0x3cd   : > { %5892 = vst [vmem:[#allocation20_spill] sm:$0xff] %v4883_v8  ;;  %v4885_v17 = vpop.f32.mrb[42].mxu0 }
 0x3ce   : > { %5893 = vst [vmem:[#allocation21_spill] sm:$0xff] %v4885_v17  ;;  %v4887_v20 = vpop.f32.mrb[43].mxu0 }
 0x3cf   : > { %5894 = vst [vmem:[#allocation22_spill] sm:$0xff] %v4887_v20 }
 0x3d7   : > { %v4889_v41 = vpop.f32.mrb[44].mxu0 }
 0x3d8   : > { %5895 = vst [vmem:[#allocation23_spill] sm:$0xff] %v4889_v41  ;;  %v4891_v47 = vpop.f32.mrb[45].mxu0 }
 0x3d9   : > { %5896 = vst [vmem:[#allocation24_spill] sm:$0xff] %v4891_v47  ;;  %v4893_v46 = vpop.f32.mrb[46].mxu0 }
 0x3da   : > { %5897 = vst [vmem:[#allocation25_spill] sm:$0xff] %v4893_v46  ;;  %v4895_v21 = vpop.f32.mrb[47].mxu0 }
 0x3db   : > { %5898 = vst [vmem:[#allocation26_spill] sm:$0xff] %v4895_v21 }
 0x3e1   : > { %v3707_v58 = vpop.f32.mrb[48].mxu0 }
 0x3e2   : > { %v1514_v54 = vpop.f32.mrb[49].mxu0  ;;  %v4899_v51 = vsel %vm938_vm2, %v3707_v58, -1e+30 }
 0x3e3   : > { %1597 = vmax.xlane.f32.xlu0 %v4899_v51  ;;  %v3708_v61 = vpop.f32.mrb[50].mxu0  ;;  %v4909_v60 = vsel %vm938_vm2, %v1514_v54, -1e+30 }
 0x3e4   : > { %v1517_v23 = vpop.f32.mrb[51].mxu0  ;;  %v4914_v58 = vsel %vm938_vm2, %v3708_v61, -1e+30 }
 0x3e5   : > { %v4904_v48 = vsel %vm938_vm2, %v1517_v23, -1e+30 }
 0x3e6   : > { %1595 = vmax.xlane.f32.xlu1 %v4904_v48 }
 0x3e7   : > { %1593 = vmax.xlane.f32.xlu0 %v4909_v60 }
 0x3e9   : > { %v3711_v0 = vpop.f32.mrb[52].mxu0 }
 0x3ea   : > { %v1530_v41 = vpop.f32.mrb[53].mxu0  ;;  %v4918_v47 = vsel %vm938_vm2, %v3711_v0, -1e+30 }
 0x3eb   : > { %1599 = vmax.xlane.f32.xlu0 %v4914_v58  ;;  %1605 = vmax.xlane.f32.xlu1 %v4918_v47  ;;  %v3712_v23 = vpop.f32.mrb[54].mxu0  ;;  %v4928_v8 = vsel %vm938_vm2, %v1530_v41, -1e+30 }
 0x3ec   : > { %v1533_v33 = vpop.f32.mrb[55].mxu0  ;;  %v4934_v46 = vsel %vm938_vm2, %v3712_v23, -1e+30 }
 0x3ed   : > { %v4924_v54 = vsel %vm938_vm2, %v1533_v33, -1e+30 }
 0x3ef   : > { %1601 = vmax.xlane.f32.xlu1 %v4928_v8  ;;  %1603 = vmax.xlane.f32.xlu0 %v4924_v54 }
 0x3f1   : > { %v3715_v61 = vpop.f32.mrb[56].mxu0 }
 0x3f2   : > { %v1546_v0 = vpop.f32.mrb[57].mxu0  ;;  %v4938_v21 = vsel %vm938_vm2, %v3715_v61, -1e+30 }
 0x3f3   : > { %1607 = vmax.xlane.f32.xlu1 %v4934_v46  ;;  %1613 = vmax.xlane.f32.xlu0 %v4938_v21  ;;  %v3716_v33 = vpop.f32.mrb[58].mxu0  ;;  %v4944_v17 = vsel %vm938_vm2, %v1546_v0, -1e+30 }
 0x3f4   : > { %v1549_v41 = vpop.f32.mrb[59].mxu0  ;;  %v4949_v23 = vsel %vm938_vm2, %v3716_v33, -1e+30 }
 0x3f5   : > { %v4959_v0 = vsel %vm938_vm2, %v1549_v41, -1e+30 }
 0x3f7   : > { %1609 = vmax.xlane.f32.xlu1 %v4944_v17 }
 0x3f9   : > { %v3719_v20 = vpop.f32.mrb[60].mxu0 }
 0x3fa   : > { %v1562_v7 = vpop.f32.mrb[61].mxu0  ;;  %v4964_v33 = vsel %vm938_vm2, %v3719_v20, -1e+30 }
 0x3fb   : > { %1615 = vmax.xlane.f32.xlu1 %v4949_v23  ;;  %v3720_v61 = vpop.f32.mrb[62].mxu0  ;;  %v4954_v44 = vsel %vm938_vm2, %v1562_v7, -1e+30 }
 0x3fc   : > { %1617 = vmax.xlane.f32.xlu0 %v4954_v44  ;;  %v1565_v29 = vpop.f32.mrb[63].mxu0  ;;  %v4969_v30 = vsel %vm938_vm2, %v3720_v61, -1e+30 }
 0x3ff   : > { %1611 = vmax.xlane.f32.xlu1 %v4959_v0 }
 0x403   : > { %1621 = vmax.xlane.f32.xlu1 %v4964_v33 }
 0x407   : > { %1623 = vmax.xlane.f32.xlu1 %v4969_v30 }
 0x412   : > { %1908 = vrot.lane.b32.xlu0 %v4577_v22, %s4290_s20 }
 0x418   : > { %1906 = vrot.lane.b32.xlu1 %v4548_v2, %s4290_s20  ;;  %v4990_v2 = vsel %vm938_vm2, %v1565_v29, -1e+30 }
 0x41c   : > { %1884 = vrot.lane.b32.xlu1 %v4610_v52, %s4290_s20 }
 0x420   : > { %1888 = vrot.lane.b32.xlu1 %v4616_v53, %s4290_s20 }
 0x424   : > { %1892 = vrot.lane.b32.xlu1 %v4624_v56, %s4290_s20 }
 0x428   : > { %1896 = vrot.lane.b32.xlu1 %v4632_v59, %s4290_s20 }
 0x42c   : > { %2197 = vrot.lane.b32.xlu1 %v4484_v12, %s4290_s20  ;;  %v5017_v12 = vpop.permute.xlu0 %1900 }
 0x430   : > { %2201 = vrot.lane.b32.xlu1 %v4512_v38, %s4290_s20  ;;  %v5022_v38 = vpop.permute.xlu0 %1904 }
 0x431   : > { %1619 = vmax.xlane.f32.xlu0 %v4990_v2 }
 0x434   : > { %2203 = vrot.lane.b32.xlu1 %v4541_v63, %s4290_s20  ;;  %v5024_v63 = vpop.permute.xlu1 %1902 }
 0x438   : > { %2205 = vrot.lane.b32.xlu1 %v4543_v31, %s4290_s20  ;;  %v4244_v31 = vld [vmem:[#allocation3 + $0x8] sm:$0xff] }
 0x43c   : > { %2209 = vrot.lane.b32.xlu1 %v4564_v15, %s4290_s20 }
 0x440   : > { %2376 = vrot.lane.b32.xlu1 %v4490_v18, %s4291_s21  ;;  %v4243_v18 = vld [vmem:[#allocation3] sm:$0xff] }
 0x447   : > { %1910 = vrot.lane.b32.xlu0 %v4586_v34, %s4290_s20 }
 0x44b   : > { %1912 = vrot.lane.b32.xlu0 %v4602_v49, %s4290_s20 }
 0x44f   : > { %1882 = vrot.lane.b32.xlu0 %v4568_v19, %s4290_s20 }
 0x453   : > { %1886 = vrot.lane.b32.xlu0 %v4608_v42, %s4290_s20 }
 0x457   : > { %1890 = vrot.lane.b32.xlu0 %v4618_v55, %s4290_s20 }
 0x45b   : > { %1894 = vrot.lane.b32.xlu0 %v4626_v57, %s4290_s20 }
 0x45f   : > { %2195 = vrot.lane.b32.xlu0 %v4482_v11, %s4290_s20 }
 0x463   : > { %2199 = vrot.lane.b32.xlu0 %v4510_v37, %s4290_s20 }
 0x467   : > { %2207 = vrot.lane.b32.xlu0 %v4562_v14, %s4290_s20 }
 0x46b   : > { %2372 = vrot.lane.b32.xlu0 %v4243_v18, %s4291_s21 }
 0x46f   : > { %2374 = vrot.lane.b32.xlu0 %v4244_v31, %s4291_s21 }
 0x470   : > { %v1598_v15 = vpop.xlane.xlu0 %1597 }
 0x471   : > { %v1627_v37 = vsub.f32 %v4899_v51, %v1598_v15 }
 0x473   : > { %2378 = vrot.lane.b32.xlu0 %v4530_v50, %s4291_s21  ;;  %v1596_v11 = vpop.xlane.xlu1 %1595  ;;  %v1645_v42 = vmul.f32 1.442695, %v1627_v37 }
 0x474   : > { %v1626_v19 = vsub.f32 %v4904_v48, %v1596_v11  ;;  %v1594_v14 = vpop.xlane.xlu0 %1593 }
 0x475   : > { %v1625_v22 = vsub.f32 %v4909_v60, %v1594_v14 }
 0x476   : > { %v1643_v34 = vmul.f32 1.442695, %v1626_v19 }
 0x477   : > { %v1641_v49 = vmul.f32 1.442695, %v1625_v22  ;;  %v1939_v22 = vsel %vm963_vm1, %v4860_v1, 0 }
 0x478   : > { %4019 = vpow2.f32 %v1643_v34  ;;  %v1600_v52 = vpop.xlane.xlu0 %1599  ;;  %v1606_v53 = vpop.xlane.xlu1 %1605 }
 0x479   : > { %4021 = vpow2.f32 %v1641_v49  ;;  %v1628_v55 = vsub.f32 %v4914_v58, %v1600_v52  ;;  %v1631_v59 = vsub.f32 %v4918_v47, %v1606_v53 }
 0x47a   : > { %4023 = vpow2.f32 %v1645_v42 }
 0x47b   : > { %v1647_v56 = vmul.f32 1.442695, %v1628_v55  ;;  %v1653_v60 = vmul.f32 1.442695, %v1631_v59 }
 0x47c   : > { %v1604_v50 = vpop.xlane.xlu0 %1603  ;;  %v1602_v57 = vpop.xlane.xlu1 %1601 }
 0x47d   : > { %4025 = vpow2.f32 %v1647_v56  ;;  %v1630_v29 = vsub.f32 %v4924_v54, %v1604_v50  ;;  %v1629_v7 = vsub.f32 %v4928_v8, %v1602_v57 }
 0x47f   : > { %v1651_v20 = vmul.f32 1.442695, %v1630_v29  ;;  %v1649_v51 = vmul.f32 1.442695, %v1629_v7 }
 0x480   : > { %v1608_v48 = vpop.xlane.xlu1 %1607  ;;  %v1614_v15 = vpop.xlane.xlu0 %1613 }
 0x481   : > { %4027 = vpow2.f32 %v1651_v20  ;;  %v1632_v41 = vsub.f32 %v4934_v46, %v1608_v48  ;;  %v1635_v14 = vsub.f32 %v4938_v21, %v1614_v15  ;;  %v1945_v20 = vsel %vm963_vm1, %v5024_v63, 0 }
 0x482   : > { %v5037_v61 = vpop.eup %4019  ;;  %4029 = vpow2.f32 %v1649_v51 }
 0x483   : > { %v5039_v58 = vpop.eup %4021  ;;  %v1655_v18 = vmul.f32 1.442695, %v1632_v41  ;;  %4031 = vpow2.f32 %v1653_v60  ;;  %v1948_v41 = vsel %vm963_vm1, %v5022_v38, 0 }
 0x484   : > { %v1610_v31 = vpop.xlane.xlu1 %1609  ;;  %v1705_v47 = vpack.c.bf16 %v5037_v61, %v5039_v58  ;;  %v5043_v54 = vpop.eup %4023 }
 0x485   : > { %4033 = vpow2.f32 %v1655_v18  ;;  %v1633_v46 = vsub.f32 %v4944_v17, %v1610_v31 }
 0x486   : > { %3737 = vmatprep.mubr.bf16.mxu1 %v1705_v47 }
 0x487   : > { %v5045_v8 = vpop.eup %4025  ;;  %v1657_v49 = vmul.f32 1.442695, %v1633_v46 }
 0x488   : > { %v1616_v11 = vpop.xlane.xlu1 %1615  ;;  %v1706_v37 = vpack.c.bf16 %v5045_v8, %v5043_v54 }
 0x489   : > { %v1636_v19 = vsub.f32 %v4949_v23, %v1616_v11  ;;  %v1661_v23 = vmul.f32 1.442695, %v1635_v14  ;;  %4035 = vpow2.f32 %v1657_v49 }
 0x48a   : > { %3738 = vmatmul.mubr.bf16.vlgmr.msra.gmra.mrb[32].mxu1 %v1706_v37 }
 0x48b   : > { %v5054_v34 = vpop.eup %4027  ;;  %3754 = vmatpush3.bf16.xpose.msra.mxu1 %v1939_v22  ;;  %v1663_v52 = vmul.f32 1.442695, %v1636_v19 }
 0x48c   : > { %v5056_v42 = vpop.eup %4029  ;;  %3918 = vmatprep.subr.msk.bf16.mxu1 %vm963_vm1, %v5017_v12  ;;  %v1612_v17 = vpop.xlane.xlu1 %1611 }
 0x48d   : > { %v1634_v53 = vsub.f32 %v4959_v0, %v1612_v17  ;;  %v1707_v21 = vpack.c.bf16 %v5054_v34, %v5056_v42  ;;  %v5063_v55 = vpop.eup %4031  ;;  %4037 = vpow2.f32 %v1663_v52  ;;  %v1942_v0 = vsel %vm963_vm1, %v5017_v12, 0 }
 0x48f   : > { %v1659_v1 = vmul.f32 1.442695, %v1634_v53  ;;  %3741 = vmatprep.mubr.bf16.mxu1 %v1707_v21  ;;  %v5065_v56 = vpop.eup %4033 }
 0x490   : > { %v1708_v50 = vpack.c.bf16 %v5065_v56, %v5063_v55  ;;  %v1622_v57 = vpop.xlane.xlu1 %1621 }
 0x491   : > { %4039 = vpow2.f32 %v1659_v1 }
 0x492   : > { %4041 = vpow2.f32 %v1661_v23  ;;  %3742 = vmatmul.mubr.bf16.gmra.mrb[36].mxu1 %v1708_v50 }
 0x493   : > { %3756 = vmatpush3.bf16.xpose.msra.mxu1 %v1942_v0  ;;  %v5073_v59 = vpop.eup %4035 }
 0x494   : > { %3919 = vmatprep.subr.msk.bf16.mxu1 %vm963_vm1, %v5024_v63  ;;  %v1624_v60 = vpop.xlane.xlu1 %1623  ;;  %v1618_v63 = vpop.xlane.xlu0 %1617 }
 0x495   : > { %v1637_v46 = vsub.f32 %v4954_v44, %v1618_v63  ;;  %v1640_v11 = vsub.f32 %v4969_v30, %v1624_v60 }
 0x497   : > { %v5075_v29 = vpop.eup %4037  ;;  %v1665_v37 = vmul.f32 1.442695, %v1637_v46  ;;  %v1671_v19 = vmul.f32 1.442695, %v1640_v11 }
 0x498   : > { %v1907_v18 = vpop.permute.xlu1 %1906  ;;  %v1909_v47 = vpop.permute.xlu0 %1908 }
 0x499   : > { %v1951_v31 = vsel %vm963_vm1, %v1907_v18, 0  ;;  %v1954_v15 = vsel %vm963_vm1, %v1909_v47, 0  ;;  %4043 = vpow2.f32 %v1665_v37 }
 0x49a   : > { %4045 = vpow2.f32 %v1671_v19 }
 0x49b   : > { %v5077_v7 = vpop.eup %4039  ;;  %3758 = vmatpush3.bf16.xpose.msra.mxu1 %v1945_v20 }
 0x49c   : > { %v5081_v51 = vpop.eup %4041  ;;  %v1709_v12 = vpack.c.bf16 %v5077_v7, %v5073_v59  ;;  %3920 = vmatprep.subr.msk.bf16.mxu1 %vm963_vm1, %v5022_v38  ;;  %v1639_v38 = vsub.f32 %v4964_v33, %v1622_v57  ;;  %v1885_v17 = vpop.permute.xlu1 %1884 }
 0x49d   : > { %v1710_v48 = vpack.c.bf16 %v5075_v29, %v5081_v51 }
 0x49e   : > { %3745 = vmatprep.mubr.bf16.mxu1 %v1709_v12  ;;  %v1669_v49 = vmul.f32 1.442695, %v1639_v38 }
 0x49f   : > { %3746 = vmatmul.mubr.bf16.gmra.mrb[40].mxu1 %v1710_v48 }
 0x4a0   : > { %v1889_v33 = vpop.permute.xlu1 %1888 }
 0x4a3   : > { %3760 = vmatpush3.bf16.xpose.msra.mxu1 %v1948_v41  ;;  %v5102_v23 = vpop.eup %4043 }
 0x4a4   : > { %3921 = vmatprep.subr.msk.bf16.mxu1 %vm963_vm1, %v1907_v18  ;;  %v5105_v1 = vpop.eup %4045  ;;  %v1893_v57 = vpop.permute.xlu1 %1892 }
 0x4a8   : > { %v1897_v41 = vpop.permute.xlu1 %1896 }
 0x4ab   : > { %3762 = vmatpush3.bf16.xpose.msra.mxu1 %v1951_v31 }
 0x4ac   : > { %3922 = vmatprep.subr.msk.bf16.mxu1 %vm963_vm1, %v1909_v47  ;;  %v2198_v63 = vpop.permute.xlu1 %2197 }
 0x4b0   : > { %v2202_v47 = vpop.permute.xlu1 %2201 }
 0x4b3   : > { %3764 = vmatpush3.bf16.xpose.msra.mxu1 %v1954_v15 }
 0x4b4   : > { %v2204_v46 = vpop.permute.xlu1 %2203 }
 0x4b8   : > { %v2206_v11 = vpop.permute.xlu1 %2205 }
 0x4bc   : > { %v2210_v37 = vpop.permute.xlu1 %2209 }
 0x4be   : > { %v1620_v14 = vpop.xlane.xlu0 %1619 }
 0x4bf   : > { %v1638_v22 = vsub.f32 %v4990_v2, %v1620_v14 }
 0x4c1   : > { %v1667_v52 = vmul.f32 1.442695, %v1638_v22 }
 0x4c2   : > { %v1911_v53 = vpop.permute.xlu0 %1910 }
 0x4c3   : > { %4047 = vpow2.f32 %v1667_v52  ;;  %3923 = vmatprep.subr.msk.bf16.mxu1 %vm963_vm1, %v1911_v53  ;;  %v1957_v44 = vsel %vm963_vm1, %v1911_v53, 0 }
 0x4c4   : > { %4049 = vpow2.f32 %v1669_v49  ;;  %3766 = vmatpush3.bf16.xpose.msra.mxu1 %v1957_v44 }
 0x4c6   : > { %v1913_v30 = vpop.permute.xlu0 %1912 }
 0x4c7   : > { %3924 = vmatprep.subr.msk.bf16.mxu1 %vm963_vm1, %v1913_v30  ;;  %v1960_v2 = vsel %vm963_vm1, %v1913_v30, 0 }
 0x4ca   : > { %v1883_v21 = vpop.permute.xlu0 %1882 }
 0x4cc   : > { %3768 = vmatpush3.bf16.xpose.msra.mxu1 %v1960_v2 }
 0x4cd   : > { %v5107_v50 = vpop.eup %4047 }
 0x4ce   : > { %v5109_v0 = vpop.eup %4049  ;;  %v1887_v20 = vpop.permute.xlu0 %1886  ;;  %v1711_v12 = vpack.c.bf16 %v5107_v50, %v5102_v23 }
 0x4cf   : > { %v1712_v48 = vpack.c.bf16 %v5105_v1, %v5109_v0 }
 0x4d0   : > { %3749 = vmatprep.mubr.bf16.mxu1 %v1711_v12 }
 0x4d1   : > { %3750 = vmatmul.mubr.bf16.gmra.mrb[44].mxu1 %v1712_v48 }
 0x4d2   : > { %v1891_v60 = vpop.permute.xlu0 %1890  ;;  %3769 = vmatprep.mubr.msk.bf16.mxu1 %vm963_vm1, %v1883_v21 }
 0x4d6   : > { %v1895_v18 = vpop.permute.xlu0 %1894 }
 0x4d9   : > { %3770 = vmatmul.mubr.msk.bf16.vlgmr.msra.gmra.mrb[48].mxu1 %vm963_vm1, %v1885_v17 }
 0x4da   : > { %v2196_v31 = vpop.permute.xlu0 %2195  ;;  %3773 = vmatprep.mubr.msk.bf16.mxu1 %vm963_vm1, %v1887_v20 }
 0x4db   : > { %3785 = vmatprep.subr.bf16.mxu0 %v2196_v31 }
 0x4dc   : > { %3786 = vmatpush3.bf16.msra.mxu0 %v2196_v31 }
 0x4dd   : > { %3787 = vmatprep.subr.bf16.mxu0 %v2198_v63 }
 0x4de   : > { %v2200_v15 = vpop.permute.xlu0 %2199 }
 0x4e0   : > { %3788 = vmatpush3.bf16.msra.mxu0 %v2198_v63 }
 0x4e1   : > { %3774 = vmatmul.mubr.msk.bf16.gmra.mrb[52].mxu1 %vm963_vm1, %v1889_v33  ;;  %3789 = vmatprep.subr.bf16.mxu0 %v2200_v15 }
 0x4e2   : > { %3777 = vmatprep.mubr.msk.bf16.mxu1 %vm963_vm1, %v1891_v60  ;;  %v2208_v38 = vpop.permute.xlu0 %2207 }
 0x4e4   : > { %3790 = vmatpush3.bf16.msra.mxu0 %v2200_v15 }
 0x4e5   : > { %3791 = vmatprep.subr.bf16.mxu0 %v2202_v47 }
 0x4e6   : > { %v5123_v19 = vpop.permute.xlu0 %2372 }
 0x4e8   : > { %3792 = vmatpush3.bf16.msra.mxu0 %v2202_v47 }
 0x4e9   : > { %3778 = vmatmul.mubr.msk.bf16.gmra.mrb[56].mxu1 %vm963_vm1, %v1893_v57  ;;  %3793 = vmatprep.subr.bf16.mxu0 %v2204_v46 }
 0x4ea   : > { %3781 = vmatprep.mubr.msk.bf16.mxu1 %vm963_vm1, %v1895_v18 }
 0x4ec   : > { %3794 = vmatpush3.bf16.msra.mxu0 %v2204_v46 }
 0x4ed   : > { %3795 = vmatprep.subr.bf16.mxu0 %v2206_v11 }
 0x4f0   : > { %3796 = vmatpush3.bf16.msra.mxu0 %v2206_v11 }
 0x4f1   : > { %3782 = vmatmul.mubr.msk.bf16.gmra.mrb[60].mxu1 %vm963_vm1, %v1897_v41  ;;  %3797 = vmatprep.subr.bf16.mxu0 %v2208_v38 }
 0x4f4   : > { %3798 = vmatpush3.bf16.msra.mxu0 %v2208_v38 }
 0x4f5   : > { %3799 = vmatprep.subr.bf16.mxu0 %v2210_v37 }
 0x4f8   : > { %3800 = vmatpush3.bf16.msra.mxu0 %v2210_v37 }
 0x4f9   : > { %3925 = vmatprep.subr.msk.bf16.mxu0 %vm963_vm1, %v5123_v19 }
 0x55d   : > { %v5127_v14 = vpop.f32.mrb[32].mxu1 }
 0x55e   : > { %5899 = vst [vmem:[#allocation27_spill] sm:$0xff] %v5127_v14  ;;  %v5129_v22 = vpop.f32.mrb[33].mxu1 }
 0x55f   : > { %5900 = vst [vmem:[#allocation28_spill] sm:$0xff] %v5129_v22  ;;  %v5131_v49 = vpop.f32.mrb[34].mxu1 }
 0x560   : > { %5901 = vst [vmem:[#allocation29_spill] sm:$0xff] %v5131_v49  ;;  %v5133_v52 = vpop.f32.mrb[35].mxu1 }
 0x561   : > { %5902 = vst [vmem:[#allocation30_spill] sm:$0xff] %v5133_v52 }
 0x565   : > { %v5135_v17 = vpop.f32.mrb[36].mxu1 }
 0x566   : > { %5903 = vst [vmem:[#allocation31_spill] sm:$0xff] %v5135_v17  ;;  %v5137_v53 = vpop.f32.mrb[37].mxu1  ;;  %v4252_v17 = vld [vmem:[#allocation4 + $0x20] sm:$0xff] }
 0x567   : > { %5904 = vst [vmem:[#allocation32_spill] sm:$0xff] %v5137_v53  ;;  %v5139_v44 = vpop.f32.mrb[38].mxu1 }
 0x568   : > { %5905 = vst [vmem:[#allocation33_spill] sm:$0xff] %v5139_v44  ;;  %v5141_v30 = vpop.f32.mrb[39].mxu1  ;;  %v4250_v44 = vld [vmem:[#allocation2 + $0x38] sm:$0xff] }
 0x569   : > { %5906 = vst [vmem:[#allocation34_spill] sm:$0xff] %v5141_v30 }
 0x572   : > { %v5143_v33 = vpop.f32.mrb[40].mxu1 }
 0x573   : > { %5907 = vst [vmem:[#allocation35_spill] sm:$0xff] %v5143_v33  ;;  %v5145_v21 = vpop.f32.mrb[41].mxu1 }
 0x574   : > { %5908 = vst [vmem:[#allocation36_spill] sm:$0xff] %v5145_v21  ;;  %v5147_v2 = vpop.f32.mrb[42].mxu1  ;;  %v4248_v21 = vld [vmem:[#allocation2 + $0x18] sm:$0xff] }
 0x575   : > { %5909 = vst [vmem:[#allocation37_spill] sm:$0xff] %v5147_v2  ;;  %v5149_v57 = vpop.f32.mrb[43].mxu1 }
 0x576   : > { %5910 = vst [vmem:[#allocation38_spill] sm:$0xff] %v5149_v57  ;;  %v4246_v57 = vld [vmem:[#allocation3 + $0x20] sm:$0xff] }
 0x5a4   : > { %v5151_v20 = vpop.f32.mrb[44].mxu1 }
 0x5a5   : > { %5911 = vst [vmem:[#allocation39_spill] sm:$0xff] %v5151_v20  ;;  %v5153_v12 = vpop.f32.mrb[45].mxu1 }
 0x5a6   : > { %5912 = vst [vmem:[#allocation40_spill] sm:$0xff] %v5153_v12  ;;  %v5155_v48 = vpop.f32.mrb[46].mxu1 }
 0x5a7   : > { %5913 = vst [vmem:[#allocation41_spill] sm:$0xff] %v5155_v48  ;;  %v5157_v60 = vpop.f32.mrb[47].mxu1 }
 0x5a8   : > { %5914 = vst [vmem:[#allocation42_spill] sm:$0xff] %v5157_v60 }
 0x5ac   : > { %v3771_v41 = vpop.f32.mrb[48].mxu1 }
 0x5ad   : > { %v1996_v18 = vpop.f32.mrb[49].mxu1  ;;  %v5161_v63 = vsel %vm938_vm2, %v3771_v41, -1e+30 }
 0x5ae   : > { %2079 = vmax.xlane.f32.xlu0 %v5161_v63  ;;  %v3772_v31 = vpop.f32.mrb[50].mxu1  ;;  %v5171_v46 = vsel %vm938_vm2, %v1996_v18, -1e+30 }
 0x5af   : > { %v1999_v47 = vpop.f32.mrb[51].mxu1  ;;  %v5176_v37 = vsel %vm938_vm2, %v3772_v31, -1e+30 }
 0x5b0   : > { %v5166_v15 = vsel %vm938_vm2, %v1999_v47, -1e+30 }
 0x5b1   : > { %2077 = vmax.xlane.f32.xlu1 %v5166_v15 }
 0x5b2   : > { %2075 = vmax.xlane.f32.xlu0 %v5171_v46 }
 0x5b4   : > { %v3775_v11 = vpop.f32.mrb[52].mxu1 }
 0x5b5   : > { %v2012_v38 = vpop.f32.mrb[53].mxu1  ;;  %v5180_v41 = vsel %vm938_vm2, %v3775_v11, -1e+30 }
 0x5b6   : > { %2081 = vmax.xlane.f32.xlu0 %v5176_v37  ;;  %2087 = vmax.xlane.f32.xlu1 %v5180_v41  ;;  %v3776_v47 = vpop.f32.mrb[54].mxu1  ;;  %v5190_v20 = vsel %vm938_vm2, %v2012_v38, -1e+30 }
 0x5b7   : > { %v2015_v48 = vpop.f32.mrb[55].mxu1  ;;  %v5196_v60 = vsel %vm938_vm2, %v3776_v47, -1e+30 }
 0x5b8   : > { %v5186_v18 = vsel %vm938_vm2, %v2015_v48, -1e+30 }
 0x5ba   : > { %2083 = vmax.xlane.f32.xlu1 %v5190_v20  ;;  %2085 = vmax.xlane.f32.xlu0 %v5186_v18 }
 0x5bc   : > { %v3779_v31 = vpop.f32.mrb[56].mxu1 }
 0x5bd   : > { %v2028_v11 = vpop.f32.mrb[57].mxu1  ;;  %v5200_v12 = vsel %vm938_vm2, %v3779_v31, -1e+30 }
 0x5be   : > { %2089 = vmax.xlane.f32.xlu1 %v5196_v60  ;;  %2095 = vmax.xlane.f32.xlu0 %v5200_v12  ;;  %v3780_v48 = vpop.f32.mrb[58].mxu1  ;;  %v5206_v39 = vsel %vm938_vm2, %v2028_v11, -1e+30 }
 0x5bf   : > { %v2031_v38 = vpop.f32.mrb[59].mxu1  ;;  %v5211_v47 = vsel %vm938_vm2, %v3780_v48, -1e+30 }
 0x5c0   : > { %v5221_v11 = vsel %vm938_vm2, %v2031_v38, -1e+30  ;;  %v4247_v38 = vld [vmem:[#allocation2 + $0x8] sm:$0xff] }
 0x5c2   : > { %2091 = vmax.xlane.f32.xlu1 %v5206_v39 }
 0x5c4   : > { %v3783_v10 = vpop.f32.mrb[60].mxu1 }
 0x5c5   : > { %v2044_v4 = vpop.f32.mrb[61].mxu1  ;;  %v5226_v48 = vsel %vm938_vm2, %v3783_v10, -1e+30  ;;  %v4249_v10 = vld [vmem:[#allocation2 + $0x28] sm:$0xff] }
 0x5c6   : > { %2097 = vmax.xlane.f32.xlu1 %v5211_v47  ;;  %v3784_v31 = vpop.f32.mrb[62].mxu1  ;;  %v5216_v2 = vsel %vm938_vm2, %v2044_v4, -1e+30  ;;  %v4245_v4 = vld [vmem:[#allocation3 + $0x28] sm:$0xff] }
 0x5c7   : > { %2099 = vmax.xlane.f32.xlu0 %v5216_v2  ;;  %v2047_v33 = vpop.f32.mrb[63].mxu1  ;;  %v5231_v43 = vsel %vm938_vm2, %v3784_v31, -1e+30  ;;  %v4251_v31 = vld [vmem:[#allocation4 + $0x8] sm:$0xff] }
 0x5ca   : > { %2093 = vmax.xlane.f32.xlu1 %v5221_v11 }
 0x5ce   : > { %2103 = vmax.xlane.f32.xlu1 %v5226_v48 }
 0x5d2   : > { %2105 = vmax.xlane.f32.xlu1 %v5231_v43 }
 0x5dd   : > { %2382 = vrot.lane.b32.xlu0 %v4245_v4, %s4291_s21  ;;  %v4253_v4 = vld [vmem:[#allocation3 + $0x30] sm:$0xff] }
 0x5e3   : > { %2380 = vrot.lane.b32.xlu1 %v4246_v57, %s4291_s21  ;;  %v5244_v57 = vsel %vm938_vm2, %v2047_v33, -1e+30  ;;  %v4259_v33 = vld [vmem:[#allocation4] sm:$0xff] }
 0x5e7   : > { %2358 = vrot.lane.b32.xlu1 %v4247_v38, %s4291_s21  ;;  %v4255_v38 = vld [vmem:[#allocation2] sm:$0xff] }
 0x5eb   : > { %2362 = vrot.lane.b32.xlu1 %v4248_v21, %s4291_s21  ;;  %v4254_v21 = vld [vmem:[#allocation3 + $0x38] sm:$0xff] }
 0x5ef   : > { %2366 = vrot.lane.b32.xlu1 %v4249_v10, %s4291_s21  ;;  %v4257_v10 = vld [vmem:[#allocation2 + $0x20] sm:$0xff] }
 0x5f3   : > { %2370 = vrot.lane.b32.xlu1 %v4250_v44, %s4291_s21  ;;  %v4256_v44 = vld [vmem:[#allocation2 + $0x10] sm:$0xff] }
 0x5f7   : > { %2671 = vrot.lane.b32.xlu1 %v4251_v31, %s4291_s21  ;;  %v4260_v31 = vld [vmem:[#allocation4 + $0x10] sm:$0xff] }
 0x5fb   : > { %2677 = vrot.lane.b32.xlu1 %v4252_v17, %s4291_s21  ;;  %v4258_v17 = vld [vmem:[#allocation2 + $0x30] sm:$0xff] }
 0x5fc   : > { %2101 = vmax.xlane.f32.xlu0 %v5244_v57 }
 0x612   : > { %2384 = vrot.lane.b32.xlu0 %v4253_v4, %s4291_s21  ;;  %v5255_v4 = vpop.permute.xlu0 %2374 }
 0x616   : > { %2386 = vrot.lane.b32.xlu0 %v4254_v21, %s4291_s21  ;;  %v4261_v21 = vld [vmem:[#allocation4 + $0x18] sm:$0xff] }
 0x61a   : > { %2356 = vrot.lane.b32.xlu0 %v4255_v38, %s4291_s21  ;;  %v4262_v38 = vld [vmem:[#allocation4 + $0x28] sm:$0xff] }
 0x61e   : > { %2360 = vrot.lane.b32.xlu0 %v4256_v44, %s4291_s21  ;;  %v5259_v44 = vpop.permute.xlu0 %2378 }
 0x622   : > { %2364 = vrot.lane.b32.xlu0 %v4257_v10, %s4291_s21  ;;  %v5261_v10 = vpop.permute.xlu1 %2376 }
 0x626   : > { %2368 = vrot.lane.b32.xlu0 %v4258_v17, %s4291_s21 }
 0x62a   : > { %2669 = vrot.lane.b32.xlu0 %v4259_v33, %s4291_s21 }
 0x62e   : > { %2673 = vrot.lane.b32.xlu0 %v4260_v31, %s4291_s21 }
 0x632   : > { %2675 = vrot.lane.b32.xlu0 %v4261_v21, %s4291_s21 }
 0x636   : > { %2679 = vrot.lane.b32.xlu0 %v4262_v38, %s4291_s21 }
 0x63b   : > { %v2080_v30 = vpop.xlane.xlu0 %2079 }
 0x63c   : > { %v2109_v53 = vsub.f32 %v5161_v63, %v2080_v30 }
 0x63e   : > { %v2078_v17 = vpop.xlane.xlu1 %2077  ;;  %v2127_v49 = vmul.f32 1.442695, %v2109_v53 }
 0x63f   : > { %v2108_v33 = vsub.f32 %v5166_v15, %v2078_v17  ;;  %v2076_v28 = vpop.xlane.xlu0 %2075 }
 0x640   : > { %v2107_v31 = vsub.f32 %v5171_v46, %v2076_v28 }
 0x641   : > { %v2125_v32 = vmul.f32 1.442695, %v2108_v33 }
 0x642   : > { %v2123_v6 = vmul.f32 1.442695, %v2107_v31 }
 0x643   : > { %4051 = vpow2.f32 %v2125_v32  ;;  %v2082_v21 = vpop.xlane.xlu0 %2081  ;;  %v2088_v14 = vpop.xlane.xlu1 %2087 }
 0x644   : > { %4053 = vpow2.f32 %v2123_v6  ;;  %v2110_v38 = vsub.f32 %v5176_v37, %v2082_v21  ;;  %v2113_v30 = vsub.f32 %v5180_v41, %v2088_v14  ;;  %v2413_v21 = vsel %vm963_vm1, %v5123_v19, 0 }
 0x645   : > { %4055 = vpow2.f32 %v2127_v49 }
 0x646   : > { %v2129_v27 = vmul.f32 1.442695, %v2110_v38  ;;  %v2135_v32 = vmul.f32 1.442695, %v2113_v30 }
 0x647   : > { %v2086_v52 = vpop.xlane.xlu0 %2085  ;;  %v2084_v22 = vpop.xlane.xlu1 %2083 }
 0x648   : > { %4057 = vpow2.f32 %v2129_v27  ;;  %v2112_v63 = vsub.f32 %v5186_v18, %v2086_v52  ;;  %v2111_v28 = vsub.f32 %v5190_v20, %v2084_v22 }
 0x64a   : > { %v2133_v15 = vmul.f32 1.442695, %v2112_v63  ;;  %v2131_v46 = vmul.f32 1.442695, %v2111_v28 }
 0x64b   : > { %v2090_v53 = vpop.xlane.xlu1 %2089  ;;  %v2096_v20 = vpop.xlane.xlu0 %2095 }
 0x64c   : > { %4059 = vpow2.f32 %v2133_v15  ;;  %v2114_v6 = vsub.f32 %v5196_v60, %v2090_v53  ;;  %v2117_v31 = vsub.f32 %v5200_v12, %v2096_v20  ;;  %v2419_v20 = vsel %vm963_vm1, %v5261_v10, 0 }
 0x64d   : > { %v5271_v17 = vpop.eup %4051  ;;  %4061 = vpow2.f32 %v2131_v46 }
 0x64e   : > { %v5273_v49 = vpop.eup %4053  ;;  %v2137_v37 = vmul.f32 1.442695, %v2114_v6  ;;  %4063 = vpow2.f32 %v2135_v32 }
 0x64f   : > { %v2092_v27 = vpop.xlane.xlu1 %2091  ;;  %v2187_v14 = vpack.c.bf16 %v5271_v17, %v5273_v49  ;;  %v5277_v52 = vpop.eup %4055 }
 0x650   : > { %4065 = vpow2.f32 %v2137_v37  ;;  %v2115_v60 = vsub.f32 %v5206_v39, %v2092_v27 }
 0x651   : > { %3801 = vmatprep.mubr.bf16.mxu0 %v2187_v14 }
 0x652   : > { %v5279_v22 = vpop.eup %4057  ;;  %v2139_v30 = vmul.f32 1.442695, %v2115_v60 }
 0x653   : > { %v2098_v41 = vpop.xlane.xlu1 %2097  ;;  %v2188_v18 = vpack.c.bf16 %v5279_v22, %v5277_v52 }
 0x654   : > { %v2118_v33 = vsub.f32 %v5211_v47, %v2098_v41  ;;  %v2143_v47 = vmul.f32 1.442695, %v2117_v31  ;;  %4067 = vpow2.f32 %v2139_v30 }
 0x655   : > { %3802 = vmatmul.mubr.bf16.vlgmr.msra.gmra.mrb[64].mxu0 %v2188_v18 }
 0x656   : > { %v5288_v38 = vpop.eup %4059  ;;  %3818 = vmatpush3.bf16.xpose.msra.mxu0 %v2413_v21  ;;  %v2145_v28 = vmul.f32 1.442695, %v2118_v33  ;;  %v2422_v33 = vsel %vm963_vm1, %v5259_v44, 0 }
 0x657   : > { %v5290_v63 = vpop.eup %4061  ;;  %3926 = vmatprep.subr.msk.bf16.mxu0 %vm963_vm1, %v5255_v4  ;;  %v2094_v39 = vpop.xlane.xlu1 %2093 }
 0x658   : > { %v2116_v15 = vsub.f32 %v5221_v11, %v2094_v39  ;;  %v2189_v12 = vpack.c.bf16 %v5288_v38, %v5290_v63  ;;  %v5297_v46 = vpop.eup %4063  ;;  %4069 = vpow2.f32 %v2145_v28  ;;  %v2416_v11 = vsel %vm963_vm1, %v5255_v4, 0 }
 0x65a   : > { %v2141_v19 = vmul.f32 1.442695, %v2116_v15  ;;  %3805 = vmatprep.mubr.bf16.mxu0 %v2189_v12  ;;  %v5299_v53 = vpop.eup %4065 }
 0x65b   : > { %v2190_v32 = vpack.c.bf16 %v5299_v53, %v5297_v46  ;;  %v2104_v6 = vpop.xlane.xlu1 %2103 }
 0x65c   : > { %4071 = vpow2.f32 %v2141_v19 }
 0x65d   : > { %4073 = vpow2.f32 %v2143_v47  ;;  %3806 = vmatmul.mubr.bf16.gmra.mrb[68].mxu0 %v2190_v32 }
 0x65e   : > { %3820 = vmatpush3.bf16.xpose.msra.mxu0 %v2416_v11  ;;  %v5307_v37 = vpop.eup %4067 }
 0x65f   : > { %3927 = vmatprep.subr.msk.bf16.mxu0 %vm963_vm1, %v5261_v10  ;;  %v2106_v18 = vpop.xlane.xlu1 %2105  ;;  %v2100_v10 = vpop.xlane.xlu0 %2099 }
 0x660   : > { %v2119_v39 = vsub.f32 %v5216_v2, %v2100_v10  ;;  %v2122_v15 = vsub.f32 %v5231_v43, %v2106_v18 }
 0x662   : > { %v5309_v27 = vpop.eup %4069  ;;  %v2147_v12 = vmul.f32 1.442695, %v2119_v39  ;;  %v2153_v47 = vmul.f32 1.442695, %v2122_v15 }
 0x663   : > { %v2381_v31 = vpop.permute.xlu1 %2380  ;;  %v2383_v30 = vpop.permute.xlu0 %2382 }
 0x664   : > { %v2425_v21 = vsel %vm963_vm1, %v2381_v31, 0  ;;  %v2428_v28 = vsel %vm963_vm1, %v2383_v30, 0  ;;  %4075 = vpow2.f32 %v2147_v12 }
 0x665   : > { %4077 = vpow2.f32 %v2153_v47 }
 0x666   : > { %v5311_v14 = vpop.eup %4071  ;;  %3822 = vmatpush3.bf16.xpose.msra.mxu0 %v2419_v20 }
 0x667   : > { %v5315_v60 = vpop.eup %4073  ;;  %v2191_v4 = vpack.c.bf16 %v5311_v14, %v5307_v37  ;;  %3928 = vmatprep.subr.msk.bf16.mxu0 %vm963_vm1, %v5259_v44  ;;  %v2121_v44 = vsub.f32 %v5226_v48, %v2104_v6  ;;  %v2359_v2 = vpop.permute.xlu1 %2358 }
 0x668   : > { %v2192_v41 = vpack.c.bf16 %v5309_v27, %v5315_v60 }
 0x669   : > { %3809 = vmatprep.mubr.bf16.mxu0 %v2191_v4  ;;  %v2151_v11 = vmul.f32 1.442695, %v2121_v44 }
 0x66a   : > { %3810 = vmatmul.mubr.bf16.gmra.mrb[72].mxu0 %v2192_v41 }
 0x66b   : > { %v2363_v48 = vpop.permute.xlu1 %2362 }
 0x66e   : > { %3824 = vmatpush3.bf16.xpose.msra.mxu0 %v2422_v33  ;;  %v5336_v18 = vpop.eup %4075 }
 0x66f   : > { %3929 = vmatprep.subr.msk.bf16.mxu0 %vm963_vm1, %v2381_v31  ;;  %v5339_v33 = vpop.eup %4077  ;;  %v2367_v39 = vpop.permute.xlu1 %2366 }
 0x673   : > { %v2371_v44 = vpop.permute.xlu1 %2370 }
 0x676   : > { %3826 = vmatpush3.bf16.xpose.msra.mxu0 %v2425_v21 }
 0x677   : > { %3930 = vmatprep.subr.msk.bf16.mxu0 %vm963_vm1, %v2383_v30 }
 0x67e   : > { %3828 = vmatpush3.bf16.xpose.msra.mxu0 %v2428_v28 }
 0x689   : > { %v2102_v19 = vpop.xlane.xlu0 %2101 }
 0x68a   : > { %v2120_v32 = vsub.f32 %v5244_v57, %v2102_v19  ;;  %v2672_v19 = vpop.permute.xlu1 %2671 }
 0x68c   : > { %v2149_v20 = vmul.f32 1.442695, %v2120_v32 }
 0x68d   : > { %v2385_v4 = vpop.permute.xlu0 %2384 }
 0x68e   : > { %4079 = vpow2.f32 %v2149_v20  ;;  %3931 = vmatprep.subr.msk.bf16.mxu0 %vm963_vm1, %v2385_v4  ;;  %v2431_v41 = vsel %vm963_vm1, %v2385_v4, 0  ;;  %v2678_v20 = vpop.permute.xlu1 %2677 }
 0x68f   : > { %4081 = vpow2.f32 %v2151_v11  ;;  %3830 = vmatpush3.bf16.xpose.msra.mxu0 %v2431_v41 }
 0x691   : > { %v2387_v43 = vpop.permute.xlu0 %2386 }
 0x692   : > { %3932 = vmatprep.subr.msk.bf16.mxu0 %vm963_vm1, %v2387_v43  ;;  %v2434_v57 = vsel %vm963_vm1, %v2387_v43, 0 }
 0x695   : > { %v2357_v6 = vpop.permute.xlu0 %2356 }
 0x697   : > { %3832 = vmatpush3.bf16.xpose.msra.mxu0 %v2434_v57 }
 0x698   : > { %v5341_v31 = vpop.eup %4079 }
 0x699   : > { %v5343_v10 = vpop.eup %4081  ;;  %v2361_v21 = vpop.permute.xlu0 %2360  ;;  %v2193_v30 = vpack.c.bf16 %v5341_v31, %v5336_v18 }
 0x69a   : > { %v2194_v28 = vpack.c.bf16 %v5339_v33, %v5343_v10 }
 0x69b   : > { %3813 = vmatprep.mubr.bf16.mxu0 %v2193_v30 }
 0x69c   : > { %3814 = vmatmul.mubr.bf16.gmra.mrb[76].mxu0 %v2194_v28 }
 0x69d   : > { %v2365_v15 = vpop.permute.xlu0 %2364  ;;  %3833 = vmatprep.mubr.msk.bf16.mxu0 %vm963_vm1, %v2357_v6 }
 0x6a1   : > { %v2369_v12 = vpop.permute.xlu0 %2368 }
 0x6a4   : > { %3834 = vmatmul.mubr.msk.bf16.vlgmr.msra.gmra.mrb[80].mxu0 %vm963_vm1, %v2359_v2 }
 0x6a5   : > { %v2670_v47 = vpop.permute.xlu0 %2669  ;;  %3837 = vmatprep.mubr.msk.bf16.mxu0 %vm963_vm1, %v2361_v21 }
 0x6a6   : > { %3849 = vmatprep.subr.bf16.mxu1 %v2670_v47 }
 0x6a7   : > { %3850 = vmatpush3.bf16.msra.mxu1 %v2670_v47 }
 0x6a8   : > { %3851 = vmatprep.subr.bf16.mxu1 %v2672_v19 }
 0x6a9   : > { %v2674_v32 = vpop.permute.xlu0 %2673 }
 0x6ab   : > { %3852 = vmatpush3.bf16.msra.mxu1 %v2672_v19 }
 0x6ac   : > { %3838 = vmatmul.mubr.msk.bf16.gmra.mrb[84].mxu0 %vm963_vm1, %v2363_v48  ;;  %3853 = vmatprep.subr.bf16.mxu1 %v2674_v32 }
 0x6ad   : > { %3841 = vmatprep.mubr.msk.bf16.mxu0 %vm963_vm1, %v2365_v15  ;;  %v2676_v11 = vpop.permute.xlu0 %2675 }
 0x6af   : > { %3854 = vmatpush3.bf16.msra.mxu1 %v2674_v32 }
 0x6b0   : > { %3855 = vmatprep.subr.bf16.mxu1 %v2676_v11 }
 0x6b1   : > { %v2680_v4 = vpop.permute.xlu0 %2679 }
 0x6b3   : > { %3856 = vmatpush3.bf16.msra.mxu1 %v2676_v11 }
 0x6b4   : > { %3842 = vmatmul.mubr.msk.bf16.gmra.mrb[88].mxu0 %vm963_vm1, %v2367_v39  ;;  %3857 = vmatprep.subr.bf16.mxu1 %v2678_v20 }
 0x6b5   : > { %3845 = vmatprep.mubr.msk.bf16.mxu0 %vm963_vm1, %v2369_v12 }
 0x6b7   : > { %3858 = vmatpush3.bf16.msra.mxu1 %v2678_v20 }
 0x6b8   : > { %3859 = vmatprep.subr.bf16.mxu1 %v2680_v4 }
 0x6bb   : > { %3860 = vmatpush3.bf16.msra.mxu1 %v2680_v4 }
 0x6bc   : > { %3846 = vmatmul.mubr.msk.bf16.gmra.mrb[92].mxu0 %vm963_vm1, %v2371_v44 }
 0x728   : > { %v5357_v41 = vpop.f32.mrb[64].mxu0 }
 0x729   : > { %5915 = vst [vmem:[#allocation43_spill] sm:$0xff] %v5357_v41  ;;  %v5359_v2 = vpop.f32.mrb[65].mxu0 }
 0x72a   : > { %5916 = vst [vmem:[#allocation44_spill] sm:$0xff] %v5359_v2  ;;  %v5361_v43 = vpop.f32.mrb[66].mxu0 }
 0x72b   : > { %5917 = vst [vmem:[#allocation45_spill] sm:$0xff] %v5361_v43  ;;  %v5363_v48 = vpop.f32.mrb[67].mxu0 }
 0x72c   : > { %5918 = vst [vmem:[#allocation46_spill] sm:$0xff] %v5363_v48 }
 0x730   : > { %v5365_v6 = vpop.f32.mrb[68].mxu0 }
 0x731   : > { %5919 = vst [vmem:[#allocation47_spill] sm:$0xff] %v5365_v6  ;;  %v5367_v57 = vpop.f32.mrb[69].mxu0 }
 0x732   : > { %5920 = vst [vmem:[#allocation48_spill] sm:$0xff] %v5367_v57  ;;  %v5369_v21 = vpop.f32.mrb[70].mxu0 }
 0x733   : > { %5921 = vst [vmem:[#allocation49_spill] sm:$0xff] %v5369_v21  ;;  %v5371_v30 = vpop.f32.mrb[71].mxu0 }
 0x734   : > { %5922 = vst [vmem:[#allocation50_spill] sm:$0xff] %v5371_v30 }
 0x73d   : > { %v5373_v28 = vpop.f32.mrb[72].mxu0 }
 0x73e   : > { %5923 = vst [vmem:[#allocation51_spill] sm:$0xff] %v5373_v28  ;;  %v5375_v39 = vpop.f32.mrb[73].mxu0 }
 0x73f   : > { %5924 = vst [vmem:[#allocation52_spill] sm:$0xff] %v5375_v39  ;;  %v5377_v15 = vpop.f32.mrb[74].mxu0 }
 0x740   : > { %5925 = vst [vmem:[#allocation53_spill] sm:$0xff] %v5377_v15  ;;  %v5379_v44 = vpop.f32.mrb[75].mxu0 }
 0x741   : > { %5926 = vst [vmem:[#allocation54_spill] sm:$0xff] %v5379_v44 }
 0x76f   : > { %v5381_v12 = vpop.f32.mrb[76].mxu0 }
 0x770   : > { %5927 = vst [vmem:[#allocation55_spill] sm:$0xff] %v5381_v12  ;;  %v5383_v47 = vpop.f32.mrb[77].mxu0 }
 0x771   : > { %5928 = vst [vmem:[#allocation56_spill] sm:$0xff] %v5383_v47  ;;  %v5385_v19 = vpop.f32.mrb[78].mxu0 }
 0x772   : > { %5929 = vst [vmem:[#allocation57_spill] sm:$0xff] %v5385_v19  ;;  %v5387_v32 = vpop.f32.mrb[79].mxu0 }
 0x773   : > { %5930 = vst [vmem:[#allocation58_spill] sm:$0xff] %v5387_v32 }
 0x777   : > { %v3835_v11 = vpop.f32.mrb[80].mxu0 }
 0x778   : > { %v5391_v20 = vsel %vm938_vm2, %v3835_v11, -1e+30  ;;  %v2470_v4 = vpop.f32.mrb[81].mxu0 }
 0x779   : > { %v5395_v28 = vsel %vm938_vm2, %v2470_v4, -1e+30  ;;  %2553 = vmax.xlane.f32.xlu1 %v5391_v20  ;;  %v3836_v15 = vpop.f32.mrb[82].mxu0 }
 0x77a   : > { %2549 = vmax.xlane.f32.xlu0 %v5395_v28  ;;  %v2473_v12 = vpop.f32.mrb[83].mxu0  ;;  %v5401_v19 = vsel %vm938_vm2, %v3836_v15, -1e+30 }
 0x77b   : > { %v5406_v11 = vsel %vm938_vm2, %v2473_v12, -1e+30 }
 0x77d   : > { %2555 = vmax.xlane.f32.xlu1 %v5401_v19 }
 0x77f   : > { %v3839_v32 = vpop.f32.mrb[84].mxu0 }
 0x780   : > { %v2486_v47 = vpop.f32.mrb[85].mxu0  ;;  %v5416_v15 = vsel %vm938_vm2, %v3839_v32, -1e+30 }
 0x781   : > { %v5410_v4 = vsel %vm938_vm2, %v2486_v47, -1e+30  ;;  %2551 = vmax.xlane.f32.xlu1 %v5406_v11  ;;  %v3840_v44 = vpop.f32.mrb[86].mxu0 }
 0x782   : > { %2557 = vmax.xlane.f32.xlu0 %v5410_v4  ;;  %v2489_v39 = vpop.f32.mrb[87].mxu0  ;;  %v5421_v12 = vsel %vm938_vm2, %v3840_v44, -1e+30 }
 0x783   : > { %v5431_v32 = vsel %vm938_vm2, %v2489_v39, -1e+30 }
 0x785   : > { %2561 = vmax.xlane.f32.xlu1 %v5416_v15 }
 0x787   : > { %v3843_v21 = vpop.f32.mrb[88].mxu0 }
 0x788   : > { %v2502_v6 = vpop.f32.mrb[89].mxu0 }
 0x789   : > { %2563 = vmax.xlane.f32.xlu1 %v5421_v12  ;;  %v3844_v47 = vpop.f32.mrb[90].mxu0 }
 0x78a   : > { %v5426_v30 = vsel %vm938_vm2, %v3844_v47, -1e+30  ;;  %v2505_v57 = vpop.f32.mrb[91].mxu0  ;;  %v5441_v47 = vsel %vm938_vm2, %v3843_v21, -1e+30 }
 0x78b   : > { %2571 = vmax.xlane.f32.xlu0 %v5426_v30  ;;  %v5436_v44 = vsel %vm938_vm2, %v2505_v57, -1e+30  ;;  %v5451_v57 = vsel %vm938_vm2, %v2502_v6, -1e+30 }
 0x78d   : > { %2559 = vmax.xlane.f32.xlu1 %v5431_v32 }
 0x78f   : > { %2567 = vmax.xlane.f32.xlu0 %v5436_v44  ;;  %v3847_v43 = vpop.f32.mrb[92].mxu0 }
 0x790   : > { %v2518_v41 = vpop.f32.mrb[93].mxu0 }
 0x791   : > { %2569 = vmax.xlane.f32.xlu1 %v5441_v47  ;;  %v3848_v48 = vpop.f32.mrb[94].mxu0  ;;  %v5463_v36 = vsel %vm938_vm2, %v2518_v41, -1e+30 }
 0x792   : > { %v5446_v39 = vsel %vm938_vm2, %v3848_v48, -1e+30  ;;  %v2521_v2 = vpop.f32.mrb[95].mxu0  ;;  %v4264_v48 = vld [vmem:[#allocation4 + $0x38] sm:$0xff] }
 0x793   : > { %2579 = vmax.xlane.f32.xlu0 %v5446_v39  ;;  %v5456_v21 = vsel %vm938_vm2, %v2521_v2, -1e+30  ;;  %v5469_v2 = vsel %vm938_vm2, %v3847_v43, -1e+30 }
 0x795   : > { %2565 = vmax.xlane.f32.xlu1 %v5451_v57 }
 0x797   : > { %2575 = vmax.xlane.f32.xlu0 %v5456_v21 }
 0x7a6   : > { %2681 = vrot.lane.b32.xlu1 %v4263_v24, %s4291_s21 }
 0x7ad   : > { %2683 = vrot.lane.b32.xlu0 %v4264_v48, %s4291_s21 }
 0x7ca   : > { %2573 = vmax.xlane.f32.xlu1 %v5463_v36 }
 0x7cc   : > { %1675 = vadd.xlane.f32.xlu0 %v5037_v61 }
 0x7ce   : > { %2577 = vmax.xlane.f32.xlu1 %v5469_v2 }
 0x7d0   : > { %1681 = vadd.xlane.f32.xlu0 %v5056_v42 }
 0x7d2   : > { %1673 = vadd.xlane.f32.xlu1 %v5039_v58 }
 0x7d4   : > { %1685 = vadd.xlane.f32.xlu0 %v5063_v55 }
 0x7d6   : > { %1677 = vadd.xlane.f32.xlu1 %v5043_v54 }
 0x7d8   : > { %2163 = vadd.xlane.f32.xlu0 %v5290_v63 }
 0x7da   : > { %1679 = vadd.xlane.f32.xlu1 %v5045_v8 }
 0x7dc   : > { %2167 = vadd.xlane.f32.xlu0 %v5297_v46 }
 0x7de   : > { %2155 = vadd.xlane.f32.xlu1 %v5273_v49 }
 0x7e0   : > { %1689 = vadd.xlane.f32.xlu0 %v5073_v59 }
 0x7e2   : > { %2157 = vadd.xlane.f32.xlu1 %v5271_v17 }
 0x7e4   : > { %1693 = vadd.xlane.f32.xlu0 %v5081_v51 }
 0x7e6   : > { %2159 = vadd.xlane.f32.xlu1 %v5277_v52 }
 0x7e8   : > { %2171 = vadd.xlane.f32.xlu0 %v5307_v37 }
 0x7ea   : > { %2161 = vadd.xlane.f32.xlu1 %v5279_v22 }
 0x7ec   : > { %2175 = vadd.xlane.f32.xlu0 %v5315_v60 }
 0x7ee   : > { %1683 = vadd.xlane.f32.xlu1 %v5054_v34 }
 0x7f0   : > { %1697 = vadd.xlane.f32.xlu0 %v5102_v23 }
 0x7f2   : > { %1687 = vadd.xlane.f32.xlu1 %v5065_v56 }
 0x7f4   : > { %1701 = vadd.xlane.f32.xlu0 %v5109_v0 }
 0x7f6   : > { %2165 = vadd.xlane.f32.xlu1 %v5288_v38 }
 0x7f8   : > { %2179 = vadd.xlane.f32.xlu0 %v5336_v18 }
 0x7fa   : > { %2169 = vadd.xlane.f32.xlu1 %v5299_v53 }
 0x7fc   : > { %2183 = vadd.xlane.f32.xlu0 %v5343_v10 }
 0x7fe   : > { %1691 = vadd.xlane.f32.xlu1 %v5077_v7 }
 0x800   : > { %1207 = vadd.xlane.f32.xlu0 %v4777_v13 }
 0x802   : > { %1695 = vadd.xlane.f32.xlu1 %v5075_v29 }
 0x804   : > { %1211 = vadd.xlane.f32.xlu0 %v4783_v3 }
 0x806   : > { %2173 = vadd.xlane.f32.xlu1 %v5311_v14  ;;  %v2554_v62 = vpop.xlane.xlu1 %2553 }
 0x807   : > { %v2583_v24 = vsub.f32 %v5391_v20, %v2554_v62  ;;  %v2550_v61 = vpop.xlane.xlu0 %2549 }
 0x808   : > { %1215 = vadd.xlane.f32.xlu0 %v4807_v35  ;;  %v2581_v54 = vsub.f32 %v5395_v28, %v2550_v61 }
 0x809   : > { %v2601_v58 = vmul.f32 1.442695, %v2583_v24 }
 0x80a   : > { %2177 = vadd.xlane.f32.xlu1 %v5309_v27  ;;  %v2556_v8 = vpop.xlane.xlu1 %2555  ;;  %v2597_v13 = vmul.f32 1.442695, %v2581_v54 }
 0x80b   : > { %4083 = vpow2.f32 %v2601_v58  ;;  %v2584_v23 = vsub.f32 %v5401_v19, %v2556_v8 }
 0x80c   : > { %1219 = vadd.xlane.f32.xlu0 %v4809_v25  ;;  %4085 = vpow2.f32 %v2597_v13 }
 0x80d   : > { %v2603_v49 = vmul.f32 1.442695, %v2584_v23 }
 0x80e   : > { %1699 = vadd.xlane.f32.xlu1 %v5107_v50  ;;  %v2552_v3 = vpop.xlane.xlu1 %2551 }
 0x80f   : > { %v2582_v34 = vsub.f32 %v5406_v11, %v2552_v3  ;;  %v2558_v42 = vpop.xlane.xlu0 %2557 }
 0x810   : > { %v2585_v56 = vsub.f32 %v5410_v4, %v2558_v42  ;;  %v5931_v42 = vld [vmem:[#allocation9_spill] sm:$0xff] }
 0x811   : > { %v2599_v55 = vmul.f32 1.442695, %v2582_v34 }
 0x812   : > { %1703 = vadd.xlane.f32.xlu1 %v5105_v1  ;;  %v2562_v35 = vpop.xlane.xlu1 %2561  ;;  %v2605_v51 = vmul.f32 1.442695, %v2585_v56  ;;  %v5932_v56 = vld [vmem:[#allocation8_spill] sm:$0xff] }
 0x813   : > { %4087 = vpow2.f32 %v2599_v55  ;;  %v2587_v59 = vsub.f32 %v5416_v15, %v2562_v35 }
 0x815   : > { %v4084_v29 = vpop.eup %4083  ;;  %v2609_v7 = vmul.f32 1.442695, %v2587_v59 }
 0x816   : > { %2181 = vadd.xlane.f32.xlu1 %v5341_v31  ;;  %2633 = vadd.xlane.f32.xlu0 %v4084_v29  ;;  %v2564_v25 = vpop.xlane.xlu1 %2563  ;;  %v4086_v17 = vpop.eup %4085 }
 0x817   : > { %4089 = vpow2.f32 %v2609_v7  ;;  %v2588_v37 = vsub.f32 %v5421_v12, %v2564_v25 }
 0x818   : > { %v2572_v50 = vpop.xlane.xlu0 %2571  ;;  %4091 = vpow2.f32 %v2605_v51 }
 0x819   : > { %4093 = vpow2.f32 %v2603_v49  ;;  %v2611_v31 = vmul.f32 1.442695, %v2588_v37  ;;  %v2592_v20 = vsub.f32 %v5426_v30, %v2572_v50  ;;  %v5933_v49 = vld [vmem:[#allocation28_spill] sm:$0xff] }
 0x81a   : > { %2185 = vadd.xlane.f32.xlu1 %v5339_v33  ;;  %v2560_v1 = vpop.xlane.xlu1 %2559 }
 0x81b   : > { %v2586_v0 = vsub.f32 %v5431_v32, %v2560_v1 }
 0x81c   : > { %v2568_v52 = vpop.xlane.xlu0 %2567 }
 0x81d   : > { %v4088_v22 = vpop.eup %4087  ;;  %v2607_v38 = vmul.f32 1.442695, %v2586_v0  ;;  %v2590_v33 = vsub.f32 %v5436_v44, %v2568_v52 }
 0x81e   : > { %1209 = vadd.xlane.f32.xlu1 %v4781_v5  ;;  %v2570_v63 = vpop.xlane.xlu1 %2569  ;;  %v2661_v46 = vpack.c.bf16 %v4088_v22, %v4086_v17 }
 0x81f   : > { %v2591_v53 = vsub.f32 %v5441_v47, %v2570_v63  ;;  %4095 = vpow2.f32 %v2607_v38  ;;  %v2615_v28 = vmul.f32 1.442695, %v2590_v33  ;;  %v5936_v33 = vld [vmem:[#allocation27_spill] sm:$0xff] }
 0x820   : > { %v2580_v27 = vpop.xlane.xlu0 %2579  ;;  %3865 = vmatprep.mubr.bf16.mxu1 %v2661_v46 }
 0x821   : > { %v4090_v14 = vpop.eup %4089  ;;  %v2617_v60 = vmul.f32 1.442695, %v2591_v53  ;;  %v2596_v62 = vsub.f32 %v5446_v39, %v2580_v27 }
 0x822   : > { %1213 = vadd.xlane.f32.xlu1 %v4779_v16  ;;  %2641 = vadd.xlane.f32.xlu0 %v4090_v14  ;;  %v2566_v18 = vpop.xlane.xlu1 %2565  ;;  %v4092_v41 = vpop.eup %4091 }
 0x823   : > { %4097 = vpow2.f32 %v2617_v60  ;;  %v2589_v5 = vsub.f32 %v5451_v57, %v2566_v18  ;;  %v4094_v19 = vpop.eup %4093  ;;  %v2627_v24 = vmul.f32 1.442695, %v2596_v62  ;;  %v5935_v60 = vld [vmem:[#allocation5_spill] sm:$0xff] }
 0x824   : > { %v2576_v10 = vpop.xlane.xlu0 %2575  ;;  %v2662_v15 = vpack.c.bf16 %v4094_v19, %v4084_v29 }
 0x825   : > { %v2613_v43 = vmul.f32 1.442695, %v2589_v5  ;;  %v2594_v61 = vsub.f32 %v5456_v21, %v2576_v10 }
 0x826   : > { %1217 = vadd.xlane.f32.xlu1 %v4815_v40  ;;  %2637 = vadd.xlane.f32.xlu0 %v4092_v41  ;;  %v2682_v6 = vpop.permute.xlu1 %2681  ;;  %v2619_v40 = vmul.f32 1.442695, %v2592_v20 }
 0x827   : > { %4099 = vpow2.f32 %v2613_v43  ;;  %3861 = vmatprep.subr.bf16.mxu1 %v2682_v6  ;;  %v2623_v58 = vmul.f32 1.442695, %v2594_v61  ;;  %v5943_v61 = vld [vmem:[#allocation43_spill] sm:$0xff] }
 0x828   : > { %4101 = vpow2.f32 %v2611_v31  ;;  %v2684_v16 = vpop.permute.xlu0 %2683  ;;  %3862 = vmatpush3.bf16.msra.mxu1 %v2682_v6  ;;  %v5937_v31 = vld [vmem:[#allocation29_spill] sm:$0xff]  ;;  %v5938_v6 = vld [vmem:[#allocation6_spill] sm:$0xff] }
 0x829   : > { %3863 = vmatprep.subr.bf16.mxu1 %v2684_v16  ;;  %v4096_v11 = vpop.eup %4095  ;;  %4103 = vpow2.f32 %v2615_v28 }
 0x82a   : > { %1221 = vadd.xlane.f32.xlu1 %v4811_v26  ;;  %v2663_v12 = vpack.c.bf16 %v4096_v11, %v4092_v41  ;;  %4105 = vpow2.f32 %v2619_v40 }
 0x82b   : > { %4107 = vpow2.f32 %v2627_v24 }
 0x82c   : > { %3864 = vmatpush3.bf16.msra.mxu1 %v2684_v16  ;;  %4109 = vpow2.f32 %v2623_v58 }
 0x82d   : > { %v4098_v4 = vpop.eup %4097 }
 0x82e   : > { %2629 = vadd.xlane.f32.xlu1 %v4086_v17  ;;  %2649 = vadd.xlane.f32.xlu0 %v4098_v4 }
 0x82f   : > { %3866 = vmatmul.mubr.bf16.vlgmr.msra.gmra.mrb[64].mxu1 %v2662_v15  ;;  %v5940_v15 = vld [vmem:[#allocation44_spill] sm:$0xff] }
 0x830   : > { %3869 = vmatprep.mubr.bf16.mxu1 %v2663_v12  ;;  %v5941_v12 = vld [vmem:[#allocation46_spill] sm:$0xff] }
 0x831   : > { %v4100_v32 = vpop.eup %4099 }
 0x832   : > { %v4102_v44 = vpop.eup %4101  ;;  %2635 = vadd.xlane.f32.xlu1 %v4094_v19  ;;  %2645 = vadd.xlane.f32.xlu0 %v4100_v32 }
 0x833   : > { %v4104_v47 = vpop.eup %4103  ;;  %v2664_v30 = vpack.c.bf16 %v4102_v44, %v4090_v14 }
 0x834   : > { %v2665_v26 = vpack.c.bf16 %v4104_v47, %v4100_v32  ;;  %v4106_v57 = vpop.eup %4105 }
 0x835   : > { %v2666_v48 = vpack.c.bf16 %v4106_v57, %v4098_v4  ;;  %v4108_v54 = vpop.eup %4107 }
 0x836   : > { %2631 = vadd.xlane.f32.xlu1 %v4088_v22  ;;  %v4110_v8 = vpop.eup %4109  ;;  %v5934_v22 = vld [vmem:[#allocation30_spill] sm:$0xff] }
 0x837   : > { %3870 = vmatmul.mubr.bf16.gmra.mrb[68].mxu1 %v2664_v30  ;;  %v5942_v30 = vld [vmem:[#allocation10_spill] sm:$0xff] }
 0x838   : > { %3873 = vmatprep.mubr.bf16.mxu1 %v2665_v26 }
 0x83a   : > { %2643 = vadd.xlane.f32.xlu1 %v4102_v44 }
 0x83e   : > { %2639 = vadd.xlane.f32.xlu1 %v4096_v11  ;;  %v5939_v11 = vld [vmem:[#allocation7_spill] sm:$0xff] }
 0x83f   : > { %3874 = vmatmul.mubr.bf16.gmra.mrb[72].mxu1 %v2666_v48 }
 0x842   : > { %2651 = vadd.xlane.f32.xlu1 %v4106_v57 }
 0x846   : > { %2647 = vadd.xlane.f32.xlu1 %v4104_v47 }
 0x84a   : > { %1225 = vadd.xlane.f32.xlu1 %v4818_v45 }
 0x84e   : > { %1229 = vadd.xlane.f32.xlu1 %v4831_v9 }
 0x852   : > { %2659 = vadd.xlane.f32.xlu1 %v4108_v54 }
 0x856   : > { %2655 = vadd.xlane.f32.xlu1 %v4110_v8 }
 0x857   : > { %v2574_v13 = vpop.xlane.xlu1 %2573 }
 0x858   : > { %v2593_v39 = vsub.f32 %v5463_v36, %v2574_v13 }
 0x859   : > { %v1676_v3 = vpop.xlane.xlu0 %1675 }
 0x85a   : > { %v2621_v34 = vmul.f32 1.442695, %v2593_v39  ;;  %1233 = vadd.xlane.f32.xlu1 %v5931_v42 }
 0x85b   : > { %v2578_v21 = vpop.xlane.xlu1 %2577 }
 0x85c   : > { %4111 = vpow2.f32 %v2621_v34  ;;  %v2595_v55 = vsub.f32 %v5469_v2, %v2578_v21  ;;  %v5945_v21 = vld [vmem:[#allocation32_spill] sm:$0xff] }
 0x85d   : > { %v1682_v35 = vpop.xlane.xlu0 %1681  ;;  %4113 = vrcp.f32 %v1676_v3 }
 0x85e   : > { %v2625_v45 = vmul.f32 1.442695, %v2595_v55  ;;  %1237 = vadd.xlane.f32.xlu1 %v5932_v56 }
 0x85f   : > { %v1674_v9 = vpop.xlane.xlu1 %1673 }
 0x860   : > { %4115 = vpow2.f32 %v2625_v45 }
 0x861   : > { %4117 = vrcp.f32 %v1674_v9  ;;  %v1686_v59 = vpop.xlane.xlu0 %1685 }
 0x863   : > { %v1678_v29 = vpop.xlane.xlu1 %1677 }
 0x864   : > { %4119 = vrcp.f32 %v1678_v29 }
 0x865   : > { %v2164_v7 = vpop.xlane.xlu0 %2163 }
 0x866   : > { %v4112_v36 = vpop.eup %4111 }
 0x867   : > { %v1680_v25 = vpop.xlane.xlu1 %1679  ;;  %v2667_v51 = vpack.c.bf16 %v4110_v8, %v4112_v36  ;;  %v4114_v23 = vpop.eup %4113 }
 0x868   : > { %4121 = vrcp.f32 %v1680_v25  ;;  %v5535_v38 = vmul.f32 %v4114_v23, %v5934_v22 }
 0x869   : > { %v2168_v50 = vpop.xlane.xlu0 %2167  ;;  %3877 = vmatprep.mubr.bf16.mxu1 %v2667_v51  ;;  %v5948_v51 = vld [vmem:[#allocation33_spill] sm:$0xff] }
 0x86a   : > { %v4116_v2 = vpop.eup %4115 }
 0x86b   : > { %v4118_v1 = vpop.eup %4117  ;;  %2657 = vadd.xlane.f32.xlu0 %v4116_v2  ;;  %v2156_v0 = vpop.xlane.xlu1 %2155  ;;  %v2668_v17 = vpack.c.bf16 %v4108_v54, %v4116_v2  ;;  %v5944_v54 = vld [vmem:[#allocation45_spill] sm:$0xff] }
 0x86c   : > { %v5532_v52 = vmul.f32 %v4118_v1, %v5933_v49  ;;  %4123 = vrcp.f32 %v2156_v0  ;;  %v5949_v49 = vld [vmem:[#allocation48_spill] sm:$0xff] }
 0x86d   : > { %v1690_v63 = vpop.xlane.xlu0 %1689  ;;  %3878 = vmatmul.mubr.bf16.gmra.mrb[76].mxu1 %v2668_v17 }
 0x86e   : > { %v1874_v46 = vpack.c.bf16 %v5535_v38, %v5532_v52  ;;  %v4120_v37 = vpop.eup %4119 }
 0x86f   : > { %2653 = vadd.xlane.f32.xlu0 %v4112_v36  ;;  %v2158_v53 = vpop.xlane.xlu1 %2157  ;;  %v1860_v5 = vmul.f32 %v4120_v37, %v5936_v33  ;;  %v5947_v36 = vld [vmem:[#allocation31_spill] sm:$0xff] }
 0x870   : > { %4125 = vrcp.f32 %v2158_v53  ;;  %v5950_v53 = vld [vmem:[#allocation50_spill] sm:$0xff] }
 0x871   : > { %v1694_v27 = vpop.xlane.xlu0 %1693 }
 0x872   : > { %v4122_v14 = vpop.eup %4121 }
 0x873   : > { %1223 = vadd.xlane.f32.xlu0 %v5935_v60  ;;  %v2160_v18 = vpop.xlane.xlu1 %2159  ;;  %v1861_v10 = vmul.f32 %v4122_v14, %v5937_v31  ;;  %v5952_v31 = vld [vmem:[#allocation49_spill] sm:$0xff] }
 0x874   : > { %4127 = vrcp.f32 %v2160_v18 }
 0x875   : > { %v2172_v41 = vpop.xlane.xlu0 %2171  ;;  %v1875_v43 = vpack.c.bf16 %v1861_v10, %v1860_v5 }
 0x876   : > { %v4124_v16 = vpop.eup %4123 }
 0x877   : > { %1227 = vadd.xlane.f32.xlu0 %v5938_v6  ;;  %2840 = vrot.lane.b32.xlu1 %v1875_v43, %s4292_s22  ;;  %v2162_v28 = vpop.xlane.xlu1 %2161  ;;  %v2332_v40 = vmul.f32 %v4124_v16, %v5940_v15  ;;  %v5954_v15 = vld [vmem:[#allocation38_spill] sm:$0xff] }
 0x878   : > { %4129 = vrcp.f32 %v2162_v28 }
 0x879   : > { %v5544_v19 = vpop.xlane.xlu0 %2175  ;;  %4131 = vrcp.f32 %v1682_v35  ;;  %v5946_v35 = vld [vmem:[#allocation34_spill] sm:$0xff] }
 0x87a   : > { %v4126_v20 = vpop.eup %4125 }
 0x87b   : > { %1231 = vadd.xlane.f32.xlu0 %v5939_v11  ;;  %v1684_v4 = vpop.xlane.xlu1 %1683  ;;  %v2333_v32 = vmul.f32 %v4126_v20, %v5941_v12  ;;  %v5953_v11 = vld [vmem:[#allocation36_spill] sm:$0xff] }
 0x87c   : > { %4133 = vrcp.f32 %v1684_v4 }
 0x87d   : > { %v5549_v44 = vpop.xlane.xlu0 %1697  ;;  %v2348_v47 = vpack.c.bf16 %v2333_v32, %v2332_v40  ;;  %4135 = vrcp.f32 %v1686_v59 }
 0x87e   : > { %v4128_v57 = vpop.eup %4127 }
 0x87f   : > { %1235 = vadd.xlane.f32.xlu0 %v5942_v30  ;;  %2862 = vrot.lane.b32.xlu1 %v2348_v47, %s4293_s23  ;;  %v1688_v26 = vpop.xlane.xlu1 %1687  ;;  %v2334_v58 = vmul.f32 %v4128_v57, %v5943_v61  ;;  %v5955_v47 = vld [vmem:[#allocation12_spill] sm:$0xff] }
 0x880   : > { %4137 = vrcp.f32 %v1688_v26  ;;  %v5956_v26 = vld [vmem:[#allocation35_spill] sm:$0xff] }
 0x881   : > { %v5553_v48 = vpop.xlane.xlu0 %1701  ;;  %4139 = vrcp.f32 %v2164_v7 }
 0x882   : > { %v4130_v62 = vpop.eup %4129 }
 0x883   : > { %v2166_v24 = vpop.xlane.xlu1 %2165  ;;  %v2335_v8 = vmul.f32 %v4130_v62, %v5944_v54  ;;  %v4132_v13 = vpop.eup %4131  ;;  %v5957_v62 = vld [vmem:[#allocation37_spill] sm:$0xff] }
 0x884   : > { %4141 = vrcp.f32 %v2166_v24  ;;  %v1862_v55 = vmul.f32 %v4132_v13, %v5945_v21  ;;  %v5960_v21 = vld [vmem:[#allocation54_spill] sm:$0xff] }
 0x885   : > { %v5557_v39 = vpop.xlane.xlu0 %2179  ;;  %v2349_v3 = vpack.c.bf16 %v2335_v8, %v2334_v58  ;;  %4143 = vrcp.f32 %v2168_v50  ;;  %v5958_v58 = vld [vmem:[#allocation11_spill] sm:$0xff] }
 0x886   : > { %v4134_v34 = vpop.eup %4133 }
 0x887   : > { %v2170_v42 = vpop.xlane.xlu1 %2169  ;;  %v1863_v45 = vmul.f32 %v4134_v34, %v5946_v35  ;;  %v4136_v56 = vpop.eup %4135  ;;  %v5959_v34 = vld [vmem:[#allocation52_spill] sm:$0xff] }
 0x888   : > { %4145 = vrcp.f32 %v2170_v42  ;;  %v1864_v25 = vmul.f32 %v4136_v56, %v5947_v36  ;;  %v5962_v36 = vld [vmem:[#allocation51_spill] sm:$0xff] }
 0x889   : > { %v5561_v9 = vpop.xlane.xlu0 %2183  ;;  %v1876_v59 = vpack.c.bf16 %v1863_v45, %v1862_v55  ;;  %4147 = vrcp.f32 %v1690_v63  ;;  %v5961_v45 = vld [vmem:[#allocation16_spill] sm:$0xff] }
 0x88a   : > { %v4138_v29 = vpop.eup %4137 }
 0x88b   : > { %2842 = vrot.lane.b32.xlu1 %v1876_v59, %s4292_s22  ;;  %v1692_v7 = vpop.xlane.xlu1 %1691  ;;  %v1865_v23 = vmul.f32 %v4138_v29, %v5948_v51  ;;  %v4140_v50 = vpop.eup %4139  ;;  %v5963_v51 = vld [vmem:[#allocation53_spill] sm:$0xff] }
 0x88c   : > { %4149 = vrcp.f32 %v1692_v7  ;;  %v2336_v22 = vmul.f32 %v4140_v50, %v5949_v49  ;;  %v5965_v49 = vld [vmem:[#allocation40_spill] sm:$0xff] }
 0x88d   : > { %4151 = vrcp.f32 %v1694_v27  ;;  %v1208_v2 = vpop.xlane.xlu0 %1207  ;;  %v1877_v1 = vpack.c.bf16 %v1865_v23, %v1864_v25  ;;  %v5951_v27 = vld [vmem:[#allocation47_spill] sm:$0xff] }
 0x88e   : > { %v4142_v0 = vpop.eup %4141  ;;  %4153 = vrcp.f32 %v1208_v2 }
 0x88f   : > { %v1696_v17 = vpop.xlane.xlu1 %1695  ;;  %v2337_v37 = vmul.f32 %v4142_v0, %v5950_v53  ;;  %v4144_v63 = vpop.eup %4143  ;;  %v5966_v53 = vld [vmem:[#allocation42_spill] sm:$0xff] }
 0x890   : > { %4155 = vrcp.f32 %v1696_v17  ;;  %v2338_v5 = vmul.f32 %v4144_v63, %v5951_v27 }
 0x891   : > { %4157 = vrcp.f32 %v2172_v41  ;;  %v1212_v14 = vpop.xlane.xlu0 %1211  ;;  %v2350_v60 = vpack.c.bf16 %v2337_v37, %v2336_v22 }
 0x892   : > { %v4146_v18 = vpop.eup %4145  ;;  %4159 = vrcp.f32 %v1212_v14 }
 0x893   : > { %2866 = vrot.lane.b32.xlu1 %v2350_v60, %s4293_s23  ;;  %v2174_v33 = vpop.xlane.xlu1 %2173  ;;  %v2339_v10 = vmul.f32 %v4146_v18, %v5952_v31  ;;  %v4148_v43 = vpop.eup %4147 }
 0x894   : > { %4161 = vrcp.f32 %v2174_v33  ;;  %v1866_v4 = vmul.f32 %v4148_v43, %v5953_v11  ;;  %v5967_v33 = vld [vmem:[#allocation39_spill] sm:$0xff] }
 0x895   : > { %4163 = vrcp.f32 %v5544_v19  ;;  %v1216_v6 = vpop.xlane.xlu0 %1215  ;;  %2838 = vrot.lane.b32.xlu0 %v1874_v46, %s4292_s22  ;;  %v2351_v41 = vpack.c.bf16 %v2339_v10, %v2338_v5  ;;  %v5968_v5 = vld [vmem:[#allocation41_spill] sm:$0xff] }
 0x896   : > { %v4150_v28 = vpop.eup %4149  ;;  %4165 = vrcp.f32 %v1216_v6 }
 0x897   : > { %v4152_v16 = vpop.eup %4151  ;;  %v2178_v20 = vpop.xlane.xlu1 %2177  ;;  %v1867_v40 = vmul.f32 %v4150_v28, %v5954_v15  ;;  %v5969_v28 = vld [vmem:[#allocation56_spill] sm:$0xff] }
 0x898   : > { %v4154_v12 = vpop.eup %4153  ;;  %4167 = vrcp.f32 %v2178_v20  ;;  %v1868_v57 = vmul.f32 %v4152_v16, %v5956_v26  ;;  %v5970_v20 = vld [vmem:[#allocation58_spill] sm:$0xff] }
 0x899   : > { %4169 = vrcp.f32 %v5549_v44  ;;  %v1220_v19 = vpop.xlane.xlu0 %1219  ;;  %2864 = vrot.lane.b32.xlu0 %v2349_v3, %s4293_s23  ;;  %v1878_v32 = vpack.c.bf16 %v1867_v40, %v1866_v4  ;;  %v5581_v52 = vmul.f32 %v4154_v12, %v5955_v47  ;;  %v5971_v12 = vld [vmem:[#allocation55_spill] sm:$0xff]  ;;  %v5973_v26 = vld [vmem:[#allocation14_spill] sm:$0xff] }
 0x89a   : > { %v4156_v38 = vpop.eup %4155  ;;  %4171 = vrcp.f32 %v1220_v19 }
 0x89b   : > { %v4158_v46 = vpop.eup %4157  ;;  %2846 = vrot.lane.b32.xlu1 %v1878_v32, %s4292_s22  ;;  %v1700_v30 = vpop.xlane.xlu1 %1699  ;;  %v1869_v24 = vmul.f32 %v4156_v38, %v5957_v62  ;;  %v5972_v32 = vld [vmem:[#allocation57_spill] sm:$0xff] }
 0x89c   : > { %v4160_v61 = vpop.eup %4159  ;;  %4173 = vrcp.f32 %v1700_v30  ;;  %v5592_v42 = vmul.f32 %v4158_v46, %v5959_v34  ;;  %v5975_v34 = vld [vmem:[#allocation18_spill] sm:$0xff] }
 0x89d   : > { %2844 = vrot.lane.b32.xlu0 %v1877_v1, %s4292_s22  ;;  %v1879_v44 = vpack.c.bf16 %v1869_v24, %v1868_v57  ;;  %v5588_v54 = vmul.f32 %v4160_v61, %v5958_v58  ;;  %4175 = vrcp.f32 %v5553_v48  ;;  %v5964_v1 = vld [vmem:[#allocation15_spill] sm:$0xff] }
 0x89e   : > { %v4162_v8 = vpop.eup %4161 }
 0x89f   : > { %v4164_v13 = vpop.eup %4163  ;;  %v1704_v3 = vpop.xlane.xlu1 %1703  ;;  %v5595_v55 = vmul.f32 %v4162_v8, %v5960_v21 }
 0x8a0   : > { %v4166_v35 = vpop.eup %4165  ;;  %4177 = vrcp.f32 %v1704_v3  ;;  %v5605_v25 = vmul.f32 %v4164_v13, %v5962_v36 }
 0x8a1   : > { %2868 = vrot.lane.b32.xlu0 %v2351_v41, %s4293_s23  ;;  %v5599_v56 = vmul.f32 %v4166_v35, %v5961_v45  ;;  %v2352_v59 = vpack.c.bf16 %v5595_v55, %v5592_v42  ;;  %4179 = vrcp.f32 %v5557_v39 }
 0x8a2   : > { %v4168_v29 = vpop.eup %4167 }
 0x8a3   : > { %v4170_v48 = vpop.eup %4169  ;;  %v2182_v7 = vpop.xlane.xlu1 %2181  ;;  %v5608_v23 = vmul.f32 %v4168_v29, %v5963_v51 }
 0x8a4   : > { %v4172_v50 = vpop.eup %4171  ;;  %4181 = vrcp.f32 %v2182_v7  ;;  %v5618_v22 = vmul.f32 %v4170_v48, %v5965_v49  ;;  %v5976_v48 = vld [vmem:[#allocation17_spill] sm:$0xff] }
 0x8a5   : > { %2848 = vrot.lane.b32.xlu0 %v1879_v44, %s4292_s22  ;;  %v2353_v2 = vpack.c.bf16 %v5608_v23, %v5605_v25  ;;  %v5614_v0 = vmul.f32 %v4172_v50, %v5964_v1  ;;  %4183 = vrcp.f32 %v5561_v9  ;;  %v5974_v44 = vld [vmem:[#allocation13_spill] sm:$0xff]  ;;  %v3986_v1 = vld [vmem:[%s5868_s7 + $0x8] sm:$0xff]  }
 0x8a6   : > { %v4174_v17 = vpop.eup %4173  ;;  %v3985_v50 = vld [vmem:[%s5868_s7] sm:$0xff]  }
 0x8a7   : > { %v2186_v39 = vpop.xlane.xlu1 %2185  ;;  %v5621_v37 = vmul.f32 %v4174_v17, %v5966_v53  ;;  %v4176_v63 = vpop.eup %4175  ;;  %3881 = vmatprep.subr.bf16.mxu1 %v3985_v50 }
 0x8a8   : > { %4185 = vrcp.f32 %v2186_v39  ;;  %v5626_v27 = vmul.f32 %v4176_v63, %v5967_v33  ;;  %3882 = vmatpush3.bf16.msra.mxu1 %v3985_v50 }
 0x8a9   : > { %v1880_v14 = vpack.c.bf16 %v5621_v37, %v5618_v22  ;;  %3883 = vmatprep.subr.bf16.mxu1 %v3986_v1 }
 0x8aa   : > { %v4178_v60 = vpop.eup %4177 }
 0x8ab   : > { %v1210_v18 = vpop.xlane.xlu1 %1209  ;;  %v5629_v31 = vmul.f32 %v4178_v60, %v5968_v5  ;;  %v4180_v9 = vpop.eup %4179 }
 0x8ac   : > { %4187 = vrcp.f32 %v1210_v18  ;;  %v5634_v16 = vmul.f32 %v4180_v9, %v5969_v28  ;;  %3884 = vmatpush3.bf16.msra.mxu1 %v3986_v1  ;;  %v2634_v18 = vpop.xlane.xlu0 %2633  ;;  %v5977_v9 = vld [vmem:[#allocation22_spill] sm:$0xff] }
 0x8ad   : > { %v1881_v10 = vpack.c.bf16 %v5629_v31, %v5626_v27 }
 0x8ae   : > { %v4182_v43 = vpop.eup %4181 }
 0x8af   : > { %v1214_v6 = vpop.xlane.xlu1 %1213  ;;  %v4184_v41 = vpop.eup %4183  ;;  %v5637_v11 = vmul.f32 %v4182_v43, %v5970_v20  ;;  %v5978_v20 = vld [vmem:[#allocation21_spill] sm:$0xff] }
 0x8b0   : > { %4189 = vrcp.f32 %v1214_v6  ;;  %v5642_v19 = vmul.f32 %v4184_v41, %v5971_v12  ;;  %v2642_v6 = vpop.xlane.xlu0 %2641 }
 0x8b1   : > { %v2354_v15 = vpack.c.bf16 %v5637_v11, %v5634_v16 }
 0x8b2   : > { %v4186_v4 = vpop.eup %4185 }
 0x8b3   : > { %v1218_v40 = vpop.xlane.xlu1 %1217  ;;  %v5645_v47 = vmul.f32 %v4186_v4, %v5972_v32 }
 0x8b4   : > { %4191 = vrcp.f32 %v1218_v40  ;;  %v2638_v40 = vpop.xlane.xlu0 %2637 }
 0x8b5   : > { %v2355_v38 = vpack.c.bf16 %v5645_v47, %v5642_v19 }
 0x8b6   : > { %v4188_v46 = vpop.eup %4187 }
 0x8b7   : > { %v1222_v30 = vpop.xlane.xlu1 %1221  ;;  %v5650_v57 = vmul.f32 %v4188_v46, %v5973_v26 }
 0x8b8   : > { %4193 = vrcp.f32 %v1222_v30  ;;  %v5979_v30 = vld [vmem:[#allocation26_spill] sm:$0xff] }
 0x8b9   : > { %v1376_v62 = vpack.c.bf16 %v5650_v57, %v5581_v52 }
 0x8ba   : > { %v4190_v24 = vpop.eup %4189 }
 0x8bb   : > { %v2630_v61 = vpop.xlane.xlu1 %2629  ;;  %v5655_v58 = vmul.f32 %v4190_v24, %v5974_v44  ;;  %v2650_v32 = vpop.xlane.xlu0 %2649 }
 0x8bd   : > { %v1377_v8 = vpack.c.bf16 %v5655_v58, %v5588_v54 }
 0x8be   : > { %v4192_v13 = vpop.eup %4191 }
 0x8bf   : > { %v2636_v3 = vpop.xlane.xlu1 %2635  ;;  %v5660_v21 = vmul.f32 %v4192_v13, %v5975_v34  ;;  %v2646_v24 = vpop.xlane.xlu0 %2645  ;;  %v5980_v13 = vld [vmem:[#allocation25_spill] sm:$0xff] }
 0x8c1   : > { %v1378_v45 = vpack.c.bf16 %v5660_v21, %v5599_v56 }
 0x8c2   : > { %v4194_v35 = vpop.eup %4193 }
 0x8c3   : > { %v2632_v29 = vpop.xlane.xlu1 %2631  ;;  %v5665_v7 = vmul.f32 %v4194_v35, %v5976_v48 }
 0x8c5   : > { %v1379_v36 = vpack.c.bf16 %v5665_v7, %v5614_v0 }
 0x8c7   : > { %v2644_v51 = vpop.xlane.xlu1 %2643 }
 0x8cb   : > { %v2640_v17 = vpop.xlane.xlu1 %2639 }
 0x8cf   : > { %v2652_v39 = vpop.xlane.xlu1 %2651 }
 0x8d3   : > { %v5675_v49 = vpop.xlane.xlu1 %2647 }
 0x8d7   : > { %v1226_v53 = vpop.xlane.xlu1 %1225 }
 0x8d8   : > { %4195 = vrcp.f32 %v1226_v53 }
 0x8db   : > { %v1230_v63 = vpop.xlane.xlu1 %1229 }
 0x8dc   : > { %4197 = vrcp.f32 %v1230_v63 }
 0x8df   : > { %v5677_v60 = vpop.xlane.xlu1 %2659 }
 0x8e2   : > { %v4196_v33 = vpop.eup %4195 }
 0x8e3   : > { %v5679_v5 = vpop.xlane.xlu1 %2655  ;;  %v5682_v43 = vmul.f32 %v4196_v33, %v5977_v9 }
 0x8e6   : > { %v4198_v41 = vpop.eup %4197 }
 0x8e7   : > { %v1234_v28 = vpop.xlane.xlu1 %1233  ;;  %v5685_v4 = vmul.f32 %v4198_v41, %v5978_v20 }
 0x8e8   : > { %4199 = vrcp.f32 %v1234_v28 }
 0x8eb   : > { %v1238_v12 = vpop.xlane.xlu1 %1237 }
 0x8ec   : > { %4201 = vrcp.f32 %v1238_v12 }
 0x8ed   : > { %4203 = vrcp.f32 %v2634_v18 }
 0x8ee   : > { %4205 = vrcp.f32 %v2630_v61 }
 0x8ef   : > { %4207 = vrcp.f32 %v2636_v3 }
 0x8f0   : > { %4209 = vrcp.f32 %v2632_v29 }
 0x8f1   : > { %4211 = vrcp.f32 %v2642_v6 }
 0x8f2   : > { %v4200_v46 = vpop.eup %4199  ;;  %4213 = vrcp.f32 %v2638_v40 }
 0x8f3   : > { %v5688_v26 = vmul.f32 %v4200_v46, %v5979_v30 }
 0x8f6   : > { %v4202_v44 = vpop.eup %4201 }
 0x8f7   : > { %v5691_v34 = vmul.f32 %v4202_v44, %v5980_v13  ;;  %v4204_v1 = vpop.eup %4203 }
 0x8f8   : > { %v5693_v35 = vpop.xlane.xlu0 %2657  ;;  %v4206_v63 = vpop.eup %4205 }
 0x8f9   : > { %v4208_v9 = vpop.eup %4207 }
 0x8fa   : > { %v4210_v28 = vpop.eup %4209 }
 0x8fc   : > { %v5695_v48 = vpop.xlane.xlu0 %2653 }
 0x900   : > { %v1224_v50 = vpop.xlane.xlu0 %1223 }
 0x901   : > { %4215 = vrcp.f32 %v1224_v50 }
 0x902   : > { %4217 = vrcp.f32 %v2644_v51  ;;  %v3867_v53 = vpop.f32.mrb[64].mxu1  ;;  %v4212_v51 = vpop.eup %4211 }
 0x903   : > { %4219 = vrcp.f32 %v2640_v17  ;;  %v2727_v33 = vpop.f32.mrb[65].mxu1  ;;  %v2808_v20 = vmul.f32 %v4204_v1, %v3867_v53  ;;  %v4214_v17 = vpop.eup %4213 }
 0x904   : > { %v3868_v41 = vpop.f32.mrb[66].mxu1  ;;  %v1228_v18 = vpop.xlane.xlu0 %1227  ;;  %v2806_v29 = vmul.f32 %v4206_v63, %v2727_v33 }
 0x905   : > { %v2809_v61 = vmul.f32 %v4208_v9, %v3868_v41  ;;  %4221 = vrcp.f32 %v1228_v18  ;;  %v2730_v3 = vpop.f32.mrb[67].mxu1 }
 0x906   : > { %v2807_v12 = vmul.f32 %v4210_v28, %v2730_v3  ;;  %4223 = vrcp.f32 %v2650_v32  ;;  %v5982_v3 = vld [vmem:[#allocation19_spill] sm:$0xff] }
 0x907   : > { %v2823_v6 = vpack.c.bf16 %v2809_v61, %v2808_v20  ;;  %4225 = vrcp.f32 %v2646_v24  ;;  %v5981_v24 = vld [vmem:[#allocation20_spill] sm:$0xff] }
 0x908   : > { %v2822_v40 = vpack.c.bf16 %v2807_v12, %v2806_v29  ;;  %v1232_v46 = vpop.xlane.xlu0 %1231 }
 0x909   : > { %4227 = vrcp.f32 %v1232_v46  ;;  %2888 = vrot.lane.b32.xlu0 %v2823_v6, %s4294_s28 }
 0x90a   : > { %4229 = vrcp.f32 %v2652_v39  ;;  %v3871_v30 = vpop.f32.mrb[68].mxu1  ;;  %2886 = vrot.lane.b32.xlu1 %v2822_v40, %s4294_s28 }
 0x90b   : > { %v4216_v44 = vpop.eup %4215  ;;  %4231 = vrcp.f32 %v5675_v49  ;;  %v2743_v13 = vpop.f32.mrb[69].mxu1  ;;  %v2812_v33 = vmul.f32 %v4212_v51, %v3871_v30 }
 0x90c   : > { %v4218_v50 = vpop.eup %4217  ;;  %v3872_v32 = vpop.f32.mrb[70].mxu1  ;;  %v5701_v53 = vmul.f32 %v4216_v44, %v5981_v24  ;;  %v2810_v39 = vmul.f32 %v4214_v17, %v2743_v13 }
 0x90d   : > { %v1236_v1 = vpop.xlane.xlu0 %1235  ;;  %v4220_v63 = vpop.eup %4219  ;;  %v2813_v9 = vmul.f32 %v4218_v50, %v3872_v32  ;;  %2872 = vrot.lane.b32.xlu0 %v2353_v2, %s4293_s23 }
 0x90e   : > { %4233 = vrcp.f32 %v1236_v1  ;;  %v2746_v41 = vpop.f32.mrb[71].mxu1  ;;  %v1380_v49 = vpack.c.bf16 %v5682_v43, %v5701_v53  ;;  %2870 = vrot.lane.b32.xlu1 %v2352_v59, %s4293_s23  ;;  %v5983_v59 = vld [vmem:[#allocation24_spill] sm:$0xff] }
 0x90f   : > { %v2811_v18 = vmul.f32 %v4220_v63, %v2746_v41  ;;  %v4222_v28 = vpop.eup %4221  ;;  %v2825_v20 = vpack.c.bf16 %v2813_v9, %v2812_v33  ;;  %v5984_v33 = vld [vmem:[#allocation23_spill] sm:$0xff]  ;;  %4235 = vrcp.f32 %v5677_v60 }
 0x910   : > { %v5714_v29 = vmul.f32 %v4222_v28, %v5982_v3  ;;  %v4224_v12 = vpop.eup %4223  ;;  %4237 = vrcp.f32 %v5679_v5 }
 0x911   : > { %v2824_v61 = vpack.c.bf16 %v2811_v18, %v2810_v39  ;;  %2892 = vrot.lane.b32.xlu0 %v2825_v20, %s4294_s28  ;;  %v4226_v25 = vpop.eup %4225  ;;  %4239 = vrcp.f32 %v5693_v35  ;;  %v2839_v5 = vpop.permute.xlu0 %2838 }
 0x912   : > { %v3875_v23 = vpop.f32.mrb[72].mxu1  ;;  %v1381_v2 = vpack.c.bf16 %v5685_v4, %v5714_v29  ;;  %4241 = vrcp.f32 %v5695_v48  ;;  %v2841_v48 = vpop.permute.xlu1 %2840 }
 0x913   : > { %2890 = vrot.lane.b32.xlu1 %v2824_v61, %s4294_s28  ;;  %v4228_v6 = vpop.eup %4227  ;;  %v2759_v40 = vpop.f32.mrb[73].mxu1  ;;  %v2816_v17 = vmul.f32 %v4224_v12, %v3875_v23  ;;  %v2904_v23 = vsel %vm963_vm1, %v1376_v62, %v2839_v5 }
 0x914   : > { %v4230_v42 = vpop.eup %4229  ;;  %v3876_v55 = vpop.f32.mrb[74].mxu1  ;;  %v5721_v46 = vmul.f32 %v4228_v6, %v5983_v59  ;;  %v2814_v13 = vmul.f32 %v4226_v25, %v2759_v40  ;;  %v2907_v40 = vsel %vm963_vm1, %v1377_v8, %v2841_v48 }
 0x915   : > { %v4232_v51 = vpop.eup %4231  ;;  %v2817_v30 = vmul.f32 %v4230_v42, %v3876_v55  ;;  %v2762_v44 = vpop.f32.mrb[75].mxu1  ;;  %2852 = vrot.lane.b32.xlu0 %v1881_v10, %s4292_s22 }
 0x916   : > { %v2815_v50 = vmul.f32 %v4232_v51, %v2762_v44  ;;  %v1382_v32 = vpack.c.bf16 %v5688_v26, %v5721_v46  ;;  %v2865_v35 = vpop.permute.xlu0 %2864  ;;  %v2863_v28 = vpop.permute.xlu1 %2862  ;;  %v3350_v26 = vld [vmem:[%s5869_s8] ss:$0 sm:$0xff] }
 0x917   : > { %2850 = vrot.lane.b32.xlu1 %v1880_v14, %s4292_s22  ;;  %v2827_v24 = vpack.c.bf16 %v2817_v30, %v2816_v17  ;;  %v2928_v42 = vsel %vm2926_vm4, %v2904_v23, %v2863_v28  ;;  %v2930_v59 = vsel %vm2926_vm4, %v2907_v40, %v2865_v35 }
 0x918   : > { %v4234_v1 = vpop.eup %4233  ;;  %v2826_v63 = vpack.c.bf16 %v2815_v50, %v2814_v13 }
 0x919   : > { %v5734_v9 = vmul.f32 %v4234_v1, %v5984_v33  ;;  %2896 = vrot.lane.b32.xlu0 %v2827_v24, %s4294_s28  ;;  %v4236_v22 = vpop.eup %4235 }
 0x91a   : > { %v4238_v14 = vpop.eup %4237  ;;  %v2845_v18 = vpop.permute.xlu0 %2844 }
 0x91b   : > { %2894 = vrot.lane.b32.xlu1 %v2826_v63, %s4294_s28  ;;  %v1383_v27 = vpack.c.bf16 %v5691_v34, %v5734_v9  ;;  %v4240_v10 = vpop.eup %4239  ;;  %v2843_v20 = vpop.permute.xlu1 %2842  ;;  %v2913_v8 = vsel %vm963_vm1, %v1379_v36, %v2845_v18 }
 0x91c   : > { %v4242_v47 = vpop.eup %4241  ;;  %v2910_v54 = vsel %vm963_vm1, %v1378_v45, %v2843_v20 }
 0x91d   : > { %2876 = vrot.lane.b32.xlu0 %v2355_v38, %s4293_s23 }
 0x91e   : > { %v2869_v61 = vpop.permute.xlu0 %2868 }
 0x91f   : > { %2874 = vrot.lane.b32.xlu1 %v2354_v15, %s4293_s23  ;;  %v2867_v3 = vpop.permute.xlu1 %2866  ;;  %v2934_v44 = vsel %vm2926_vm4, %v2913_v8, %v2869_v61 }
 0x920   : > { %v2932_v58 = vsel %vm2926_vm4, %v2910_v54, %v2867_v3 }
 0x922   : > { %v2849_v12 = vpop.permute.xlu0 %2848 }
 0x923   : > { %v2847_v25 = vpop.permute.xlu1 %2846  ;;  %v2919_v7 = vsel %vm963_vm1, %v1381_v2, %v2849_v12 }
 0x924   : > { %v2916_v0 = vsel %vm963_vm1, %v1380_v49, %v2847_v25 }
 0x940   : > { %v3879_v37 = vpop.f32.mrb[76].mxu1 }
 0x941   : > { %v2775_v31 = vpop.f32.mrb[77].mxu1  ;;  %v2820_v38 = vmul.f32 %v4240_v10, %v3879_v37 }
 0x942   : > { %v3880_v19 = vpop.f32.mrb[78].mxu1  ;;  %v2818_v16 = vmul.f32 %v4242_v47, %v2775_v31 }
 0x943   : > { %v2821_v41 = vmul.f32 %v4236_v22, %v3880_v19  ;;  %v2778_v39 = vpop.f32.mrb[79].mxu1 }
 0x944   : > { %v2819_v11 = vmul.f32 %v4238_v14, %v2778_v39 }
 0x945   : > { %v2829_v15 = vpack.c.bf16 %v2821_v41, %v2820_v38 }
 0x946   : > { %v2828_v60 = vpack.c.bf16 %v2819_v11, %v2818_v16 }
 0x947   : > { %2900 = vrot.lane.b32.xlu0 %v2829_v15, %s4294_s28 }
 0x948   : > { %2898 = vrot.lane.b32.xlu1 %v2828_v60, %s4294_s28 }
 0x97b   : > { %v2889_v6 = vpop.permute.xlu0 %2888 }
 0x97c   : > { %v2887_v55 = vpop.permute.xlu1 %2886  ;;  %v2947_v17 = vsel %vm2943_vm3, %v2930_v59, %v2889_v6 }
 0x97d   : > { %v2945_v51 = vsel %vm2943_vm3, %v2928_v42, %v2887_v55 }
 0x97e   : > { %3885 = vmatprep.mubr.msk.bf16.mxu1 %vm440_vm0, %v2945_v51 }
 0x97f   : > { %v2873_v52 = vpop.permute.xlu0 %2872  ;;  %3886 = vmatmul.mubr.msk.bf16.vlgmr.msra.gmra.mrb[80].mxu1 %vm440_vm0, %v2947_v17 }
 0x980   : > { %v2871_v57 = vpop.permute.xlu1 %2870  ;;  %v2938_v24 = vsel %vm2926_vm4, %v2919_v7, %v2873_v52 }
 0x981   : > { %v2936_v36 = vsel %vm2926_vm4, %v2916_v0, %v2871_v57 }
 0x983   : > { %v2893_v62 = vpop.permute.xlu0 %2892 }
 0x984   : > { %v2951_v50 = vsel %vm2943_vm3, %v2934_v44, %v2893_v62 }
 0x985   : > { %v2891_v30 = vpop.permute.xlu1 %2890 }
 0x986   : > { %v2949_v13 = vsel %vm2943_vm3, %v2932_v58, %v2891_v30 }
 0x987   : > { %3889 = vmatprep.mubr.msk.bf16.mxu1 %vm440_vm0, %v2949_v13  ;;  %v2853_v56 = vpop.permute.xlu0 %2852 }
 0x988   : > { %3890 = vmatmul.mubr.msk.bf16.gmra.mrb[84].mxu1 %vm440_vm0, %v2951_v50  ;;  %v2925_v29 = vsel %vm963_vm1, %v1383_v27, %v2853_v56 }
 0x989   : > { %v2851_v21 = vpop.permute.xlu1 %2850 }
 0x98a   : > { %v2922_v4 = vsel %vm963_vm1, %v1382_v32, %v2851_v21 }
 0x98b   : > { %v2897_v45 = vpop.permute.xlu0 %2896 }
 0x98c   : > { %v2955_v33 = vsel %vm2943_vm3, %v2938_v24, %v2897_v45 }
 0x98d   : > { %v2895_v1 = vpop.permute.xlu1 %2894 }
 0x98e   : > { %v2953_v63 = vsel %vm2943_vm3, %v2936_v36, %v2895_v1 }
 0x98f   : > { %3893 = vmatprep.mubr.msk.bf16.mxu1 %vm440_vm0, %v2953_v63  ;;  %v2877_v43 = vpop.permute.xlu0 %2876 }
 0x990   : > { %3894 = vmatmul.mubr.msk.bf16.gmra.mrb[88].mxu1 %vm440_vm0, %v2955_v33  ;;  %v2942_v37 = vsel %vm2926_vm4, %v2925_v29, %v2877_v43 }
 0x991   : > { %v2875_v53 = vpop.permute.xlu1 %2874 }
 0x992   : > { %v2940_v2 = vsel %vm2926_vm4, %v2922_v4, %v2875_v53 }
 0x9b9   : > { %v2901_v49 = vpop.permute.xlu0 %2900 }
 0x9ba   : > { %v2899_v22 = vpop.permute.xlu1 %2898  ;;  %v2959_v31 = vsel %vm2943_vm3, %v2942_v37, %v2901_v49 }
 0x9bb   : > { %v2957_v14 = vsel %vm2943_vm3, %v2940_v2, %v2899_v22 }
 0x9bc   : > { %3897 = vmatprep.mubr.msk.bf16.mxu1 %vm440_vm0, %v2957_v14 }
 0x9bd   : > { %3898 = vmatmul.mubr.msk.bf16.gmra.mrb[92].mxu1 %vm440_vm0, %v2959_v31 }
 0xa52   : > { %v3887_v34 = vpop.f32.mrb[80].mxu1 }
 0xa53   : > { %v3042_v46 = vadd.f32 %v3887_v34, %v3350_v26  ;;  %v3033_v32 = vpop.f32.mrb[81].mxu1 }
 0xa54   : > { %v3034_v9 = vadd.f32 %v3350_v26, %v3033_v32  ;;  %v3888_v27 = vpop.f32.mrb[82].mxu1 }
 0xa55   : > { %v3383_v10 = vpack.c.bf16 %v3042_v46, %v3042_v46  ;;  %v3045_v19 = vadd.f32 %v3888_v27, %v3350_v26  ;;  %v3036_v47 = vpop.f32.mrb[83].mxu1 }
 0xa56   : > { %v3381_v38 = vpack.c.bf16 %v3034_v9, %v3034_v9  ;;  %v3037_v41 = vadd.f32 %v3350_v26, %v3036_v47 }
 0xa57   : > { %3163 = vst.msk [vmem:[%s5818_s16 + $0x8] sm:$0xf] %vm3160_vm5, %v3383_v10  ;;  %v3384_v39 = vpack.c.bf16 %v3045_v19, %v3045_v19 }
 0xa58   : > { %3161 = vst.msk [vmem:[%s5818_s16] sm:$0xf] %vm3160_vm5, %v3381_v38  ;;  %v3382_v16 = vpack.c.bf16 %v3037_v41, %v3037_v41 }
 0xa59   : > { %3164 = vst.msk [vmem:[%s5818_s16 + $0xc] sm:$0xf] %vm3160_vm5, %v3384_v39 }
 0xa5a   : > { %3162 = vst.msk [vmem:[%s5818_s16 + $0x4] sm:$0xf] %vm3160_vm5, %v3382_v16 }
 0xa5b   : > { %v3891_v11 = vpop.f32.mrb[84].mxu1 }
 0xa5c   : > { %v3058_v15 = vadd.f32 %v3891_v11, %v3350_v26  ;;  %v3049_v60 = vpop.f32.mrb[85].mxu1 }
 0xa5d   : > { %v3050_v5 = vadd.f32 %v3350_v26, %v3049_v60  ;;  %v3892_v35 = vpop.f32.mrb[86].mxu1 }
 0xa5e   : > { %v3387_v48 = vpack.c.bf16 %v3058_v15, %v3058_v15  ;;  %v3061_v18 = vadd.f32 %v3892_v35, %v3350_v26  ;;  %v3052_v28 = vpop.f32.mrb[87].mxu1 }
 0xa5f   : > { %v3385_v20 = vpack.c.bf16 %v3050_v5, %v3050_v5  ;;  %v3053_v61 = vadd.f32 %v3350_v26, %v3052_v28 }
 0xa60   : > { %3167 = vst.msk [vmem:[%s5818_s16 + $0x18] sm:$0xf] %vm3160_vm5, %v3387_v48  ;;  %v3388_v3 = vpack.c.bf16 %v3061_v18, %v3061_v18 }
 0xa61   : > { %3165 = vst.msk [vmem:[%s5818_s16 + $0x10] sm:$0xf] %vm3160_vm5, %v3385_v20  ;;  %v3386_v12 = vpack.c.bf16 %v3053_v61, %v3053_v61 }
 0xa62   : > { %3168 = vst.msk [vmem:[%s5818_s16 + $0x1c] sm:$0xf] %vm3160_vm5, %v3388_v3 }
 0xa63   : > { %3166 = vst.msk [vmem:[%s5818_s16 + $0x14] sm:$0xf] %vm3160_vm5, %v3386_v12  ;;  %v3895_v25 = vpop.f32.mrb[88].mxu1 }
 0xa64   : > { %v3074_v23 = vadd.f32 %v3895_v25, %v3350_v26  ;;  %v3065_v6 = vpop.f32.mrb[89].mxu1 }
 0xa65   : > { %v3066_v40 = vadd.f32 %v3350_v26, %v3065_v6  ;;  %v3896_v42 = vpop.f32.mrb[90].mxu1 }
 0xa66   : > { %v3391_v55 = vpack.c.bf16 %v3074_v23, %v3074_v23  ;;  %v3077_v59 = vadd.f32 %v3896_v42, %v3350_v26  ;;  %v3068_v51 = vpop.f32.mrb[91].mxu1 }
 0xa67   : > { %v3389_v17 = vpack.c.bf16 %v3066_v40, %v3066_v40  ;;  %v3069_v52 = vadd.f32 %v3350_v26, %v3068_v51 }
 0xa68   : > { %3171 = vst.msk [vmem:[%s5818_s16 + $0x28] sm:$0xf] %vm3160_vm5, %v3391_v55  ;;  %v3392_v57 = vpack.c.bf16 %v3077_v59, %v3077_v59 }
 0xa69   : > { %3169 = vst.msk [vmem:[%s5818_s16 + $0x20] sm:$0xf] %vm3160_vm5, %v3389_v17  ;;  %v3390_v54 = vpack.c.bf16 %v3069_v52, %v3069_v52 }
 0xa6a   : > { %3172 = vst.msk [vmem:[%s5818_s16 + $0x2c] sm:$0xf] %vm3160_vm5, %v3392_v57 }
 0xa6b   : > { %3170 = vst.msk [vmem:[%s5818_s16 + $0x24] sm:$0xf] %vm3160_vm5, %v3390_v54 }
 0xa90   : > { %v3899_v62 = vpop.f32.mrb[92].mxu1 }
 0xa91   : > { %v3090_v58 = vadd.f32 %v3899_v62, %v3350_v26  ;;  %v3081_v8 = vpop.f32.mrb[93].mxu1 }
 0xa92   : > { %v3082_v30 = vadd.f32 %v3350_v26, %v3081_v8  ;;  %v3900_v44 = vpop.f32.mrb[94].mxu1 }
 0xa93   : > { %v3395_v13 = vpack.c.bf16 %v3090_v58, %v3090_v58  ;;  %v3093_v50 = vadd.f32 %v3900_v44, %v3350_v26  ;;  %v3084_v56 = vpop.f32.mrb[95].mxu1 }
 0xa94   : > { %v3393_v21 = vpack.c.bf16 %v3082_v30, %v3082_v30  ;;  %v3085_v0 = vadd.f32 %v3350_v26, %v3084_v56 }
 0xa95   : > { %3175 = vst.msk [vmem:[%s5818_s16 + $0x38] sm:$0xf] %vm3160_vm5, %v3395_v13  ;;  %v3396_v45 = vpack.c.bf16 %v3093_v50, %v3093_v50 }
 0xa96   : > { %3173 = vst.msk [vmem:[%s5818_s16 + $0x30] sm:$0xf] %vm3160_vm5, %v3393_v21  ;;  %v3394_v7 = vpack.c.bf16 %v3085_v0, %v3085_v0 }
 0xa97   : > { %3176 = vst.msk [vmem:[%s5818_s16 + $0x3c] sm:$0xf] %vm3160_vm5, %v3396_v45 }
 0xa98   : > { %3174 = vst.msk [vmem:[%s5818_s16 + $0x34] sm:$0xf] %vm3160_vm5, %v3394_v7 }
 0xa99 PF: > { %s19_s11 = sadd.s32 1, %s4287_s11   ;;  %s5985_s30 = smov %s4283_s10 }
 0xa9a   : > { %p16_p5 = scmp.ge.s32.totalorder %s19_s11, 4   ;;  %s5986_s10 = smov %s5988_s12 }
 0xa9c   :  { %18 = sbr.rel (!%p16_p5) target bundleno = 2 (0x2), region = 91 }

</bundles_post_ra>
